<compile_context>
chip_gen: v7x
topology: tpu7x:2x2x1
jax: 0.10.0
libtpu: 0.0.40
codegen_flags: <defaults>
</compile_context>

<pallas_src>
import functools

import jax
import jax.numpy as jnp
from jax.experimental import pallas as pl
from jax.experimental.pallas import tpu as pltpu

HIDDEN = 1024  # hidden width of linear1 / linear2 (matches the PyTorch module)
LANE = 128     # TPU lane width: feature dims are padded to multiples of this


def _round_up(x, m):
    return ((x + m - 1) // m) * m


def _default_epilogue_dtype():
    """bf16 bias-add/ReLU on chips with a bf16 VALU (v6e/v7x); f32 on <=v5."""
    try:
        kind = jax.devices()[0].device_kind.lower()
    except Exception:  # pragma: no cover - detection failure -> safe default
        return jnp.float32
    for old in ("v2", "v3", "v4", "v5"):
        if old in kind:
            return jnp.float32
    return jnp.bfloat16


def _mlp_kernel(x_ref, w1_ref, b1_ref, w2_ref, b2_ref, w3_ref, b3_ref, o_ref):
    w1 = w1_ref[...]
    w2 = w2_ref[...]
    w3 = w3_ref[...]
    b1 = b1_ref[...]
    b2 = b2_ref[...]
    # layer 1: x @ W1 + b1, ReLU   (bf16 MXU inputs, f32 accumulation, bias/ReLU in b1.dtype)
    h = jnp.dot(x_ref[...].astype(w1.dtype), w1, preferred_element_type=jnp.float32)
    h = jnp.maximum(h.astype(b1.dtype) + b1, 0).astype(w2.dtype)
    # layer 2: h @ W2 + b2, ReLU
    h = jnp.dot(h, w2, preferred_element_type=jnp.float32)
    h = jnp.maximum(h.astype(b2.dtype) + b2, 0).astype(w3.dtype)
    # layer 3: h @ W3 + b3 (no activation); final bias add stays f32
    out = jnp.dot(h, w3, preferred_element_type=jnp.float32)
    o_ref[...] = (out + b3_ref[...]).astype(o_ref.dtype)


def prepare_params(params, weight_dtype=jnp.bfloat16, epilogue_dtype=None):
    """One-time weight prep: cast weights to bf16 and zero-pad the input/output feature
    dims up to multiples of 128 so every matmul and the final store are lane-dense.
    Hidden-layer biases are stored in the epilogue dtype (bf16 on v6e/v7x, f32 on <=v5);
    the final bias stays f32."""
    if epilogue_dtype is None:
        epilogue_dtype = _default_epilogue_dtype()
    w1, b1, w2, b2, w3, b3 = params
    input_size = w1.shape[0]
    output_size = w3.shape[1]
    pin = _round_up(input_size, LANE)
    pout = _round_up(output_size, LANE)

    w1p = jnp.zeros((pin, HIDDEN), weight_dtype).at[:input_size, :].set(
        w1.astype(weight_dtype))
    w3p = jnp.zeros((HIDDEN, pout), weight_dtype).at[:, :output_size].set(
        w3.astype(weight_dtype))
    b3p = jnp.zeros((1, pout), jnp.float32).at[:, :output_size].set(
        b3.astype(jnp.float32))

    return (w1p,
            b1.astype(epilogue_dtype),
            w2.astype(weight_dtype),
            b2.astype(epilogue_dtype),
            w3p,
            b3p)


@functools.partial(jax.jit, static_argnames=("output_size", "tm"))
def prediction_model_quadruped_forward(state, prepared, output_size, *, tm=None):
    """Forward pass. state: [batch, input_size] (f32 or bf16); prepared from prepare_params()."""
    w1, b1, w2, b2, w3, b3 = prepared
    batch, input_size = state.shape
    pin = w1.shape[0]    # input_size padded to a multiple of 128
    pout = w3.shape[1]   # output_size padded to a multiple of 128

    # Pad the feature axis of the state to match the zero-padded W1 rows.
    if pin != input_size:
        state = jnp.pad(state, ((0, 0), (0, pin - input_size)))

    # Batch-tile selection (static: derived from static shapes).
    if tm is None:
        if batch <= 256:
            # tiny / inference batch: one grid step, no per-step loop overhead
            tm = max(8, _round_up(batch, 8))
        else:
            # ~512-row tiles amortize the ~0.35us per-grid-step overhead; always keep
            # >= 2 grid steps (v7x megacore sharding of the "parallel" axis); round the
            # tile to the batch so we don't burn MXU work on padded zero rows.
            num_steps = max(2, -(-batch // 512))          # ceil(batch / 512), >= 2
            tm = _round_up(-(-batch // num_steps), 8)     # ceil(batch / num_steps) -> x8
    padded_b = _round_up(batch, tm)
    if padded_b != batch:
        state = jnp.pad(state, ((0, padded_b - batch), (0, 0)))

    grid = (padded_b // tm,)

    # Weights / biases: constant index_map => fetched once; single-buffer them to free
    # ~2.6 MiB of dead double-buffer VMEM.
    resident = pl.Buffered(1)

    out = pl.pallas_call(
        _mlp_kernel,
        out_shape=jax.ShapeDtypeStruct((padded_b, pout), jnp.float32),
        grid_spec=pltpu.PrefetchScalarGridSpec(
            num_scalar_prefetch=0,
            grid=grid,
            in_specs=[
                pl.BlockSpec((tm, pin), lambda i: (i, 0)),          # x tile (streamed)
                pl.BlockSpec((pin, HIDDEN), lambda i: (0, 0),       # W1 (bf16, resident)
                             pipeline_mode=resident),
                pl.BlockSpec((1, HIDDEN), lambda i: (0, 0),         # b1
                             pipeline_mode=resident),
                pl.BlockSpec((HIDDEN, HIDDEN), lambda i: (0, 0),    # W2 (bf16, resident)
                             pipeline_mode=resident),
                pl.BlockSpec((1, HIDDEN), lambda i: (0, 0),         # b2
                             pipeline_mode=resident),
                pl.BlockSpec((HIDDEN, pout), lambda i: (0, 0),      # W3 (bf16, lane-padded)
                             pipeline_mode=resident),
                pl.BlockSpec((1, pout), lambda i: (0, 0),           # b3 (f32, lane-padded)
                             pipeline_mode=resident),
            ],
            out_specs=pl.BlockSpec((tm, pout), lambda i: (i, 0)),
        ),
        compiler_params=pltpu.CompilerParams(
            dimension_semantics=("parallel",),
            vmem_limit_bytes=32 << 20,  # footprint <= ~16 MiB even at tm=1024; safe on v7x
        ),
    )(state, w1, b1, w2, b2, w3, b3)

    return out[:batch, :output_size]


def init_params(key, input_size, output_size):
    """Deterministic init mirroring nn.Linear's U(-1/sqrt(fan_in), 1/sqrt(fan_in)).
    Weights are stored as [in_features, out_features] (transposed vs. PyTorch)."""
    def linear(k, fan_in, fan_out):
        kw, kb = jax.random.split(k)
        bound = 1.0 / jnp.sqrt(fan_in)
        w = jax.random.uniform(kw, (fan_in, fan_out), jnp.float32, -bound, bound)
        b = jax.random.uniform(kb, (1, fan_out), jnp.float32, -bound, bound)
        return w, b

    k1, k2, k3 = jax.random.split(key, 3)
    w1, b1 = linear(k1, input_size, HIDDEN)
    w2, b2 = linear(k2, HIDDEN, HIDDEN)
    w3, b3 = linear(k3, HIDDEN, output_size)
    return (w1, b1, w2, b2, w3, b3)


def reference_forward(state, params, weight_dtype=jnp.bfloat16, epilogue_dtype=None):
    """Pure-JAX reference mirroring the kernel math (bf16 matmul inputs, f32 accumulate,
    epilogue in the same dtype the kernel uses). Note: bf16 weights/epilogue are a
    deliberate accuracy trade-off vs. the pure-f32 PyTorch model."""
    if epilogue_dtype is None:
        epilogue_dtype = _default_epilogue_dtype()
    w1, b1, w2, b2, w3, b3 = params

    def mm(a, w):
        return jnp.dot(a.astype(weight_dtype), w.astype(weight_dtype),
                       preferred_element_type=jnp.float32)

    h = jnp.maximum(mm(state, w1).astype(epilogue_dtype) + b1.astype(epilogue_dtype), 0)
    h = jnp.maximum(mm(h, w2).astype(epilogue_dtype) + b2.astype(epilogue_dtype), 0)
    return mm(h, w3) + b3.astype(jnp.float32)


if __name__ == "__main__":
    key = jax.random.PRNGKey(0)
    k_param, k_state = jax.random.split(key)

    batch = 2
    input_size = 32
    output_size = 16

    params = init_params(k_param, input_size, output_size)
    prepared = prepare_params(params)  # one-time bf16 cast + 128-lane padding
    state = jax.random.normal(k_state, (batch, input_size), jnp.float32)

    out = prediction_model_quadruped_forward(state, prepared, output_size)
    out = jax.block_until_ready(out)

    ref = reference_forward(state, params)
    assert out.shape == (batch, output_size), out.shape
    assert jnp.allclose(out, ref.astype(jnp.float32), atol=1e-2, rtol=1e-2), \
        "mismatch vs JAX reference"

    print("KERNEL_OK")
</pallas_src>

<mosaic_0001>
module attributes {stable_mosaic.version = 11 : i64} {
  func.func @_mlp_kernel(%arg0: i32, %arg1: memref<8x128xf32, #tpu.memory_space<vmem>>, %arg2: memref<128x1024xbf16, #tpu.memory_space<vmem>>, %arg3: memref<1x1024xbf16, #tpu.memory_space<vmem>>, %arg4: memref<1024x1024xbf16, #tpu.memory_space<vmem>>, %arg5: memref<1x1024xbf16, #tpu.memory_space<vmem>>, %arg6: memref<1024x128xbf16, #tpu.memory_space<vmem>>, %arg7: memref<1x128xf32, #tpu.memory_space<vmem>>, %arg8: memref<8x128xf32, #tpu.memory_space<vmem>>) attributes {dimension_semantics = [#tpu.dimension_semantics<parallel>], iteration_bounds = array<i64: 1>, scalar_prefetch = 0 : i64, scratch_operands = 0 : i64, tpu.core_type = #tpu.core_type<tc>, window_params = [{transform_indices = @transform_0, window_bounds = array<i64: 8, 128>}, {pipeline_mode = #tpu.pipeline_mode<synchronous>, transform_indices = @transform_1, window_bounds = array<i64: 128, 1024>}, {pipeline_mode = #tpu.pipeline_mode<synchronous>, transform_indices = @transform_2, window_bounds = array<i64: 1, 1024>}, {pipeline_mode = #tpu.pipeline_mode<synchronous>, transform_indices = @transform_3, window_bounds = array<i64: 1024, 1024>}, {pipeline_mode = #tpu.pipeline_mode<synchronous>, transform_indices = @transform_4, window_bounds = array<i64: 1, 1024>}, {pipeline_mode = #tpu.pipeline_mode<synchronous>, transform_indices = @transform_5, window_bounds = array<i64: 1024, 128>}, {pipeline_mode = #tpu.pipeline_mode<synchronous>, transform_indices = @transform_6, window_bounds = array<i64: 1, 128>}, {transform_indices = @transform_7, window_bounds = array<i64: 8, 128>}]} {
    %c0 = arith.constant 0 : index
    %c0_0 = arith.constant 0 : index
    %0 = vector.load %arg2[%c0, %c0_0] : memref<128x1024xbf16, #tpu.memory_space<vmem>>, vector<128x1024xbf16>
    %c0_1 = arith.constant 0 : index
    %c0_2 = arith.constant 0 : index
    %1 = vector.load %arg4[%c0_1, %c0_2] : memref<1024x1024xbf16, #tpu.memory_space<vmem>>, vector<1024x1024xbf16>
    %c0_3 = arith.constant 0 : index
    %c0_4 = arith.constant 0 : index
    %2 = vector.load %arg6[%c0_3, %c0_4] : memref<1024x128xbf16, #tpu.memory_space<vmem>>, vector<1024x128xbf16>
    %c0_5 = arith.constant 0 : index
    %c0_6 = arith.constant 0 : index
    %3 = vector.load %arg3[%c0_5, %c0_6] : memref<1x1024xbf16, #tpu.memory_space<vmem>>, vector<1x1024xbf16>
    %c0_7 = arith.constant 0 : index
    %c0_8 = arith.constant 0 : index
    %4 = vector.load %arg5[%c0_7, %c0_8] : memref<1x1024xbf16, #tpu.memory_space<vmem>>, vector<1x1024xbf16>
    %c0_9 = arith.constant 0 : index
    %c0_10 = arith.constant 0 : index
    %5 = vector.load %arg1[%c0_9, %c0_10] : memref<8x128xf32, #tpu.memory_space<vmem>>, vector<8x128xf32>
    %6 = arith.truncf %5 : vector<8x128xf32> to vector<8x128xbf16>
    %cst = arith.constant dense<0.000000e+00> : vector<8x1024xf32>
    %7 = tpu.matmul %6, %0, %cst {dimension_numbers = #tpu.dot_dimension_numbers<[1], [0], [0], [1], [0, 0, 1, 1], [], []>} : vector<8x128xbf16>, vector<128x1024xbf16>, vector<8x1024xf32> -> vector<8x1024xf32>
    %8 = arith.truncf %7 : vector<8x1024xf32> to vector<8x1024xbf16>
    %9 = vector.broadcast %3 : vector<1x1024xbf16> to vector<8x1024xbf16>
    %10 = arith.addf %8, %9 : vector<8x1024xbf16>
    %cst_11 = arith.constant 0.000000e+00 : bf16
    %11 = vector.broadcast %cst_11 : bf16 to vector<8x1024xbf16>
    %12 = arith.maximumf %10, %11 : vector<8x1024xbf16>
    %cst_12 = arith.constant dense<0.000000e+00> : vector<8x1024xf32>
    %13 = tpu.matmul %12, %1, %cst_12 {dimension_numbers = #tpu.dot_dimension_numbers<[1], [0], [0], [1], [0, 0, 1, 1], [], []>} : vector<8x1024xbf16>, vector<1024x1024xbf16>, vector<8x1024xf32> -> vector<8x1024xf32>
    %14 = arith.truncf %13 : vector<8x1024xf32> to vector<8x1024xbf16>
    %15 = vector.broadcast %4 : vector<1x1024xbf16> to vector<8x1024xbf16>
    %16 = arith.addf %14, %15 : vector<8x1024xbf16>
    %cst_13 = arith.constant 0.000000e+00 : bf16
    %17 = vector.broadcast %cst_13 : bf16 to vector<8x1024xbf16>
    %18 = arith.maximumf %16, %17 : vector<8x1024xbf16>
    %cst_14 = arith.constant dense<0.000000e+00> : vector<8x128xf32>
    %19 = tpu.matmul %18, %2, %cst_14 {dimension_numbers = #tpu.dot_dimension_numbers<[1], [0], [0], [1], [0, 0, 1, 1], [], []>} : vector<8x1024xbf16>, vector<1024x128xbf16>, vector<8x128xf32> -> vector<8x128xf32>
    %c0_15 = arith.constant 0 : index
    %c0_16 = arith.constant 0 : index
    %20 = vector.load %arg7[%c0_15, %c0_16] : memref<1x128xf32, #tpu.memory_space<vmem>>, vector<1x128xf32>
    %21 = vector.broadcast %20 : vector<1x128xf32> to vector<8x128xf32>
    %22 = arith.addf %19, %21 : vector<8x128xf32>
    %c0_17 = arith.constant 0 : index
    %c0_18 = arith.constant 0 : index
    %23 = vector.load %arg8[%c0_17, %c0_18] : memref<8x128xf32, #tpu.memory_space<vmem>>, vector<8x128xf32>
    tpu.vector_store %arg8[%c0_17, %c0_18], %22 {strides = array<i32>} : memref<8x128xf32, #tpu.memory_space<vmem>>, vector<8x128xf32>,
    return
  }
  func.func @transform_0(%arg0: i32) -> (i32, i32) {
    %c0_i32 = arith.constant 0 : i32
    %c0_i32_0 = arith.constant 0 : i32
    return %arg0, %c0_i32 : i32, i32
  }
  func.func @transform_1(%arg0: i32) -> (i32, i32) {
    %c0_i32 = arith.constant 0 : i32
    %c0_i32_0 = arith.constant 0 : i32
    %c0_i32_1 = arith.constant 0 : i32
    return %c0_i32, %c0_i32_0 : i32, i32
  }
  func.func @transform_2(%arg0: i32) -> (i32, i32) {
    %c0_i32 = arith.constant 0 : i32
    %c0_i32_0 = arith.constant 0 : i32
    %c0_i32_1 = arith.constant 0 : i32
    return %c0_i32, %c0_i32_0 : i32, i32
  }
  func.func @transform_3(%arg0: i32) -> (i32, i32) {
    %c0_i32 = arith.constant 0 : i32
    %c0_i32_0 = arith.constant 0 : i32
    %c0_i32_1 = arith.constant 0 : i32
    return %c0_i32, %c0_i32_0 : i32, i32
  }
  func.func @transform_4(%arg0: i32) -> (i32, i32) {
    %c0_i32 = arith.constant 0 : i32
    %c0_i32_0 = arith.constant 0 : i32
    %c0_i32_1 = arith.constant 0 : i32
    return %c0_i32, %c0_i32_0 : i32, i32
  }
  func.func @transform_5(%arg0: i32) -> (i32, i32) {
    %c0_i32 = arith.constant 0 : i32
    %c0_i32_0 = arith.constant 0 : i32
    %c0_i32_1 = arith.constant 0 : i32
    return %c0_i32, %c0_i32_0 : i32, i32
  }
  func.func @transform_6(%arg0: i32) -> (i32, i32) {
    %c0_i32 = arith.constant 0 : i32
    %c0_i32_0 = arith.constant 0 : i32
    %c0_i32_1 = arith.constant 0 : i32
    return %c0_i32, %c0_i32_0 : i32, i32
  }
  func.func @transform_7(%arg0: i32) -> (i32, i32) {
    %c0_i32 = arith.constant 0 : i32
    %c0_i32_0 = arith.constant 0 : i32
    return %arg0, %c0_i32 : i32, i32
  }
}

</mosaic_0001>

<bundles_post_ra>
// kernel: prediction_model_quadruped_forward.1
= control target key start
LH: loop header
LB: loop body
LE: loop exit
PB: predicated region body
PF: predicated region fallthrough
CT: control target
= control target key end

     0   :  { %12 = vsyncpa [#allocation3], 0  ;;  %s6644_s0 = inlined_call_operand.vmem [shape: f32[8,128], index: 0, kind: input, shape index: {}]   ;;  %s6645_s1 = inlined_call_operand.hbm [shape: bf16[128,1024], index: 1, kind: input, shape index: {}]   ;;  %s6646_s2 = inlined_call_operand.hbm [shape: bf16[1,1024], index: 2, kind: input, shape index: {}]   ;;  %s6647_s3 = inlined_call_operand.hbm [shape: bf16[1024,1024], index: 3, kind: input, shape index: {}]   ;;  %s6648_s4 = inlined_call_operand.hbm [shape: bf16[1,1024], index: 4, kind: input, shape index: {}]   ;;  %s6649_s5 = inlined_call_operand.hbm [shape: bf16[1024,128], index: 5, kind: input, shape index: {}]   ;;  %s6650_s6 = inlined_call_operand.hbm [shape: f32[1,128], index: 6, kind: input, shape index: {}]   ;;  %s6651_s7 = inlined_call_operand.vmem [shape: f32[8,128], index: 7, kind: output, shape index: {}]  }
   0x1   :  { %13 = vsyncpa [#allocation5], 0 }
   0x2   :  { %14 = vsyncpa [#allocation8], 0 }
   0x3   :  { %15 = vsyncpa [#allocation11], 0  ;;  %s6326_s24 = smov [#allocation4]   ;;  %s6327_s26 = smov [#allocation7]  }
   0x4   :  { %s36_s25 = sshll.u32 %s6326_s24, 4  ;;  %s58_s27 = sshll.u32 %s6327_s26, 4  ;;  %s37_s25 = int_to_ptr.vmem [resolvable:$true] %s36_s25  ;;  %s59_s27 = int_to_ptr.vmem [resolvable:$true] %s58_s27 }
   0x5   :  { %s6186_s30 = scalar_lea.hbm %s6646_s2, 128 }
   0x6   :  { %p6187_p0 = scmp.ne.s32.totalorder %s6646_s2, %s6186_s30  ;;  %p6190_p1 = scmp.lt.u32.totalorder %s6186_s30, %s6646_s2 }
   0x8   :  { %p6192_p2 = pnand %p6190_p1, %p6187_p0 }
   0xa   :  { %6195 = shalt.err (!%p6192_p2)
}
   0xb   :  { %s6196_s12 = scalar_lea.vmem %s37_s25, 128  ;;  %p6201_p4 = scmp.lt.s32.totalorder %s37_s25, %s37_s25 }
   0xc   :  { %p6197_p3 = scmp.ne.s32.totalorder %s37_s25, %s6196_s12  ;;  %p6202_p5 = scmp.lt.s32.totalorder %s6196_s12, %s6196_s12 }
   0xe   :  { %p6203_p6 = por %p6202_p5, %p6201_p4 }
  0x10   :  { %p6204_p7 = pnand %p6203_p6, %p6197_p3 }
  0x12   :  { %6207 = shalt.err (!%p6204_p7)
}
  0x13   :  { %39 = dma.hbm_to_vmem [thread:$0]  %s6646_s2, 128, %s37_s25, [#allocation5]  }
  0x14   :  { %s6208_s17 = scalar_lea.hbm %s6648_s4, 128 }
  0x15   :  { %p6209_p8 = scmp.ne.s32.totalorder %s6648_s4, %s6208_s17  ;;  %p6212_p9 = scmp.lt.u32.totalorder %s6208_s17, %s6648_s4 }
  0x17   :  { %p6214_p10 = pnand %p6212_p9, %p6209_p8 }
  0x19   :  { %6217 = shalt.err (!%p6214_p10)
}
  0x1a   :  { %s6218_s22 = scalar_lea.vmem %s59_s27, 128  ;;  %p6223_p12 = scmp.lt.s32.totalorder %s59_s27, %s59_s27 }
  0x1b   :  { %p6219_p11 = scmp.ne.s32.totalorder %s59_s27, %s6218_s22  ;;  %p6224_p13 = scmp.lt.s32.totalorder %s6218_s22, %s6218_s22 }
  0x1d   :  { %p6225_p0 = por %p6224_p13, %p6223_p12 }
  0x1f   :  { %p6226_p1 = pnand %p6225_p0, %p6219_p11 }
  0x21   :  { %6229 = shalt.err (!%p6226_p1)
}
  0x22   :  { %61 = dma.hbm_to_vmem [thread:$0]  %s6648_s4, 128, %s59_s27, [#allocation8]  }
  0x23   :  { %s6328_s24 = smov [#allocation2]   ;;  %s6230_s29 = scalar_lea.hbm %s6645_s1, 8192 }
  0x24   :  { %s23_s25 = sshll.u32 %s6328_s24, 4  ;;  %p6231_p2 = scmp.ne.s32.totalorder %s6645_s1, %s6230_s29  ;;  %s24_s25 = int_to_ptr.vmem [resolvable:$true] %s23_s25 }
  0x25   :  { %p6234_p3 = scmp.lt.u32.totalorder %s6230_s29, %s6645_s1 }
  0x27   :  { %p6236_p4 = pnand %p6234_p3, %p6231_p2 }
  0x29   :  { %6239 = shalt.err (!%p6236_p4)
}
  0x2a   :  { %s6240_s11 = scalar_lea.vmem %s24_s25, 8192  ;;  %p6245_p6 = scmp.lt.s32.totalorder %s24_s25, %s24_s25 }
  0x2b   :  { %p6241_p5 = scmp.ne.s32.totalorder %s24_s25, %s6240_s11  ;;  %p6246_p7 = scmp.lt.s32.totalorder %s6240_s11, %s6240_s11 }
  0x2d   :  { %p6247_p8 = por %p6246_p7, %p6245_p6 }
  0x2f   :  { %p6248_p9 = pnand %p6247_p8, %p6241_p5 }
  0x31   :  { %6251 = shalt.err (!%p6248_p9)
}
  0x32   :  { %s6329_s4 = smov 512   ;;  %s6330_s27 = smov 32  }
  0x33   :  { %29 = dma.hbm_to_vmem [thread:$0]  %s6645_s1, 8192, %s24_s25, [#allocation3], %s6329_s4, %s6329_s4, %s6330_s27  }
  0x34   :  { %s6331_s14 = smov [#allocation6]   ;;  %s6332_s16 = smov [#allocation9]  }
  0x35   :  { %s45_s15 = sshll.u32 %s6331_s14, 4  ;;  %s67_s17 = sshll.u32 %s6332_s16, 4  ;;  %s46_s15 = int_to_ptr.vmem [resolvable:$true] %s45_s15  ;;  %s68_s17 = int_to_ptr.vmem [resolvable:$true] %s67_s17 }
  0x36   :  { %s6252_s20 = scalar_lea.hbm %s6647_s3, 65536 }
  0x37   :  { %p6253_p10 = scmp.ne.s32.totalorder %s6647_s3, %s6252_s20  ;;  %p6256_p11 = scmp.lt.u32.totalorder %s6252_s20, %s6647_s3 }
  0x39   :  { %p6258_p12 = pnand %p6256_p11, %p6253_p10 }
  0x3b   :  { %6261 = shalt.err (!%p6258_p12)
}
  0x3c   :  { %s6262_s1 = scalar_lea.vmem %s46_s15, 65536  ;;  %p6267_p0 = scmp.lt.s32.totalorder %s46_s15, %s46_s15 }
  0x3d   :  { %p6263_p13 = scmp.ne.s32.totalorder %s46_s15, %s6262_s1  ;;  %p6268_p1 = scmp.lt.s32.totalorder %s6262_s1, %s6262_s1 }
  0x3f   :  { %p6269_p2 = por %p6268_p1, %p6267_p0 }
  0x41   :  { %p6270_p3 = pnand %p6269_p2, %p6263_p13 }
  0x43   :  { %6273 = shalt.err (!%p6270_p3)
}
  0x44   :  { %51 = dma.hbm_to_vmem [thread:$0]  %s6647_s3, 65536, %s46_s15, [#allocation5], %s6329_s4, %s6329_s4, %s6330_s27  }
  0x45   :  { %s6274_s29 = scalar_lea.hbm %s6649_s5, 8192 }
  0x46   :  { %p6275_p4 = scmp.ne.s32.totalorder %s6649_s5, %s6274_s29  ;;  %p6278_p5 = scmp.lt.u32.totalorder %s6274_s29, %s6649_s5 }
  0x48   :  { %p6280_p6 = pnand %p6278_p5, %p6275_p4 }
  0x4a   :  { %6283 = shalt.err (!%p6280_p6)
}
  0x4b   :  { %s6284_s11 = scalar_lea.vmem %s68_s17, 8192  ;;  %p6289_p8 = scmp.lt.s32.totalorder %s68_s17, %s68_s17 }
  0x4c   :  { %p6285_p7 = scmp.ne.s32.totalorder %s68_s17, %s6284_s11  ;;  %p6290_p9 = scmp.lt.s32.totalorder %s6284_s11, %s6284_s11 }
  0x4e   :  { %p6291_p10 = por %p6290_p9, %p6289_p8 }
  0x50   :  { %p6292_p11 = pnand %p6291_p10, %p6285_p7 }
  0x52   :  { %6295 = shalt.err (!%p6292_p11)
}
  0x53   :  { %s6333_s3 = smov 64   ;;  %s6334_s4 = smov 4  }
  0x54   :  { %73 = dma.hbm_to_vmem [thread:$0]  %s6649_s5, 8192, %s68_s17, [#allocation8], %s6333_s3, %s6333_s3, %s6334_s4  }
  0x55   :  { %s6335_s13 = smov [#allocation10]   ;;  %s6296_s18 = scalar_lea.hbm %s6650_s6, 16 }
  0x56   :  { %s80_s14 = sshll.u32 %s6335_s13, 4  ;;  %p6297_p12 = scmp.ne.s32.totalorder %s6650_s6, %s6296_s18  ;;  %s81_s14 = int_to_ptr.vmem [resolvable:$true] %s80_s14 }
  0x57   :  { %p6300_p13 = scmp.lt.u32.totalorder %s6296_s18, %s6650_s6 }
  0x59   :  { %p6302_p0 = pnand %p6300_p13, %p6297_p12 }
  0x5b   :  { %6305 = shalt.err (!%p6302_p0)
}
  0x5c   :  { %s6306_s2 = scalar_lea.vmem %s81_s14, 16  ;;  %s6310_s5 = scalar_lea.vmem %s81_s14, 32 }
  0x5d   :  { %p6307_p1 = scmp.ne.s32.totalorder %s81_s14, %s6306_s2  ;;  %p6311_p2 = scmp.lt.s32.totalorder %s81_s14, %s81_s14 }
  0x5e   :  { %p6312_p3 = scmp.lt.s32.totalorder %s6310_s5, %s6306_s2 }
  0x60   :  { %p6313_p4 = por %p6312_p3, %p6311_p2 }
  0x62   :  { %p6314_p5 = pnand %p6313_p4, %p6307_p1 }
  0x64   :  { %6317 = shalt.err (!%p6314_p5)
}
  0x65   :  { %83 = dma.hbm_to_vmem [thread:$0]  %s6650_s6, 16, %s81_s14, [#allocation11]  }
  0x66   :  { %6318 = dma.done.wait [#allocation3], 8192  }
  0x67   :  { %6319 = vsyncadd [#allocation3], 4294959104 }
  0x68   :  { %6320 = dma.done.wait [#allocation5], 65664  }
  0x69   :  { %6321 = vsyncadd [#allocation5], 4294901632 }
  0x6a   :  { %6322 = dma.done.wait [#allocation8], 8320  }
  0x6b   :  { %6323 = vsyncadd [#allocation8], 4294958976 }
  0x6c   :  { %6324 = dma.done.wait [#allocation11], 16  }
  0x6d   :  { %6325 = vsyncadd [#allocation11], 4294967280  ;;  %v6336_v0 = vmov 0   ;;  %v103_v1 = vld [vmem:[#allocation2] sm:$0xff]  ;;  %v104_v14 = vld [vmem:[#allocation2 + $0x8] sm:$0xff] }
  0x6e   :  { %1163 = vmatprep.mubr.bf16.mxu0 %v6336_v0  ;;  %1204 = vmatprep.mubr.bf16.mxu1 %v6336_v0  ;;  %v107_v2 = vld [vmem:[#allocation2 + $0x20] sm:$0xff]  ;;  %v108_v15 = vld [vmem:[#allocation2 + $0x28] sm:$0xff]  ;;  %v105_v58 = vld [vmem:[#allocation2 + $0x10] sm:$0xff] }
  0x6f   :  { %v111_v3 = vld [vmem:[#allocation2 + $0x40] sm:$0xff]  ;;  %v5332_v4 = vcombine.high %v103_v1, %v107_v2  ;;  %v5331_v5 = vcombine.low %v103_v1, %v107_v2  ;;  %v112_v16 = vld [vmem:[#allocation2 + $0x48] sm:$0xff]  ;;  %v5334_v18 = vcombine.high %v104_v14, %v108_v15  ;;  %v5333_v19 = vcombine.low %v104_v14, %v108_v15  ;;  %v109_v59 = vld [vmem:[#allocation2 + $0x30] sm:$0xff] }
  0x70   :  { %v115_v6 = vld [vmem:[#allocation2 + $0x60] sm:$0xff]  ;;  %v116_v17 = vld [vmem:[#allocation2 + $0x68] sm:$0xff]  ;;  %v5336_v2 = vcombine.high %v105_v58, %v109_v59  ;;  %v125_v14 = vld [vmem:[#allocation2 + $0xb0] sm:$0xff] }
  0x71   :  { %v5340_v7 = vcombine.high %v111_v3, %v115_v6  ;;  %v119_v8 = vld [vmem:[#allocation2 + $0x80] sm:$0xff]  ;;  %1131 = vmatprep.subr.bf16.mxu0 %v5332_v4  ;;  %v5339_v10 = vcombine.low %v111_v3, %v115_v6  ;;  %v5342_v20 = vcombine.high %v112_v16, %v116_v17  ;;  %v120_v22 = vld [vmem:[#allocation2 + $0x88] sm:$0xff]  ;;  %1172 = vmatprep.subr.bf16.mxu1 %v5334_v18  ;;  %v113_v4 = vld [vmem:[#allocation2 + $0x50] sm:$0xff] }
  0x72   :  { %v123_v9 = vld [vmem:[#allocation2 + $0xa0] sm:$0xff]  ;;  %1132 = vmatpush1.bf16.msra.mxu0 %v5331_v5  ;;  %v124_v23 = vld [vmem:[#allocation2 + $0xa8] sm:$0xff]  ;;  %1173 = vmatpush1.bf16.msra.mxu1 %v5333_v19  ;;  %v5341_v27 = vcombine.low %v112_v16, %v116_v17  ;;  %v117_v5 = vld [vmem:[#allocation2 + $0x70] sm:$0xff] }
  0x73   :  { %1133 = vmatprep.subr.bf16.mxu0 %v5340_v7  ;;  %v5348_v11 = vcombine.high %v119_v8, %v123_v9  ;;  %v127_v12 = vld [vmem:[#allocation2 + $0xc0] sm:$0xff]  ;;  %v5347_v21 = vcombine.low %v119_v8, %v123_v9  ;;  %1174 = vmatprep.subr.bf16.mxu1 %v5342_v20  ;;  %v5350_v28 = vcombine.high %v120_v22, %v124_v23  ;;  %v128_v30 = vld [vmem:[#allocation2 + $0xc8] sm:$0xff]  ;;  %v106_v9 = vld [vmem:[#allocation2 + $0x18] sm:$0xff] }
  0x74   :  { %v131_v13 = vld [vmem:[#allocation2 + $0xe0] sm:$0xff]  ;;  %v132_v31 = vld [vmem:[#allocation2 + $0xe8] sm:$0xff]  ;;  %v5349_v35 = vcombine.low %v120_v22, %v124_v23  ;;  %v5335_v8 = vcombine.low %v105_v58, %v109_v59  ;;  %v5343_v16 = vcombine.low %v113_v4, %v117_v5  ;;  %v114_v17 = vld [vmem:[#allocation2 + $0x58] sm:$0xff] }
  0x75   :  { %v5356_v24 = vcombine.high %v127_v12, %v131_v13  ;;  %v135_v25 = vld [vmem:[#allocation2 + $0x100] sm:$0xff]  ;;  %v5355_v29 = vcombine.low %v127_v12, %v131_v13  ;;  %v5358_v36 = vcombine.high %v128_v30, %v132_v31  ;;  %v136_v38 = vld [vmem:[#allocation2 + $0x108] sm:$0xff]  ;;  %v5357_v43 = vcombine.low %v128_v30, %v132_v31  ;;  %v121_v13 = vld [vmem:[#allocation2 + $0x90] sm:$0xff] }
  0x76   :  { %1134 = vmatpush1.bf16.msra.mxu0 %v5339_v10  ;;  %v139_v26 = vld [vmem:[#allocation2 + $0x120] sm:$0xff]  ;;  %1175 = vmatpush1.bf16.msra.mxu1 %v5341_v27  ;;  %v140_v39 = vld [vmem:[#allocation2 + $0x128] sm:$0xff]  ;;  %v110_v10 = vld [vmem:[#allocation2 + $0x38] sm:$0xff]  ;;  %v5352_v19 = vcombine.high %v121_v13, %v125_v14 }
  0x77   :  { %1135 = vmatprep.subr.bf16.mxu0 %v5348_v11  ;;  %v5364_v32 = vcombine.high %v135_v25, %v139_v26  ;;  %v143_v33 = vld [vmem:[#allocation2 + $0x140] sm:$0xff]  ;;  %1176 = vmatprep.subr.bf16.mxu1 %v5350_v28  ;;  %v5363_v37 = vcombine.low %v135_v25, %v139_v26  ;;  %v5366_v44 = vcombine.high %v136_v38, %v140_v39  ;;  %v144_v46 = vld [vmem:[#allocation2 + $0x148] sm:$0xff]  ;;  %v118_v18 = vld [vmem:[#allocation2 + $0x78] sm:$0xff] }
  0x78   :  { %v147_v34 = vld [vmem:[#allocation2 + $0x160] sm:$0xff]  ;;  %v148_v47 = vld [vmem:[#allocation2 + $0x168] sm:$0xff]  ;;  %v5365_v51 = vcombine.low %v136_v38, %v140_v39  ;;  %v5344_v11 = vcombine.high %v113_v4, %v117_v5  ;;  %v5338_v15 = vcombine.high %v106_v9, %v110_v10  ;;  %v129_v20 = vld [vmem:[#allocation2 + $0xd0] sm:$0xff]  ;;  %v5337_v22 = vcombine.low %v106_v9, %v110_v10 }
  0x79   :  { %v5372_v40 = vcombine.high %v143_v33, %v147_v34  ;;  %v151_v41 = vld [vmem:[#allocation2 + $0x180] sm:$0xff]  ;;  %v5371_v45 = vcombine.low %v143_v33, %v147_v34  ;;  %v5374_v52 = vcombine.high %v144_v46, %v148_v47  ;;  %v152_v54 = vld [vmem:[#allocation2 + $0x188] sm:$0xff]  ;;  %v5373_v57 = vcombine.low %v144_v46, %v148_v47  ;;  %v137_v25 = vld [vmem:[#allocation2 + $0x110] sm:$0xff] }
  0x7a   :  { %1136 = vmatpush1.bf16.msra.mxu0 %v5347_v21  ;;  %v155_v42 = vld [vmem:[#allocation2 + $0x1a0] sm:$0xff]  ;;  %1177 = vmatpush1.bf16.msra.mxu1 %v5349_v35  ;;  %v156_v55 = vld [vmem:[#allocation2 + $0x1a8] sm:$0xff]  ;;  %v133_v21 = vld [vmem:[#allocation2 + $0xf0] sm:$0xff]  ;;  %v5346_v23 = vcombine.high %v114_v17, %v118_v18  ;;  %v5345_v30 = vcombine.low %v114_v17, %v118_v18 }
  0x7b   :  { %1137 = vmatprep.subr.bf16.mxu0 %v5356_v24  ;;  %1178 = vmatprep.subr.bf16.mxu1 %v5358_v36  ;;  %v5380_v48 = vcombine.high %v151_v41, %v155_v42  ;;  %v159_v49 = vld [vmem:[#allocation2 + $0x1c0] sm:$0xff]  ;;  %v5379_v53 = vcombine.low %v151_v41, %v155_v42  ;;  %v5382_v60 = vcombine.high %v152_v54, %v156_v55  ;;  %v160_v63 = vld [vmem:[#allocation2 + $0x1c8] sm:$0xff]  ;;  %v141_v26 = vld [vmem:[#allocation2 + $0x130] sm:$0xff] }
  0x7c   :  { %v163_v50 = vld [vmem:[#allocation2 + $0x1e0] sm:$0xff]  ;;  %v164_v1 = vld [vmem:[#allocation2 + $0x1e8] sm:$0xff]  ;;  %v5381_v3 = vcombine.low %v152_v54, %v156_v55  ;;  %v5351_v24 = vcombine.low %v121_v13, %v125_v14  ;;  %v122_v27 = vld [vmem:[#allocation2 + $0x98] sm:$0xff]  ;;  %v5359_v34 = vcombine.low %v129_v20, %v133_v21  ;;  %v5367_v42 = vcombine.low %v137_v25, %v141_v26 }
  0x7d   :  { %v5388_v56 = vcombine.high %v159_v49, %v163_v50  ;;  %v5387_v61 = vcombine.low %v159_v49, %v163_v50  ;;  %v809_v62 = vld [vmem:[%s6644_s0] sm:$0xff]  ;;  %v5390_v7 = vcombine.high %v160_v63, %v164_v1  ;;  %v5389_v12 = vcombine.low %v160_v63, %v164_v1  ;;  %v126_v28 = vld [vmem:[#allocation2 + $0xb8] sm:$0xff]  ;;  %v145_v35 = vld [vmem:[#allocation2 + $0x150] sm:$0xff] }
  0x7e   :  { %1138 = vmatpush1.bf16.msra.mxu0 %v5355_v29  ;;  %1179 = vmatpush1.bf16.msra.mxu1 %v5357_v43  ;;  %v6455_v6 = vpack.c.bf16 %v809_v62, %v809_v62  ;;  %v5360_v29 = vcombine.high %v129_v20, %v133_v21  ;;  %v130_v31 = vld [vmem:[#allocation2 + $0xd8] sm:$0xff]  ;;  %v5354_v33 = vcombine.high %v122_v27, %v126_v28  ;;  %v149_v36 = vld [vmem:[#allocation2 + $0x170] sm:$0xff]  ;;  %v167_v59 = vld [vmem:[#allocation6] sm:$0xff] }
  0x7f   :  { %1139 = vmatprep.subr.bf16.mxu0 %v5364_v32  ;;  %1180 = vmatprep.subr.bf16.mxu1 %v5366_v44  ;;  %v134_v32 = vld [vmem:[#allocation2 + $0xf8] sm:$0xff]  ;;  %v5353_v38 = vcombine.low %v122_v27, %v126_v28  ;;  %v153_v43 = vld [vmem:[#allocation2 + $0x190] sm:$0xff]  ;;  %v5375_v50 = vcombine.low %v145_v35, %v149_v36  ;;  %v175_v4 = vld [vmem:[#allocation6 + $0x40] sm:$0xff] }
  0x80   :  { %v138_v39 = vld [vmem:[#allocation2 + $0x118] sm:$0xff]  ;;  %v5362_v41 = vcombine.high %v130_v31, %v134_v32  ;;  %v157_v44 = vld [vmem:[#allocation2 + $0x1b0] sm:$0xff]  ;;  %v5361_v46 = vcombine.low %v130_v31, %v134_v32  ;;  %v179_v5 = vld [vmem:[#allocation6 + $0x60] sm:$0xff] }
  0x81   :  { %v146_v47 = vld [vmem:[#allocation2 + $0x158] sm:$0xff]  ;;  %v5383_v58 = vcombine.low %v153_v43, %v157_v44  ;;  %v168_v9 = vld [vmem:[#allocation6 + $0x8] sm:$0xff]  ;;  %v183_v13 = vld [vmem:[#allocation6 + $0x80] sm:$0xff]  ;;  %v5403_v20 = vcombine.low %v175_v4, %v179_v5 }
  0x82   :  { %1140 = vmatpush1.bf16.msra.mxu0 %v5363_v37  ;;  %1181 = vmatpush1.bf16.msra.mxu1 %v5365_v51  ;;  %v5368_v37 = vcombine.high %v137_v25, %v141_v26  ;;  %v161_v51 = vld [vmem:[#allocation2 + $0x1d0] sm:$0xff]  ;;  %v154_v55 = vld [vmem:[#allocation2 + $0x198] sm:$0xff]  ;;  %v187_v14 = vld [vmem:[#allocation6 + $0xa0] sm:$0xff] }
  0x83   :  { %1141 = vmatprep.subr.bf16.mxu0 %v5372_v40  ;;  %1182 = vmatprep.subr.bf16.mxu1 %v5374_v52  ;;  %v142_v40 = vld [vmem:[#allocation2 + $0x138] sm:$0xff]  ;;  %v165_v52 = vld [vmem:[#allocation2 + $0x1f0] sm:$0xff]  ;;  %v191_v21 = vld [vmem:[#allocation6 + $0xc0] sm:$0xff]  ;;  %v5411_v28 = vcombine.low %v183_v13, %v187_v14 }
  0x84   :  { %v5370_v49 = vcombine.high %v138_v39, %v142_v40  ;;  %v5369_v54 = vcombine.low %v138_v39, %v142_v40  ;;  %v162_v63 = vld [vmem:[#allocation2 + $0x1d8] sm:$0xff]  ;;  %v172_v10 = vld [vmem:[#allocation6 + $0x28] sm:$0xff] }
  0x85   :  { %v166_v1 = vld [vmem:[#allocation2 + $0x1f8] sm:$0xff]  ;;  %v176_v17 = vld [vmem:[#allocation6 + $0x48] sm:$0xff] }
  0x86   :  { %1142 = vmatpush1.bf16.msra.mxu0 %v5371_v45  ;;  %1183 = vmatpush1.bf16.msra.mxu1 %v5373_v57  ;;  %v5376_v45 = vcombine.high %v145_v35, %v149_v36  ;;  %v180_v18 = vld [vmem:[#allocation6 + $0x68] sm:$0xff] }
  0x87   :  { %1143 = vmatprep.subr.bf16.mxu0 %v5380_v48  ;;  %1184 = vmatprep.subr.bf16.mxu1 %v5382_v60  ;;  %v150_v48 = vld [vmem:[#allocation2 + $0x178] sm:$0xff]  ;;  %v171_v60 = vld [vmem:[#allocation6 + $0x20] sm:$0xff]  ;;  %v184_v25 = vld [vmem:[#allocation6 + $0x88] sm:$0xff]  ;;  %v5406_v27 = vcombine.high %v176_v17, %v180_v18  ;;  %v5405_v32 = vcombine.low %v176_v17, %v180_v18 }
  0x88   :  { %v5378_v57 = vcombine.high %v146_v47, %v150_v48  ;;  %v5377_v62 = vcombine.low %v146_v47, %v150_v48  ;;  %v188_v26 = vld [vmem:[#allocation6 + $0xa8] sm:$0xff]  ;;  %v251_v17 = vld [vmem:[#allocation6 + $0x2a0] sm:$0xff] }
  0x89   :  { %v5414_v35 = vcombine.high %v184_v25, %v188_v26  ;;  %v5413_v40 = vcombine.low %v184_v25, %v188_v26  ;;  %v259_v25 = vld [vmem:[#allocation6 + $0x2e0] sm:$0xff] }
  0x8a   :  { %1144 = vmatpush1.bf16.msra.mxu0 %v5379_v53  ;;  %1185 = vmatpush1.bf16.msra.mxu1 %v5381_v3  ;;  %v5384_v53 = vcombine.high %v153_v43, %v157_v44  ;;  %v5391_v3 = vcombine.low %v161_v51, %v165_v52  ;;  %v215_v44 = vld [vmem:[#allocation6 + $0x180] sm:$0xff] }
  0x8b   :  { %1145 = vmatprep.subr.bf16.mxu0 %v5388_v56  ;;  %1186 = vmatprep.subr.bf16.mxu1 %v5390_v7  ;;  %v158_v56 = vld [vmem:[#allocation2 + $0x1b8] sm:$0xff]  ;;  %v5396_v7 = vcombine.high %v167_v59, %v171_v60 }
  0x8e   :  { %1146 = vmatpush1.bf16.msra.mxu0 %v5387_v61  ;;  %1187 = vmatpush1.bf16.msra.mxu1 %v5389_v12  ;;  %v5392_v61 = vcombine.high %v161_v51, %v165_v52  ;;  %v5395_v12 = vcombine.low %v167_v59, %v171_v60  ;;  %v212_v51 = vld [vmem:[#allocation6 + $0x168] sm:$0xff] }
  0x8f   :  { %1213 = vmatprep.subr.bf16.mxu0 %v5336_v2  ;;  %1254 = vmatprep.subr.bf16.mxu1 %v5338_v15  ;;  %v5386_v2 = vcombine.high %v154_v55, %v158_v56  ;;  %v5404_v15 = vcombine.high %v175_v4, %v179_v5  ;;  %v220_v59 = vld [vmem:[#allocation6 + $0x1a8] sm:$0xff] }
  0x90   :  { %v228_v4 = vld [vmem:[#allocation6 + $0x1e8] sm:$0xff] }
  0x91   :  { %1164 = vmatmul.mubr.bf16.vlgmr.msra.gmra.mrb[0].mxu0 %v6455_v6  ;;  %1205 = vmatmul.mubr.bf16.vlgmr.msra.gmra.mrb[0].mxu1 %v6455_v6 }
  0x92   :  { %1214 = vmatpush1.bf16.msra.mxu0 %v5335_v8  ;;  %1245 = vmatprep.mubr.bf16.mxu0 %v6336_v0  ;;  %v5385_v8 = vcombine.low %v154_v55, %v158_v56  ;;  %v227_v55 = vld [vmem:[#allocation6 + $0x1e0] sm:$0xff] }
  0x93   :  { %1215 = vmatprep.subr.bf16.mxu0 %v5344_v11  ;;  %1255 = vmatpush1.bf16.msra.mxu1 %v5337_v22  ;;  %v5394_v11 = vcombine.high %v162_v63, %v166_v1  ;;  %v195_v22 = vld [vmem:[#allocation6 + $0xe0] sm:$0xff] }
  0x94   :  { %1286 = vmatprep.mubr.bf16.mxu1 %v6336_v0  ;;  %1256 = vmatprep.subr.bf16.mxu1 %v5346_v23  ;;  %v5412_v23 = vcombine.high %v183_v13, %v187_v14  ;;  %v5420_v31 = vcombine.high %v191_v21, %v195_v22  ;;  %v5419_v36 = vcombine.low %v191_v21, %v195_v22  ;;  %v236_v13 = vld [vmem:[#allocation6 + $0x228] sm:$0xff] }
  0x95   :  { %v244_v21 = vld [vmem:[#allocation6 + $0x268] sm:$0xff] }
  0x96   :  { %1216 = vmatpush1.bf16.msra.mxu0 %v5343_v16  ;;  %v5393_v16 = vcombine.low %v162_v63, %v166_v1  ;;  %v235_v63 = vld [vmem:[#allocation6 + $0x220] sm:$0xff] }
  0x97   :  { %1217 = vmatprep.subr.bf16.mxu0 %v5352_v19  ;;  %1257 = vmatpush1.bf16.msra.mxu1 %v5345_v30  ;;  %v5398_v19 = vcombine.high %v168_v9, %v172_v10  ;;  %v203_v30 = vld [vmem:[#allocation6 + $0x120] sm:$0xff] }
  0x98   :  { %1258 = vmatprep.subr.bf16.mxu1 %v5354_v33  ;;  %v192_v33 = vld [vmem:[#allocation6 + $0xc8] sm:$0xff] }
  0x9a   :  { %1218 = vmatpush1.bf16.msra.mxu0 %v5351_v24  ;;  %v5397_v24 = vcombine.low %v168_v9, %v172_v10  ;;  %v243_v9 = vld [vmem:[#allocation6 + $0x260] sm:$0xff] }
  0x9b   :  { %1219 = vmatprep.subr.bf16.mxu0 %v5360_v29  ;;  %1259 = vmatpush1.bf16.msra.mxu1 %v5353_v38  ;;  %v199_v29 = vld [vmem:[#allocation6 + $0x100] sm:$0xff] }
  0x9c   :  { %1260 = vmatprep.subr.bf16.mxu1 %v5362_v41  ;;  %v211_v38 = vld [vmem:[#allocation6 + $0x160] sm:$0xff]  ;;  %v5428_v39 = vcombine.high %v199_v29, %v203_v30  ;;  %v200_v41 = vld [vmem:[#allocation6 + $0x108] sm:$0xff]  ;;  %v5427_v43 = vcombine.low %v199_v29, %v203_v30 }
  0x9d   :  { %v252_v29 = vld [vmem:[#allocation6 + $0x2a8] sm:$0xff] }
  0x9e   :  { %1220 = vmatpush1.bf16.msra.mxu0 %v5359_v34  ;;  %v196_v34 = vld [vmem:[#allocation6 + $0xe8] sm:$0xff] }
  0x9f   :  { %1221 = vmatprep.subr.bf16.mxu0 %v5368_v37  ;;  %1261 = vmatpush1.bf16.msra.mxu1 %v5361_v46  ;;  %v207_v37 = vld [vmem:[#allocation6 + $0x140] sm:$0xff]  ;;  %v5421_v47 = vcombine.low %v192_v33, %v196_v34 }
  0xa0   :  { %1262 = vmatprep.subr.bf16.mxu1 %v5370_v49  ;;  %v5436_v46 = vcombine.high %v207_v37, %v211_v38  ;;  %v5435_v49 = vcombine.low %v207_v37, %v211_v38  ;;  %v260_v37 = vld [vmem:[#allocation6 + $0x2e8] sm:$0xff] }
  0xa2   :  { %1222 = vmatpush1.bf16.msra.mxu0 %v5367_v42  ;;  %v204_v42 = vld [vmem:[#allocation6 + $0x128] sm:$0xff] }
  0xa3   :  { %1223 = vmatprep.subr.bf16.mxu0 %v5376_v45  ;;  %1263 = vmatpush1.bf16.msra.mxu1 %v5369_v54  ;;  %v219_v45 = vld [vmem:[#allocation6 + $0x1a0] sm:$0xff]  ;;  %v5430_v48 = vcombine.high %v200_v41, %v204_v42 }
  0xa4   :  { %1264 = vmatprep.subr.bf16.mxu1 %v5378_v57  ;;  %v5444_v52 = vcombine.high %v215_v44, %v219_v45  ;;  %v223_v54 = vld [vmem:[#allocation6 + $0x1c0] sm:$0xff]  ;;  %v5443_v57 = vcombine.low %v215_v44, %v219_v45  ;;  %v268_v44 = vld [vmem:[#allocation6 + $0x328] sm:$0xff] }
  0xa5   :  { %v5452_v60 = vcombine.high %v223_v54, %v227_v55 }
  0xa6   :  { %1224 = vmatpush1.bf16.msra.mxu0 %v5375_v50  ;;  %v208_v50 = vld [vmem:[#allocation6 + $0x148] sm:$0xff] }
  0xa7   :  { %1225 = vmatprep.subr.bf16.mxu0 %v5384_v53  ;;  %1265 = vmatpush1.bf16.msra.mxu1 %v5377_v62  ;;  %v5429_v53 = vcombine.low %v200_v41, %v204_v42  ;;  %v5438_v56 = vcombine.high %v208_v50, %v212_v51  ;;  %v231_v62 = vld [vmem:[#allocation6 + $0x200] sm:$0xff] }
  0xa8   :  { %1266 = vmatprep.subr.bf16.mxu1 %v5386_v2  ;;  %v5451_v2 = vcombine.low %v223_v54, %v227_v55  ;;  %v5460_v5 = vcombine.high %v231_v62, %v235_v63  ;;  %v275_v41 = vld [vmem:[#allocation6 + $0x360] sm:$0xff] }
  0xaa   :  { %1226 = vmatpush1.bf16.msra.mxu0 %v5383_v58  ;;  %v216_v58 = vld [vmem:[#allocation6 + $0x188] sm:$0xff] }
  0xab   :  { %1227 = vmatprep.subr.bf16.mxu0 %v5392_v61  ;;  %1267 = vmatpush1.bf16.msra.mxu1 %v5385_v8  ;;  %v5437_v61 = vcombine.low %v208_v50, %v212_v51  ;;  %v5446_v1 = vcombine.high %v216_v58, %v220_v59  ;;  %v239_v8 = vld [vmem:[#allocation6 + $0x240] sm:$0xff]  ;;  %v272_v51 = vld [vmem:[#allocation6 + $0x348] sm:$0xff] }
  0xac   :  { %1268 = vmatprep.subr.bf16.mxu1 %v5394_v11  ;;  %v5459_v11 = vcombine.low %v231_v62, %v235_v63  ;;  %v5468_v14 = vcombine.high %v239_v8, %v243_v9 }
  0xae   :  { %1228 = vmatpush1.bf16.msra.mxu0 %v5391_v3  ;;  %v224_v3 = vld [vmem:[#allocation6 + $0x1c8] sm:$0xff] }
  0xaf   :  { %3985 = vmatprep.subr.bf16.mxu0 %v5396_v7  ;;  %1269 = vmatpush1.bf16.msra.mxu1 %v5393_v16  ;;  %v5445_v7 = vcombine.low %v216_v58, %v220_v59  ;;  %v5454_v10 = vcombine.high %v224_v3, %v228_v4  ;;  %v247_v16 = vld [vmem:[#allocation6 + $0x280] sm:$0xff]  ;;  %v280_v59 = vld [vmem:[#allocation6 + $0x388] sm:$0xff] }
  0xb0   :  { %4149 = vmatprep.subr.bf16.mxu1 %v5398_v19  ;;  %v5467_v19 = vcombine.low %v239_v8, %v243_v9  ;;  %v5476_v22 = vcombine.high %v247_v16, %v251_v17  ;;  %v6469_v8 = vld [vmem:[#allocation6 + $0x428] sm:$0xff] }
  0xb1   :  { %1246 = vmatmul.mubr.bf16.vlgmr.msra.gmra.mrb[4].mxu0 %v6455_v6 }
  0xb2   :  { %3986 = vmatpush1.bf16.msra.mxu0 %v5395_v12  ;;  %1287 = vmatmul.mubr.bf16.vlgmr.msra.gmra.mrb[4].mxu1 %v6455_v6  ;;  %v5422_v6 = vcombine.high %v192_v33, %v196_v34  ;;  %v232_v12 = vld [vmem:[#allocation6 + $0x208] sm:$0xff]  ;;  %v267_v33 = vld [vmem:[#allocation6 + $0x320] sm:$0xff] }
  0xb3   :  { %3987 = vmatprep.subr.bf16.mxu0 %v5404_v15  ;;  %4150 = vmatpush1.bf16.msra.mxu1 %v5397_v24  ;;  %v5453_v15 = vcombine.low %v224_v3, %v228_v4  ;;  %v5462_v18 = vcombine.high %v232_v12, %v236_v13  ;;  %v255_v24 = vld [vmem:[#allocation6 + $0x2c0] sm:$0xff]  ;;  %v6467_v3 = vld [vmem:[#allocation6 + $0x408] sm:$0xff] }
  0xb4   :  { %4151 = vmatprep.subr.bf16.mxu1 %v5406_v27  ;;  %v5475_v27 = vcombine.low %v247_v16, %v251_v17  ;;  %v5484_v30 = vcombine.high %v255_v24, %v259_v25  ;;  %v6337_v16 = vmov 1966171168  }
  0xb5   :  { %v1306_v17 = vunpack.c.l.s4 %v6337_v16 }
  0xb6   :  { %3988 = vmatpush1.bf16.msra.mxu0 %v5403_v20  ;;  %v240_v20 = vld [vmem:[#allocation6 + $0x248] sm:$0xff] }
  0xb7   :  { %3989 = vmatprep.subr.bf16.mxu0 %v5412_v23  ;;  %4152 = vmatpush1.bf16.msra.mxu1 %v5405_v32  ;;  %v5461_v23 = vcombine.low %v232_v12, %v236_v13  ;;  %v5470_v26 = vcombine.high %v240_v20, %v244_v21  ;;  %v263_v32 = vld [vmem:[#allocation6 + $0x300] sm:$0xff] }
  0xb8   :  { %4153 = vmatprep.subr.bf16.mxu1 %v5414_v35  ;;  %v5483_v35 = vcombine.low %v255_v24, %v259_v25  ;;  %v5492_v38 = vcombine.high %v263_v32, %v267_v33 }
  0xba   :  { %3990 = vmatpush1.bf16.msra.mxu0 %v5411_v28  ;;  %v248_v28 = vld [vmem:[#allocation6 + $0x288] sm:$0xff] }
  0xbb   :  { %3991 = vmatprep.subr.bf16.mxu0 %v5420_v31  ;;  %4154 = vmatpush1.bf16.msra.mxu1 %v5413_v40  ;;  %v5469_v31 = vcombine.low %v240_v20, %v244_v21  ;;  %v5478_v34 = vcombine.high %v248_v28, %v252_v29  ;;  %v271_v40 = vld [vmem:[#allocation6 + $0x340] sm:$0xff] }
  0xbc   :  { %4155 = vmatprep.subr.bf16.mxu1 %v5422_v6  ;;  %v5491_v6 = vcombine.low %v263_v32, %v267_v33  ;;  %v5500_v45 = vcombine.high %v271_v40, %v275_v41  ;;  %v5499_v50 = vcombine.low %v271_v40, %v275_v41  ;;  %v303_v41 = vld [vmem:[#allocation6 + $0x440] sm:$0xff] }
  0xbe   :  { %3992 = vmatpush1.bf16.msra.mxu0 %v5419_v36  ;;  %v256_v36 = vld [vmem:[#allocation6 + $0x2c8] sm:$0xff] }
  0xbf   :  { %3993 = vmatprep.subr.bf16.mxu0 %v5428_v39  ;;  %4156 = vmatpush1.bf16.msra.mxu1 %v5421_v47  ;;  %v5477_v39 = vcombine.low %v248_v28, %v252_v29  ;;  %v5486_v42 = vcombine.high %v256_v36, %v260_v37 }
  0xc0   :  { %4157 = vmatprep.subr.bf16.mxu1 %v5430_v48  ;;  %v279_v48 = vld [vmem:[#allocation6 + $0x380] sm:$0xff] }
  0xc2   :  { %3994 = vmatpush1.bf16.msra.mxu0 %v5427_v43  ;;  %v264_v43 = vld [vmem:[#allocation6 + $0x308] sm:$0xff] }
  0xc3   :  { %3995 = vmatprep.subr.bf16.mxu0 %v5436_v46  ;;  %4158 = vmatpush1.bf16.msra.mxu1 %v5429_v53  ;;  %v5485_v46 = vcombine.low %v256_v36, %v260_v37  ;;  %v5494_v47 = vcombine.high %v264_v43, %v268_v44  ;;  %v5493_v54 = vcombine.low %v264_v43, %v268_v44  ;;  %v304_v43 = vld [vmem:[#allocation6 + $0x448] sm:$0xff] }
  0xc4   :  { %4159 = vmatprep.subr.bf16.mxu1 %v5438_v56  ;;  %v287_v56 = vld [vmem:[#allocation6 + $0x3c0] sm:$0xff]  ;;  %v308_v44 = vld [vmem:[#allocation6 + $0x468] sm:$0xff] }
  0xc6   :  { %3996 = vmatpush1.bf16.msra.mxu0 %v5435_v49  ;;  %v283_v49 = vld [vmem:[#allocation6 + $0x3a0] sm:$0xff] }
  0xc7   :  { %3997 = vmatprep.subr.bf16.mxu0 %v5444_v52  ;;  %4160 = vmatpush1.bf16.msra.mxu1 %v5437_v61  ;;  %v276_v52 = vld [vmem:[#allocation6 + $0x368] sm:$0xff]  ;;  %v5508_v53 = vcombine.high %v279_v48, %v283_v49  ;;  %v5507_v58 = vcombine.low %v279_v48, %v283_v49 }
  0xc8   :  { %4161 = vmatprep.subr.bf16.mxu1 %v5446_v1  ;;  %v5502_v55 = vcombine.high %v272_v51, %v276_v52  ;;  %v5501_v62 = vcombine.low %v272_v51, %v276_v52  ;;  %v6463_v1 = vld [vmem:[#allocation6 + $0x400] sm:$0xff] }
  0xc9   :  { %v311_v51 = vld [vmem:[#allocation6 + $0x480] sm:$0xff] }
  0xca   :  { %3998 = vmatpush1.bf16.msra.mxu0 %v5443_v57  ;;  %v291_v57 = vld [vmem:[#allocation6 + $0x3e0] sm:$0xff] }
  0xcb   :  { %3999 = vmatprep.subr.bf16.mxu0 %v5452_v60  ;;  %4162 = vmatpush1.bf16.msra.mxu1 %v5445_v7  ;;  %v284_v60 = vld [vmem:[#allocation6 + $0x3a8] sm:$0xff]  ;;  %v5516_v61 = vcombine.high %v287_v56, %v291_v57  ;;  %v5515_v4 = vcombine.low %v287_v56, %v291_v57 }
  0xcc   :  { %4163 = vmatprep.subr.bf16.mxu1 %v5454_v10  ;;  %v5510_v63 = vcombine.high %v280_v59, %v284_v60  ;;  %v292_v7 = vld [vmem:[#allocation6 + $0x3e8] sm:$0xff]  ;;  %v5509_v12 = vcombine.low %v280_v59, %v284_v60  ;;  %v5533_v60 = vcombine.low %v304_v43, %v308_v44 }
  0xce   :  { %4000 = vmatpush1.bf16.msra.mxu0 %v5451_v2  ;;  %v6465_v2 = vld [vmem:[#allocation6 + $0x420] sm:$0xff] }
  0xcf   :  { %4001 = vmatprep.subr.bf16.mxu0 %v5460_v5  ;;  %4164 = vmatpush1.bf16.msra.mxu1 %v5453_v15  ;;  %v288_v5 = vld [vmem:[#allocation6 + $0x3c8] sm:$0xff]  ;;  %v5523_v9 = vcombine.low %v6463_v1, %v6465_v2  ;;  %v5524_v10 = vcombine.high %v6463_v1, %v6465_v2  ;;  %v5526_v15 = vcombine.high %v6467_v3, %v6469_v8  ;;  %v319_v1 = vld [vmem:[#allocation6 + $0x4c0] sm:$0xff] }
  0xd0   :  { %4165 = vmatprep.subr.bf16.mxu1 %v5462_v18  ;;  %v5518_v13 = vcombine.high %v288_v5, %v292_v7  ;;  %v1308_v18 = vlaneseq  ;;  %v323_v2 = vld [vmem:[#allocation6 + $0x4e0] sm:$0xff] }
  0xd1   :  { %v5547_v16 = vcombine.low %v319_v1, %v323_v2 }
  0xd2   :  { %4002 = vmatpush1.bf16.msra.mxu0 %v5459_v11  ;;  %v5525_v11 = vcombine.low %v6467_v3, %v6469_v8  ;;  %v1309_v20 = vshrl.u32 %v1308_v18, 7  ;;  %v320_v3 = vld [vmem:[#allocation6 + $0x4c8] sm:$0xff] }
  0xd3   :  { %4003 = vmatprep.subr.bf16.mxu0 %v5468_v14  ;;  %4166 = vmatpush1.bf16.msra.mxu1 %v5461_v23  ;;  %v5517_v14 = vcombine.low %v288_v5, %v292_v7 }
  0xd4   :  { %4167 = vmatprep.subr.bf16.mxu1 %v5470_v26  ;;  %v6491_v28 = vsub.s32 0, %v1309_v20 }
  0xd6   :  { %4004 = vmatpush1.bf16.msra.mxu0 %v5467_v19  ;;  %v1307_v19 = vunpack.c.0.s8 %v1306_v17 }
  0xd7   :  { %4005 = vmatprep.subr.bf16.mxu0 %v5476_v22  ;;  %4168 = vmatpush1.bf16.msra.mxu1 %v5469_v31  ;;  %v6481_v22 = vld [vmem:[#allocation4] sm:$0xff] }
  0xd8   :  { %4169 = vmatprep.subr.bf16.mxu1 %v5478_v34  ;;  %v6479_v21 = vsub.s32 %v1307_v19, %v1309_v20  ;;  %v335_v20 = vld [vmem:[#allocation6 + $0x540] sm:$0xff] }
  0xda   :  { %4006 = vmatpush1.bf16.msra.mxu0 %v5475_v27  ;;  %v1311_v23 = vrot.slane %v6481_v22, %v6479_v21 }
  0xdb   :  { %4007 = vmatprep.subr.bf16.mxu0 %v5484_v30  ;;  %4170 = vmatpush1.bf16.msra.mxu1 %v5477_v39 }
  0xdc   :  { %4171 = vmatprep.subr.bf16.mxu1 %v5486_v42  ;;  %v1319_v24 = vcombine.high %v1311_v23, %v1311_v23  ;;  %v6486_v25 = vrot.slane %v1311_v23, %v6479_v21  ;;  %v339_v23 = vld [vmem:[#allocation6 + $0x560] sm:$0xff] }
  0xde   :  { %4008 = vmatpush1.bf16.msra.mxu0 %v5483_v35  ;;  %v1341_v26 = vrot.slane %v1319_v24, %v6479_v21  ;;  %v1354_v27 = vpack.i.b16 %v6486_v25, %v6486_v25  ;;  %v336_v24 = vld [vmem:[#allocation6 + $0x548] sm:$0xff] }
  0xdf   :  { %4009 = vmatprep.subr.bf16.mxu0 %v5492_v38  ;;  %4172 = vmatpush1.bf16.msra.mxu1 %v5485_v46 }
  0xe0   :  { %4173 = vmatprep.subr.bf16.mxu1 %v5494_v47  ;;  %v1361_v29 = vpack.i.b16 %v1341_v26, %v1341_v26  ;;  %v1351_v30 = vcombine.high %v1341_v26, %v1341_v26  ;;  %v1359_v31 = vrot.slane %v1354_v27, %v6491_v28  ;;  %v340_v26 = vld [vmem:[#allocation6 + $0x568] sm:$0xff] }
  0xe2   :  { %4010 = vmatpush1.bf16.msra.mxu0 %v5491_v6  ;;  %v1366_v33 = vrot.slane %v1361_v29, %v6491_v28  ;;  %v1375_v38 = vpack.i.b16 %v1351_v30, %v1351_v30  ;;  %v307_v6 = vld [vmem:[#allocation6 + $0x460] sm:$0xff] }
  0xe3   :  { %4011 = vmatprep.subr.bf16.mxu0 %v5500_v45  ;;  %4174 = vmatpush1.bf16.msra.mxu1 %v5493_v54  ;;  %v5532_v49 = vcombine.high %v303_v41, %v307_v6  ;;  %v312_v54 = vld [vmem:[#allocation6 + $0x488] sm:$0xff]  ;;  %v5531_v59 = vcombine.low %v303_v41, %v307_v6  ;;  %v351_v41 = vld [vmem:[#allocation6 + $0x5c0] sm:$0xff] }
  0xe4   :  { %4175 = vmatprep.subr.bf16.mxu1 %v5502_v55  ;;  %v1380_v47 = vrot.slane %v1375_v38, %v6491_v28  ;;  %v316_v55 = vld [vmem:[#allocation6 + $0x4a8] sm:$0xff]  ;;  %v5565_v38 = vcombine.low %v336_v24, %v340_v26  ;;  %v355_v6 = vld [vmem:[#allocation6 + $0x5e0] sm:$0xff] }
  0xe5   :  { %v5541_v8 = vcombine.low %v312_v54, %v316_v55 }
  0xe6   :  { %4012 = vmatpush1.bf16.msra.mxu0 %v5499_v50  ;;  %v5534_v50 = vcombine.high %v304_v43, %v308_v44  ;;  %v352_v43 = vld [vmem:[#allocation6 + $0x5c8] sm:$0xff] }
  0xe7   :  { %4013 = vmatprep.subr.bf16.mxu0 %v5508_v53  ;;  %4176 = vmatpush1.bf16.msra.mxu1 %v5501_v62  ;;  %v315_v53 = vld [vmem:[#allocation6 + $0x4a0] sm:$0xff]  ;;  %v356_v44 = vld [vmem:[#allocation6 + $0x5e8] sm:$0xff] }
  0xe8   :  { %4177 = vmatprep.subr.bf16.mxu1 %v5510_v63  ;;  %v5540_v62 = vcombine.high %v311_v51, %v315_v53  ;;  %v5542_v63 = vcombine.high %v312_v54, %v316_v55  ;;  %v5539_v7 = vcombine.low %v311_v51, %v315_v53  ;;  %v5580_v51 = vcombine.high %v351_v41, %v355_v6  ;;  %v359_v53 = vld [vmem:[#allocation6 + $0x600] sm:$0xff] }
  0xe9   :  { %v363_v55 = vld [vmem:[#allocation6 + $0x620] sm:$0xff] }
  0xea   :  { %4014 = vmatpush1.bf16.msra.mxu0 %v5507_v58 }
  0xeb   :  { %4015 = vmatprep.subr.bf16.mxu0 %v5516_v61  ;;  %4178 = vmatpush1.bf16.msra.mxu1 %v5509_v12  ;;  %v331_v12 = vld [vmem:[#allocation6 + $0x520] sm:$0xff] }
  0xec   :  { %4179 = vmatprep.subr.bf16.mxu1 %v5518_v13  ;;  %v328_v13 = vld [vmem:[#allocation6 + $0x508] sm:$0xff] }
  0xee   :  { %4016 = vmatpush1.bf16.msra.mxu0 %v5515_v4  ;;  %v324_v4 = vld [vmem:[#allocation6 + $0x4e8] sm:$0xff] }
  0xef   :  { %4026 = vmatprep.subr.bf16.mxu0 %v5524_v10  ;;  %4180 = vmatpush1.bf16.msra.mxu1 %v5517_v14  ;;  %v5550_v10 = vcombine.high %v320_v3, %v324_v4  ;;  %v332_v14 = vld [vmem:[#allocation6 + $0x528] sm:$0xff]  ;;  %v5549_v17 = vcombine.low %v320_v3, %v324_v4  ;;  %v367_v4 = vld [vmem:[#allocation6 + $0x640] sm:$0xff] }
  0xf0   :  { %4190 = vmatprep.subr.bf16.mxu1 %v5526_v15  ;;  %v1304_v15 = vcombine.high %v6481_v22, %v6481_v22  ;;  %v5558_v19 = vcombine.high %v328_v13, %v332_v14  ;;  %v5557_v30 = vcombine.low %v328_v13, %v332_v14  ;;  %v5564_v22 = vcombine.high %v335_v20, %v339_v23 }
  0xf1   :  { %v5587_v13 = vcombine.low %v359_v53, %v363_v55 }
  0xf2   :  { %v6516_v27 = vrot.slane %v1304_v15, %v6479_v21 }
 0x164   :  { %v1165_v32 = vpop.f32.mrb[0].mxu0  ;;  %v6498_v46 = vpop.f32.mrb[0].mxu1 }
 0x165   :  { %v1295_v34 = vpack.c.bf16 %v1165_v32, %v1165_v32  ;;  %v1167_v35 = vpop.f32.mrb[1].mxu0  ;;  %v1208_v52 = vpop.f32.mrb[1].mxu1  ;;  %v343_v32 = vld [vmem:[#allocation6 + $0x580] sm:$0xff] }
 0x166   :  { %v1296_v36 = vpack.c.bf16 %v1167_v35, %v1167_v35  ;;  %v1169_v37 = vpop.f32.mrb[2].mxu0  ;;  %v1298_v56 = vpack.c.bf16 %v1208_v52, %v1208_v52  ;;  %v1210_v57 = vpop.f32.mrb[2].mxu1  ;;  %v344_v35 = vld [vmem:[#allocation6 + $0x588] sm:$0xff]  ;;  %v5582_v52 = vcombine.high %v352_v43, %v356_v44 }
 0x167   :  { %v1409_v39 = vadd.bf16 %v1359_v31, %v1295_v34  ;;  %v1170_v40 = vpop.f32.mrb[3].mxu0  ;;  %v1211_v58 = vpop.f32.mrb[3].mxu1  ;;  %v5566_v31 = vcombine.high %v336_v24, %v340_v26  ;;  %v347_v34 = vld [vmem:[#allocation6 + $0x5a0] sm:$0xff]  ;;  %v5563_v37 = vcombine.low %v335_v20, %v339_v23  ;;  %v364_v57 = vld [vmem:[#allocation6 + $0x628] sm:$0xff] }
 0x168   :  { %v1410_v42 = vadd.bf16 %v1366_v33, %v1296_v36  ;;  %v1412_v61 = vadd.bf16 %v1380_v47, %v1298_v56  ;;  %v1334_v33 = vrot.slane %v6516_v27, %v6479_v21  ;;  %v348_v36 = vld [vmem:[#allocation6 + $0x5a8] sm:$0xff]  ;;  %v379_v23 = vld [vmem:[#allocation6 + $0x6a0] sm:$0xff] }
 0x169   :  { %v6502_v48 = vmax.bf16 %v6336_v0, %v1409_v39  ;;  %v5572_v39 = vcombine.high %v343_v32, %v347_v34  ;;  %v5574_v40 = vcombine.high %v344_v35, %v348_v36  ;;  %v360_v56 = vld [vmem:[#allocation6 + $0x608] sm:$0xff] }
 0x16a   :  { %v6496_v45 = vmax.bf16 %v6336_v0, %v1410_v42  ;;  %v6509_v5 = vmax.bf16 %v6336_v0, %v1412_v61  ;;  %v1382_v42 = vpack.i.b16 %v1334_v33, %v1334_v33  ;;  %v1350_v47 = vcombine.high %v1334_v33, %v1334_v33  ;;  %v376_v24 = vld [vmem:[#allocation6 + $0x688] sm:$0xff] }
 0x16b   :  { %v5590_v3 = vcombine.high %v360_v56, %v364_v57  ;;  %v5589_v14 = vcombine.low %v360_v56, %v364_v57  ;;  %v380_v26 = vld [vmem:[#allocation6 + $0x6a8] sm:$0xff]  ;;  %v1320_v57 = vcombine.high %v6516_v27, %v6516_v27 }
 0x16c   :  { %4017 = vmatprep.mubr.bf16.mxu0 %v6496_v45  ;;  %4181 = vmatprep.mubr.bf16.mxu1 %v6496_v45  ;;  %v1387_v54 = vrot.slane %v1382_v42, %v6491_v28  ;;  %v1396_v61 = vpack.i.b16 %v1350_v47, %v1350_v47  ;;  %v396_v47 = vld [vmem:[#allocation6 + $0x728] sm:$0xff] }
 0x16d   :  { %4018 = vmatmul.mubr.bf16.vlgmr.msra.gmra.mrb[8].mxu0 %v6502_v48  ;;  %4182 = vmatmul.mubr.bf16.vlgmr.msra.gmra.mrb[8].mxu1 %v6502_v48  ;;  %v404_v56 = vld [vmem:[#allocation6 + $0x768] sm:$0xff] }
 0x16e   :  { %4027 = vmatpush1.bf16.msra.mxu0 %v5523_v9  ;;  %4191 = vmatpush1.bf16.msra.mxu1 %v5525_v11  ;;  %v5548_v9 = vcombine.high %v319_v1, %v323_v2  ;;  %v327_v11 = vld [vmem:[#allocation6 + $0x500] sm:$0xff]  ;;  %v5588_v2 = vcombine.high %v359_v53, %v363_v55  ;;  %v400_v55 = vld [vmem:[#allocation6 + $0x748] sm:$0xff] }
 0x16f   :  { %4028 = vmatprep.subr.bf16.mxu0 %v5532_v49  ;;  %4192 = vmatprep.subr.bf16.mxu1 %v5534_v50  ;;  %v5556_v18 = vcombine.high %v327_v11, %v331_v12  ;;  %v5555_v29 = vcombine.low %v327_v11, %v331_v12  ;;  %v5571_v49 = vcombine.low %v343_v32, %v347_v34  ;;  %v372_v11 = vld [vmem:[#allocation6 + $0x668] sm:$0xff]  ;;  %v399_v53 = vld [vmem:[#allocation6 + $0x740] sm:$0xff] }
 0x170   :  { %4058 = vmatprep.mubr.bf16.mxu0 %v6509_v5  ;;  %4222 = vmatprep.mubr.bf16.mxu1 %v6509_v5  ;;  %v5573_v50 = vcombine.low %v344_v35, %v348_v36  ;;  %v1401_v12 = vrot.slane %v1396_v61, %v6491_v28  ;;  %v5606_v34 = vcombine.high %v376_v24, %v380_v26  ;;  %v383_v35 = vld [vmem:[#allocation6 + $0x6c0] sm:$0xff] }
 0x171   :  { %v387_v36 = vld [vmem:[#allocation6 + $0x6e0] sm:$0xff] }
 0x172   :  { %4029 = vmatpush1.bf16.msra.mxu0 %v5531_v59  ;;  %4193 = vmatpush1.bf16.msra.mxu1 %v5533_v60 }
 0x173   :  { %4030 = vmatprep.subr.bf16.mxu0 %v5540_v62  ;;  %4194 = vmatprep.subr.bf16.mxu1 %v5542_v63  ;;  %v5579_v62 = vcombine.low %v351_v41, %v355_v6  ;;  %v5581_v63 = vcombine.low %v352_v43, %v356_v44  ;;  %v5612_v41 = vcombine.high %v383_v35, %v387_v36  ;;  %v391_v6 = vld [vmem:[#allocation6 + $0x700] sm:$0xff]  ;;  %v392_v44 = vld [vmem:[#allocation6 + $0x708] sm:$0xff] }
 0x174   :  { %v395_v43 = vld [vmem:[#allocation6 + $0x720] sm:$0xff]  ;;  %v5621_v61 = vcombine.low %v392_v44, %v396_v47 }
 0x176   :  { %4031 = vmatpush1.bf16.msra.mxu0 %v5539_v7  ;;  %4195 = vmatpush1.bf16.msra.mxu1 %v5541_v8 }
 0x177   :  { %4032 = vmatprep.subr.bf16.mxu0 %v5548_v9  ;;  %4196 = vmatprep.subr.bf16.mxu1 %v5550_v10  ;;  %v371_v9 = vld [vmem:[#allocation6 + $0x660] sm:$0xff]  ;;  %v368_v10 = vld [vmem:[#allocation6 + $0x648] sm:$0xff] }
 0x178   :  { %v5597_v32 = vcombine.low %v368_v10, %v372_v11 }
 0x17a   :  { %4033 = vmatpush1.bf16.msra.mxu0 %v5547_v16  ;;  %4197 = vmatpush1.bf16.msra.mxu1 %v5549_v17  ;;  %v5596_v16 = vcombine.high %v367_v4, %v371_v9  ;;  %v5598_v17 = vcombine.high %v368_v10, %v372_v11 }
 0x17b   :  { %4034 = vmatprep.subr.bf16.mxu0 %v5556_v18  ;;  %4198 = vmatprep.subr.bf16.mxu1 %v5558_v19  ;;  %v375_v18 = vld [vmem:[#allocation6 + $0x680] sm:$0xff] }
 0x17c   :  { %v5604_v33 = vcombine.high %v375_v18, %v379_v23 }
 0x17e   :  { %4035 = vmatpush1.bf16.msra.mxu0 %v5555_v29  ;;  %4199 = vmatpush1.bf16.msra.mxu1 %v5557_v30 }
 0x17f   :  { %4036 = vmatprep.subr.bf16.mxu0 %v5564_v22  ;;  %4200 = vmatprep.subr.bf16.mxu1 %v5566_v31  ;;  %v5595_v31 = vcombine.low %v367_v4, %v371_v9  ;;  %v412_v4 = vld [vmem:[#allocation6 + $0x7a8] sm:$0xff] }
 0x182   :  { %4037 = vmatpush1.bf16.msra.mxu0 %v5563_v37  ;;  %4201 = vmatpush1.bf16.msra.mxu1 %v5565_v38  ;;  %v384_v37 = vld [vmem:[#allocation6 + $0x6c8] sm:$0xff] }
 0x183   :  { %4038 = vmatprep.subr.bf16.mxu0 %v5572_v39  ;;  %4202 = vmatprep.subr.bf16.mxu1 %v5574_v40  ;;  %v388_v38 = vld [vmem:[#allocation6 + $0x6e8] sm:$0xff]  ;;  %v5603_v39 = vcombine.low %v375_v18, %v379_v23  ;;  %v5605_v40 = vcombine.low %v376_v24, %v380_v26 }
 0x184   :  { %v1247_v58 = vpop.f32.mrb[4].mxu0  ;;  %v5614_v42 = vcombine.high %v384_v37, %v388_v38 }
 0x185   :  { %v1299_v59 = vpack.c.bf16 %v1247_v58, %v1247_v58  ;;  %v6521_v60 = vpop.f32.mrb[5].mxu0  ;;  %v1288_v15 = vpop.f32.mrb[4].mxu1  ;;  %v1349_v58 = vcombine.high %v6486_v25, %v6486_v25  ;;  %v5629_v25 = vcombine.low %v400_v55, %v404_v56 }
 0x186   :  { %4039 = vmatpush1.bf16.msra.mxu0 %v5571_v49  ;;  %4203 = vmatpush1.bf16.msra.mxu1 %v5573_v50  ;;  %v1251_v1 = vpop.f32.mrb[6].mxu0  ;;  %v1301_v19 = vpack.c.bf16 %v1288_v15, %v1288_v15  ;;  %v6526_v20 = vpop.f32.mrb[5].mxu1  ;;  %v5611_v49 = vcombine.low %v383_v35, %v387_v36  ;;  %v5613_v50 = vcombine.low %v384_v37, %v388_v38  ;;  %v420_v15 = vld [vmem:[#allocation6 + $0x7e8] sm:$0xff] }
 0x187   :  { %4040 = vmatprep.subr.bf16.mxu0 %v5580_v51  ;;  %4204 = vmatprep.subr.bf16.mxu1 %v5582_v52  ;;  %v6523_v7 = vadd.bf16 %v1387_v54, %v1299_v59  ;;  %v1252_v8 = vpop.f32.mrb[7].mxu0  ;;  %v1292_v29 = vpop.f32.mrb[6].mxu1  ;;  %v5620_v51 = vcombine.high %v391_v6, %v395_v43  ;;  %v5622_v52 = vcombine.high %v392_v44, %v396_v47  ;;  %v403_v54 = vld [vmem:[#allocation6 + $0x760] sm:$0xff] }
 0x188   :  { %v6528_v30 = vadd.bf16 %v1401_v12, %v1301_v19  ;;  %v1293_v22 = vpop.f32.mrb[7].mxu1  ;;  %v5619_v59 = vcombine.low %v391_v6, %v395_v43  ;;  %v407_v1 = vld [vmem:[#allocation6 + $0x780] sm:$0xff]  ;;  %v6535_v8 = vrot.slane %v1320_v57, %v6479_v21  ;;  %v1368_v9 = vpack.i.b16 %v1349_v58, %v1349_v58 }
 0x189   :  { %v5627_v27 = vcombine.low %v399_v53, %v403_v54  ;;  %v415_v12 = vld [vmem:[#allocation6 + $0x7c0] sm:$0xff] }
 0x18a   :  { %4041 = vmatpush1.bf16.msra.mxu0 %v5579_v62  ;;  %4205 = vmatpush1.bf16.msra.mxu1 %v5581_v63  ;;  %v5628_v62 = vcombine.high %v399_v53, %v403_v54  ;;  %v5630_v63 = vcombine.high %v400_v55, %v404_v56  ;;  %v1373_v18 = vrot.slane %v1368_v9, %v6491_v28  ;;  %v423_v29 = vld [vmem:[#allocation6 + $0x800] sm:$0xff]  ;;  %v444_v53 = vld [vmem:[#allocation6 + $0x8a8] sm:$0xff] }
 0x18b   :  { %4042 = vmatprep.subr.bf16.mxu0 %v5588_v2  ;;  %4206 = vmatprep.subr.bf16.mxu1 %v5590_v3  ;;  %v411_v2 = vld [vmem:[#allocation6 + $0x7a0] sm:$0xff]  ;;  %v408_v3 = vld [vmem:[#allocation6 + $0x788] sm:$0xff] }
 0x18c   :  { %v5636_v10 = vcombine.high %v407_v1, %v411_v2  ;;  %v5638_v11 = vcombine.high %v408_v3, %v412_v4  ;;  %v5635_v19 = vcombine.low %v407_v1, %v411_v2  ;;  %v5637_v23 = vcombine.low %v408_v3, %v412_v4  ;;  %v427_v22 = vld [vmem:[#allocation6 + $0x820] sm:$0xff] }
 0x18d   :  { %v5652_v37 = vcombine.high %v423_v29, %v427_v22  ;;  %v455_v9 = vld [vmem:[#allocation6 + $0x900] sm:$0xff] }
 0x18e   :  { %4043 = vmatpush1.bf16.msra.mxu0 %v5587_v13  ;;  %4207 = vmatpush1.bf16.msra.mxu1 %v5589_v14  ;;  %v419_v13 = vld [vmem:[#allocation6 + $0x7e0] sm:$0xff]  ;;  %v416_v14 = vld [vmem:[#allocation6 + $0x7c8] sm:$0xff] }
 0x18f   :  { %4044 = vmatprep.subr.bf16.mxu0 %v5596_v16  ;;  %4208 = vmatprep.subr.bf16.mxu1 %v5598_v17  ;;  %v1389_v16 = vpack.i.b16 %v6535_v8, %v6535_v8  ;;  %v1297_v17 = vpack.c.bf16 %v6498_v46, %v6498_v46  ;;  %v5644_v24 = vcombine.high %v415_v12, %v419_v13 }
 0x190   :  { %v5646_v26 = vcombine.high %v416_v14, %v420_v15  ;;  %v5643_v35 = vcombine.low %v415_v12, %v419_v13  ;;  %v5645_v36 = vcombine.low %v416_v14, %v420_v15  ;;  %v463_v15 = vld [vmem:[#allocation6 + $0x940] sm:$0xff] }
 0x191   :  { %v1411_v46 = vadd.bf16 %v1373_v18, %v1297_v17  ;;  %v464_v17 = vld [vmem:[#allocation6 + $0x948] sm:$0xff] }
 0x192   :  { %4045 = vmatpush1.bf16.msra.mxu0 %v5595_v31  ;;  %4209 = vmatpush1.bf16.msra.mxu1 %v5597_v32  ;;  %v424_v31 = vld [vmem:[#allocation6 + $0x808] sm:$0xff] }
 0x193   :  { %4046 = vmatprep.subr.bf16.mxu0 %v5604_v33  ;;  %4210 = vmatprep.subr.bf16.mxu1 %v5606_v34  ;;  %v428_v32 = vld [vmem:[#allocation6 + $0x828] sm:$0xff]  ;;  %v1300_v33 = vpack.c.bf16 %v6521_v60, %v6521_v60  ;;  %v1394_v34 = vrot.slane %v1389_v16, %v6491_v28  ;;  %v6546_v43 = vmax.bf16 %v6336_v0, %v1411_v46  ;;  %v467_v16 = vld [vmem:[#allocation6 + $0x960] sm:$0xff] }
 0x194   :  { %v5654_v38 = vcombine.high %v424_v31, %v428_v32  ;;  %v5651_v60 = vcombine.low %v423_v29, %v427_v22  ;;  %v5653_v44 = vcombine.low %v424_v31, %v428_v32  ;;  %v468_v18 = vld [vmem:[#allocation6 + $0x968] sm:$0xff]  ;;  %v471_v29 = vld [vmem:[#allocation6 + $0x980] sm:$0xff] }
 0x195   :  { %v1414_v6 = vadd.bf16 %v1394_v34, %v1300_v33  ;;  %v475_v22 = vld [vmem:[#allocation6 + $0x9a0] sm:$0xff]  ;;  %v472_v31 = vld [vmem:[#allocation6 + $0x988] sm:$0xff]  ;;  %v5691_v33 = vcombine.low %v463_v15, %v467_v16  ;;  %v5693_v34 = vcombine.low %v464_v17, %v468_v18 }
 0x196   :  { %4047 = vmatpush1.bf16.msra.mxu0 %v5603_v39  ;;  %4211 = vmatpush1.bf16.msra.mxu1 %v5605_v40  ;;  %v431_v39 = vld [vmem:[#allocation6 + $0x840] sm:$0xff]  ;;  %v476_v32 = vld [vmem:[#allocation6 + $0x9a8] sm:$0xff]  ;;  %v5700_v46 = vcombine.high %v471_v29, %v475_v22 }
 0x197   :  { %4048 = vmatprep.subr.bf16.mxu0 %v5612_v41  ;;  %4212 = vmatprep.subr.bf16.mxu1 %v5614_v42  ;;  %v435_v40 = vld [vmem:[#allocation6 + $0x860] sm:$0xff]  ;;  %v432_v41 = vld [vmem:[#allocation6 + $0x848] sm:$0xff]  ;;  %v6549_v54 = vmax.bf16 %v6336_v0, %v1414_v6 }
 0x198   :  { %v436_v42 = vld [vmem:[#allocation6 + $0x868] sm:$0xff]  ;;  %v5660_v47 = vcombine.high %v431_v39, %v435_v40  ;;  %v5659_v55 = vcombine.low %v431_v39, %v435_v40  ;;  %v5699_v40 = vcombine.low %v471_v29, %v475_v22 }
 0x199   :  { %v5661_v56 = vcombine.low %v432_v41, %v436_v42  ;;  %v484_v39 = vld [vmem:[#allocation6 + $0x9e8] sm:$0xff] }
 0x19a   :  { %4049 = vmatpush1.bf16.msra.mxu0 %v5611_v49  ;;  %4213 = vmatpush1.bf16.msra.mxu1 %v5613_v50  ;;  %v5662_v49 = vcombine.high %v432_v41, %v436_v42  ;;  %v439_v50 = vld [vmem:[#allocation6 + $0x880] sm:$0xff]  ;;  %v5701_v41 = vcombine.low %v472_v31, %v476_v32 }
 0x19b   :  { %4050 = vmatprep.subr.bf16.mxu0 %v5620_v51  ;;  %4214 = vmatprep.subr.bf16.mxu1 %v5622_v52  ;;  %v443_v51 = vld [vmem:[#allocation6 + $0x8a0] sm:$0xff]  ;;  %v440_v52 = vld [vmem:[#allocation6 + $0x888] sm:$0xff] }
 0x19c   :  { %v5668_v57 = vcombine.high %v439_v50, %v443_v51  ;;  %v5670_v58 = vcombine.high %v440_v52, %v444_v53  ;;  %v5667_v1 = vcombine.low %v439_v50, %v443_v51  ;;  %v5669_v2 = vcombine.low %v440_v52, %v444_v53 }
 0x19e   :  { %4051 = vmatpush1.bf16.msra.mxu0 %v5619_v59  ;;  %4215 = vmatpush1.bf16.msra.mxu1 %v5621_v61  ;;  %v447_v59 = vld [vmem:[#allocation6 + $0x8c0] sm:$0xff] }
 0x19f   :  { %4052 = vmatprep.subr.bf16.mxu0 %v5628_v62  ;;  %4216 = vmatprep.subr.bf16.mxu1 %v5630_v63  ;;  %v451_v61 = vld [vmem:[#allocation6 + $0x8e0] sm:$0xff]  ;;  %v448_v62 = vld [vmem:[#allocation6 + $0x8c8] sm:$0xff] }
 0x1a0   :  { %v452_v63 = vld [vmem:[#allocation6 + $0x8e8] sm:$0xff]  ;;  %v5676_v3 = vcombine.high %v447_v59, %v451_v61 }
 0x1a1   :  { %v5678_v4 = vcombine.high %v448_v62, %v452_v63  ;;  %v5677_v12 = vcombine.low %v448_v62, %v452_v63 }
 0x1a2   :  { %4053 = vmatpush1.bf16.msra.mxu0 %v5627_v27  ;;  %4217 = vmatpush1.bf16.msra.mxu1 %v5629_v25  ;;  %v459_v27 = vld [vmem:[#allocation6 + $0x920] sm:$0xff]  ;;  %v456_v25 = vld [vmem:[#allocation6 + $0x908] sm:$0xff] }
 0x1a3   :  { %4054 = vmatprep.subr.bf16.mxu0 %v5636_v10  ;;  %4218 = vmatprep.subr.bf16.mxu1 %v5638_v11  ;;  %v460_v10 = vld [vmem:[#allocation6 + $0x928] sm:$0xff]  ;;  %v5675_v11 = vcombine.low %v447_v59, %v451_v61  ;;  %v5684_v13 = vcombine.high %v455_v9, %v459_v27 }
 0x1a4   :  { %v5686_v14 = vcombine.high %v456_v25, %v460_v10 }
 0x1a6   :  { %4055 = vmatpush1.bf16.msra.mxu0 %v5635_v19  ;;  %4219 = vmatpush1.bf16.msra.mxu1 %v5637_v23  ;;  %v5683_v19 = vcombine.low %v455_v9, %v459_v27  ;;  %v5685_v23 = vcombine.low %v456_v25, %v460_v10 }
 0x1a7   :  { %4056 = vmatprep.subr.bf16.mxu0 %v5644_v24  ;;  %4220 = vmatprep.subr.bf16.mxu1 %v5646_v26  ;;  %v5692_v24 = vcombine.high %v463_v15, %v467_v16  ;;  %v5694_v26 = vcombine.high %v464_v17, %v468_v18 }
 0x1aa   :  { %4057 = vmatpush1.bf16.msra.mxu0 %v5643_v35  ;;  %4221 = vmatpush1.bf16.msra.mxu1 %v5645_v36  ;;  %v5702_v35 = vcombine.high %v472_v31, %v476_v32  ;;  %v479_v36 = vld [vmem:[#allocation6 + $0x9c0] sm:$0xff] }
 0x1ab   :  { %4067 = vmatprep.subr.bf16.mxu0 %v5652_v37  ;;  %4231 = vmatprep.subr.bf16.mxu1 %v5654_v38  ;;  %v483_v37 = vld [vmem:[#allocation6 + $0x9e0] sm:$0xff]  ;;  %v480_v38 = vld [vmem:[#allocation6 + $0x9c8] sm:$0xff] }
 0x1ac   :  { %v5708_v42 = vcombine.high %v479_v36, %v483_v37  ;;  %v5710_v6 = vcombine.high %v480_v38, %v484_v39  ;;  %v5707_v50 = vcombine.low %v479_v36, %v483_v37  ;;  %v5709_v51 = vcombine.low %v480_v38, %v484_v39 }
 0x1ad   :  { %4059 = vmatmul.mubr.bf16.vlgmr.msra.gmra.mrb[8].mxu0 %v6546_v43  ;;  %4223 = vmatmul.mubr.bf16.vlgmr.msra.gmra.mrb[8].mxu1 %v6546_v43 }
 0x1ae   :  { %4068 = vmatpush1.bf16.msra.mxu0 %v5651_v60  ;;  %4232 = vmatpush1.bf16.msra.mxu1 %v5653_v44  ;;  %v487_v60 = vld [vmem:[#allocation6 + $0xa00] sm:$0xff] }
 0x1af   :  { %4069 = vmatprep.subr.bf16.mxu0 %v5660_v47  ;;  %4233 = vmatprep.subr.bf16.mxu1 %v5662_v49  ;;  %v491_v44 = vld [vmem:[#allocation6 + $0xa20] sm:$0xff]  ;;  %v488_v47 = vld [vmem:[#allocation6 + $0xa08] sm:$0xff] }
 0x1b0   :  { %4099 = vmatprep.mubr.bf16.mxu0 %v6549_v54  ;;  %4263 = vmatprep.mubr.bf16.mxu1 %v6549_v54  ;;  %v492_v49 = vld [vmem:[#allocation6 + $0xa28] sm:$0xff]  ;;  %v5716_v52 = vcombine.high %v487_v60, %v491_v44  ;;  %v5715_v59 = vcombine.low %v487_v60, %v491_v44  ;;  %v1352_v60 = vcombine.high %v6535_v8, %v6535_v8 }
 0x1b1   :  { %v5718_v53 = vcombine.high %v488_v47, %v492_v49  ;;  %v5717_v61 = vcombine.low %v488_v47, %v492_v49 }
 0x1b2   :  { %4070 = vmatpush1.bf16.msra.mxu0 %v5659_v55  ;;  %4234 = vmatpush1.bf16.msra.mxu1 %v5661_v56  ;;  %v495_v55 = vld [vmem:[#allocation6 + $0xa40] sm:$0xff] }
 0x1b3   :  { %4071 = vmatprep.subr.bf16.mxu0 %v5668_v57  ;;  %4235 = vmatprep.subr.bf16.mxu1 %v5670_v58  ;;  %v499_v56 = vld [vmem:[#allocation6 + $0xa60] sm:$0xff]  ;;  %v496_v57 = vld [vmem:[#allocation6 + $0xa48] sm:$0xff] }
 0x1b4   :  { %v500_v58 = vld [vmem:[#allocation6 + $0xa68] sm:$0xff]  ;;  %v5724_v62 = vcombine.high %v495_v55, %v499_v56  ;;  %v5723_v9 = vcombine.low %v495_v55, %v499_v56  ;;  %v1403_v56 = vpack.i.b16 %v1352_v60, %v1352_v60 }
 0x1b5   :  { %v5726_v63 = vcombine.high %v496_v57, %v500_v58  ;;  %v5725_v27 = vcombine.low %v496_v57, %v500_v58  ;;  %v548_v55 = vld [vmem:[#allocation6 + $0xbe8] sm:$0xff] }
 0x1b6   :  { %4072 = vmatpush1.bf16.msra.mxu0 %v5667_v1  ;;  %4236 = vmatpush1.bf16.msra.mxu1 %v5669_v2  ;;  %v503_v1 = vld [vmem:[#allocation6 + $0xa80] sm:$0xff] }
 0x1b7   :  { %4073 = vmatprep.subr.bf16.mxu0 %v5676_v3  ;;  %4237 = vmatprep.subr.bf16.mxu1 %v5678_v4  ;;  %v507_v2 = vld [vmem:[#allocation6 + $0xaa0] sm:$0xff]  ;;  %v504_v3 = vld [vmem:[#allocation6 + $0xa88] sm:$0xff] }
 0x1b8   :  { %v508_v4 = vld [vmem:[#allocation6 + $0xaa8] sm:$0xff]  ;;  %v5732_v25 = vcombine.high %v503_v1, %v507_v2  ;;  %v5731_v15 = vcombine.low %v503_v1, %v507_v2  ;;  %v1302_v2 = vpack.c.bf16 %v6526_v20, %v6526_v20 }
 0x1b9   :  { %v5734_v10 = vcombine.high %v504_v3, %v508_v4  ;;  %v5733_v16 = vcombine.low %v504_v3, %v508_v4  ;;  %v556_v1 = vld [vmem:[#allocation6 + $0xc28] sm:$0xff]  ;;  %v1408_v3 = vrot.slane %v1403_v56, %v6491_v28 }
 0x1ba   :  { %4074 = vmatpush1.bf16.msra.mxu0 %v5675_v11  ;;  %4238 = vmatpush1.bf16.msra.mxu1 %v5677_v12  ;;  %v511_v11 = vld [vmem:[#allocation6 + $0xac0] sm:$0xff] }
 0x1bb   :  { %4075 = vmatprep.subr.bf16.mxu0 %v5684_v13  ;;  %4239 = vmatprep.subr.bf16.mxu1 %v5686_v14  ;;  %v515_v12 = vld [vmem:[#allocation6 + $0xae0] sm:$0xff]  ;;  %v512_v13 = vld [vmem:[#allocation6 + $0xac8] sm:$0xff] }
 0x1bc   :  { %v516_v14 = vld [vmem:[#allocation6 + $0xae8] sm:$0xff]  ;;  %v5740_v17 = vcombine.high %v511_v11, %v515_v12  ;;  %v5739_v29 = vcombine.low %v511_v11, %v515_v12  ;;  %v563_v11 = vld [vmem:[#allocation6 + $0xc60] sm:$0xff] }
 0x1bd   :  { %v5742_v18 = vcombine.high %v512_v13, %v516_v14  ;;  %v5741_v22 = vcombine.low %v512_v13, %v516_v14  ;;  %v560_v12 = vld [vmem:[#allocation6 + $0xc48] sm:$0xff]  ;;  %v1416_v14 = vadd.bf16 %v1408_v3, %v1302_v2 }
 0x1be   :  { %4076 = vmatpush1.bf16.msra.mxu0 %v5683_v19  ;;  %4240 = vmatpush1.bf16.msra.mxu1 %v5685_v23  ;;  %v519_v19 = vld [vmem:[#allocation6 + $0xb00] sm:$0xff]  ;;  %v564_v13 = vld [vmem:[#allocation6 + $0xc68] sm:$0xff] }
 0x1bf   :  { %4077 = vmatprep.subr.bf16.mxu0 %v5692_v24  ;;  %4241 = vmatprep.subr.bf16.mxu1 %v5694_v26  ;;  %v523_v23 = vld [vmem:[#allocation6 + $0xb20] sm:$0xff]  ;;  %v520_v24 = vld [vmem:[#allocation6 + $0xb08] sm:$0xff] }
 0x1c0   :  { %v524_v26 = vld [vmem:[#allocation6 + $0xb28] sm:$0xff]  ;;  %v5748_v31 = vcombine.high %v519_v19, %v523_v23  ;;  %v5747_v36 = vcombine.low %v519_v19, %v523_v23  ;;  %v567_v19 = vld [vmem:[#allocation6 + $0xc80] sm:$0xff] }
 0x1c1   :  { %v5750_v32 = vcombine.high %v520_v24, %v524_v26  ;;  %v5749_v37 = vcombine.low %v520_v24, %v524_v26  ;;  %v571_v23 = vld [vmem:[#allocation6 + $0xca0] sm:$0xff]  ;;  %v568_v24 = vld [vmem:[#allocation6 + $0xc88] sm:$0xff] }
 0x1c2   :  { %4078 = vmatpush1.bf16.msra.mxu0 %v5691_v33  ;;  %4242 = vmatpush1.bf16.msra.mxu1 %v5693_v34  ;;  %v527_v33 = vld [vmem:[#allocation6 + $0xb40] sm:$0xff]  ;;  %v572_v26 = vld [vmem:[#allocation6 + $0xca8] sm:$0xff] }
 0x1c3   :  { %4079 = vmatprep.subr.bf16.mxu0 %v5700_v46  ;;  %4243 = vmatprep.subr.bf16.mxu1 %v5702_v35  ;;  %v531_v34 = vld [vmem:[#allocation6 + $0xb60] sm:$0xff]  ;;  %v528_v46 = vld [vmem:[#allocation6 + $0xb48] sm:$0xff] }
 0x1c4   :  { %v532_v35 = vld [vmem:[#allocation6 + $0xb68] sm:$0xff]  ;;  %v5756_v38 = vcombine.high %v527_v33, %v531_v34  ;;  %v5755_v44 = vcombine.low %v527_v33, %v531_v34  ;;  %v575_v33 = vld [vmem:[#allocation6 + $0xcc0] sm:$0xff] }
 0x1c5   :  { %v5758_v39 = vcombine.high %v528_v46, %v532_v35  ;;  %v5757_v47 = vcombine.low %v528_v46, %v532_v35  ;;  %v579_v34 = vld [vmem:[#allocation6 + $0xce0] sm:$0xff]  ;;  %v576_v46 = vld [vmem:[#allocation6 + $0xcc8] sm:$0xff] }
 0x1c6   :  { %4080 = vmatpush1.bf16.msra.mxu0 %v5699_v40  ;;  %4244 = vmatpush1.bf16.msra.mxu1 %v5701_v41  ;;  %v535_v40 = vld [vmem:[#allocation6 + $0xb80] sm:$0xff]  ;;  %v580_v35 = vld [vmem:[#allocation6 + $0xce8] sm:$0xff]  ;;  %v5803_v60 = vcombine.low %v575_v33, %v579_v34 }
 0x1c7   :  { %4081 = vmatprep.subr.bf16.mxu0 %v5708_v42  ;;  %4245 = vmatprep.subr.bf16.mxu1 %v5710_v6  ;;  %v539_v41 = vld [vmem:[#allocation6 + $0xba0] sm:$0xff]  ;;  %v536_v42 = vld [vmem:[#allocation6 + $0xb88] sm:$0xff] }
 0x1c8   :  { %v540_v6 = vld [vmem:[#allocation6 + $0xba8] sm:$0xff]  ;;  %v5764_v49 = vcombine.high %v535_v40, %v539_v41  ;;  %v5763_v57 = vcombine.low %v535_v40, %v539_v41  ;;  %v583_v40 = vld [vmem:[#allocation6 + $0xd00] sm:$0xff] }
 0x1c9   :  { %v5765_v58 = vcombine.low %v536_v42, %v540_v6  ;;  %v587_v41 = vld [vmem:[#allocation6 + $0xd20] sm:$0xff] }
 0x1ca   :  { %4082 = vmatpush1.bf16.msra.mxu0 %v5707_v50  ;;  %4246 = vmatpush1.bf16.msra.mxu1 %v5709_v51  ;;  %v5766_v50 = vcombine.high %v536_v42, %v540_v6  ;;  %v543_v51 = vld [vmem:[#allocation6 + $0xbc0] sm:$0xff]  ;;  %v584_v42 = vld [vmem:[#allocation6 + $0xd08] sm:$0xff] }
 0x1cb   :  { %4083 = vmatprep.subr.bf16.mxu0 %v5716_v52  ;;  %4247 = vmatprep.subr.bf16.mxu1 %v5718_v53  ;;  %v547_v52 = vld [vmem:[#allocation6 + $0xbe0] sm:$0xff]  ;;  %v544_v53 = vld [vmem:[#allocation6 + $0xbc8] sm:$0xff] }
 0x1cc   :  { %v5772_v8 = vcombine.high %v543_v51, %v547_v52  ;;  %v5771_v4 = vcombine.low %v543_v51, %v547_v52  ;;  %v588_v6 = vld [vmem:[#allocation6 + $0xd28] sm:$0xff]  ;;  %v595_v51 = vld [vmem:[#allocation6 + $0xd60] sm:$0xff] }
 0x1cd   :  { %v592_v52 = vld [vmem:[#allocation6 + $0xd48] sm:$0xff]  ;;  %v5813_v56 = vcombine.low %v584_v42, %v588_v6 }
 0x1ce   :  { %4084 = vmatpush1.bf16.msra.mxu0 %v5715_v59  ;;  %4248 = vmatpush1.bf16.msra.mxu1 %v5717_v61  ;;  %v5774_v59 = vcombine.high %v544_v53, %v548_v55  ;;  %v551_v61 = vld [vmem:[#allocation6 + $0xc00] sm:$0xff] }
 0x1cf   :  { %4085 = vmatprep.subr.bf16.mxu0 %v5724_v62  ;;  %4249 = vmatprep.subr.bf16.mxu1 %v5726_v63  ;;  %v555_v62 = vld [vmem:[#allocation6 + $0xc20] sm:$0xff]  ;;  %v552_v63 = vld [vmem:[#allocation6 + $0xc08] sm:$0xff] }
 0x1d0   :  { %v5779_v20 = vcombine.low %v551_v61, %v555_v62 }
 0x1d2   :  { %4086 = vmatpush1.bf16.msra.mxu0 %v5723_v9  ;;  %4250 = vmatpush1.bf16.msra.mxu1 %v5725_v27  ;;  %v5773_v9 = vcombine.low %v544_v53, %v548_v55  ;;  %v5780_v27 = vcombine.high %v551_v61, %v555_v62  ;;  %v596_v53 = vld [vmem:[#allocation6 + $0xd68] sm:$0xff]  ;;  %v5811_v55 = vcombine.low %v583_v40, %v587_v41 }
 0x1d3   :  { %4087 = vmatprep.subr.bf16.mxu0 %v5732_v25  ;;  %4251 = vmatprep.subr.bf16.mxu1 %v5734_v10  ;;  %v5782_v25 = vcombine.high %v552_v63, %v556_v1  ;;  %v559_v10 = vld [vmem:[#allocation6 + $0xc40] sm:$0xff]  ;;  %v600_v61 = vld [vmem:[#allocation6 + $0xd88] sm:$0xff] }
 0x1d4   :  { %v604_v62 = vld [vmem:[#allocation6 + $0xda8] sm:$0xff] }
 0x1d5   :  { %v5830_v3 = vcombine.high %v600_v61, %v604_v62 }
 0x1d6   :  { %4088 = vmatpush1.bf16.msra.mxu0 %v5731_v15  ;;  %4252 = vmatpush1.bf16.msra.mxu1 %v5733_v16  ;;  %v6562_v15 = vmax.bf16 %v6336_v0, %v6523_v7  ;;  %v5781_v16 = vcombine.low %v552_v63, %v556_v1  ;;  %v5787_v7 = vcombine.low %v559_v10, %v563_v11 }
 0x1d7   :  { %4089 = vmatprep.subr.bf16.mxu0 %v5740_v17  ;;  %4253 = vmatprep.subr.bf16.mxu1 %v5742_v18  ;;  %v5788_v17 = vcombine.high %v559_v10, %v563_v11  ;;  %v5790_v18 = vcombine.high %v560_v12, %v564_v13  ;;  %v5821_v1 = vcombine.low %v592_v52, %v596_v53 }
 0x1d8   :  { %v5829_v11 = vcombine.low %v600_v61, %v604_v62  ;;  %v655_v62 = vld [vmem:[#allocation6 + $0xf40] sm:$0xff] }
 0x1da   :  { %4090 = vmatpush1.bf16.msra.mxu0 %v5739_v29  ;;  %4254 = vmatpush1.bf16.msra.mxu1 %v5741_v22  ;;  %v6565_v29 = vmax.bf16 %v6336_v0, %v1416_v14  ;;  %v5789_v22 = vcombine.low %v560_v12, %v564_v13  ;;  %v615_v14 = vld [vmem:[#allocation6 + $0xe00] sm:$0xff] }
 0x1db   :  { %4091 = vmatprep.subr.bf16.mxu0 %v5748_v31  ;;  %4255 = vmatprep.subr.bf16.mxu1 %v5750_v32  ;;  %v5796_v31 = vcombine.high %v567_v19, %v571_v23  ;;  %v5798_v32 = vcombine.high %v568_v24, %v572_v26 }
 0x1de   :  { %4092 = vmatpush1.bf16.msra.mxu0 %v5747_v36  ;;  %4256 = vmatpush1.bf16.msra.mxu1 %v5749_v37  ;;  %v5795_v36 = vcombine.low %v567_v19, %v571_v23  ;;  %v5797_v37 = vcombine.low %v568_v24, %v572_v26  ;;  %v623_v26 = vld [vmem:[#allocation6 + $0xe40] sm:$0xff] }
 0x1df   :  { %4093 = vmatprep.subr.bf16.mxu0 %v5756_v38  ;;  %4257 = vmatprep.subr.bf16.mxu1 %v5758_v39  ;;  %v5804_v38 = vcombine.high %v575_v33, %v579_v34  ;;  %v5806_v39 = vcombine.high %v576_v46, %v580_v35 }
 0x1e2   :  { %4094 = vmatpush1.bf16.msra.mxu0 %v5755_v44  ;;  %4258 = vmatpush1.bf16.msra.mxu1 %v5757_v47  ;;  %v5805_v44 = vcombine.low %v576_v46, %v580_v35  ;;  %v5812_v47 = vcombine.high %v583_v40, %v587_v41  ;;  %v631_v35 = vld [vmem:[#allocation6 + $0xe80] sm:$0xff] }
 0x1e3   :  { %4095 = vmatprep.subr.bf16.mxu0 %v5764_v49  ;;  %4259 = vmatprep.subr.bf16.mxu1 %v5766_v50  ;;  %v5814_v49 = vcombine.high %v584_v42, %v588_v6  ;;  %v591_v50 = vld [vmem:[#allocation6 + $0xd40] sm:$0xff] }
 0x1e4   :  { %v5819_v63 = vcombine.low %v591_v50, %v595_v51  ;;  %v639_v6 = vld [vmem:[#allocation6 + $0xec0] sm:$0xff] }
 0x1e6   :  { %4096 = vmatpush1.bf16.msra.mxu0 %v5763_v57  ;;  %4260 = vmatpush1.bf16.msra.mxu1 %v5765_v58  ;;  %v5820_v57 = vcombine.high %v591_v50, %v595_v51  ;;  %v5822_v58 = vcombine.high %v592_v52, %v596_v53  ;;  %v647_v53 = vld [vmem:[#allocation6 + $0xf00] sm:$0xff] }
 0x1e7   :  { %4097 = vmatprep.subr.bf16.mxu0 %v5772_v8  ;;  %4261 = vmatprep.subr.bf16.mxu1 %v5774_v59  ;;  %v599_v8 = vld [vmem:[#allocation6 + $0xd80] sm:$0xff] }
 0x1e8   :  { %v603_v59 = vld [vmem:[#allocation6 + $0xda0] sm:$0xff] }
 0x1e9   :  { %v5828_v2 = vcombine.high %v599_v8, %v603_v59  ;;  %v5827_v10 = vcombine.low %v599_v8, %v603_v59 }
 0x1ea   :  { %4098 = vmatpush1.bf16.msra.mxu0 %v5771_v4  ;;  %4262 = vmatpush1.bf16.msra.mxu1 %v5773_v9  ;;  %v607_v4 = vld [vmem:[#allocation6 + $0xdc0] sm:$0xff] }
 0x1eb   :  { %4108 = vmatprep.subr.bf16.mxu0 %v5780_v27  ;;  %4272 = vmatprep.subr.bf16.mxu1 %v5782_v25  ;;  %v611_v9 = vld [vmem:[#allocation6 + $0xde0] sm:$0xff]  ;;  %v608_v27 = vld [vmem:[#allocation6 + $0xdc8] sm:$0xff] }
 0x1ec   :  { %v612_v25 = vld [vmem:[#allocation6 + $0xde8] sm:$0xff]  ;;  %v5836_v12 = vcombine.high %v607_v4, %v611_v9 }
 0x1ed   :  { %4100 = vmatmul.mubr.bf16.vlgmr.msra.gmra.mrb[8].mxu0 %v6562_v15  ;;  %4264 = vmatmul.mubr.bf16.vlgmr.msra.gmra.mrb[8].mxu1 %v6562_v15  ;;  %v5838_v13 = vcombine.high %v608_v27, %v612_v25  ;;  %v5837_v19 = vcombine.low %v608_v27, %v612_v25  ;;  %v663_v25 = vld [vmem:[#allocation6 + $0xf80] sm:$0xff] }
 0x1ee   :  { %4109 = vmatpush1.bf16.msra.mxu0 %v5779_v20  ;;  %4273 = vmatpush1.bf16.msra.mxu1 %v5781_v16  ;;  %v619_v20 = vld [vmem:[#allocation6 + $0xe20] sm:$0xff]  ;;  %v616_v16 = vld [vmem:[#allocation6 + $0xe08] sm:$0xff] }
 0x1ef   :  { %4110 = vmatprep.subr.bf16.mxu0 %v5788_v17  ;;  %4274 = vmatprep.subr.bf16.mxu1 %v5790_v18  ;;  %v620_v17 = vld [vmem:[#allocation6 + $0xe28] sm:$0xff]  ;;  %v5835_v18 = vcombine.low %v607_v4, %v611_v9  ;;  %v5844_v23 = vcombine.high %v615_v14, %v619_v20 }
 0x1f0   :  { %4140 = vmatprep.mubr.bf16.mxu0 %v6565_v29  ;;  %4304 = vmatprep.mubr.bf16.mxu1 %v6565_v29  ;;  %v5846_v24 = vcombine.high %v616_v16, %v620_v17  ;;  %v5845_v33 = vcombine.low %v616_v16, %v620_v17  ;;  %v671_v17 = vld [vmem:[#allocation6 + $0xfc0] sm:$0xff] }
 0x1f2   :  { %4111 = vmatpush1.bf16.msra.mxu0 %v5787_v7  ;;  %4275 = vmatpush1.bf16.msra.mxu1 %v5789_v22  ;;  %v627_v7 = vld [vmem:[#allocation6 + $0xe60] sm:$0xff]  ;;  %v624_v22 = vld [vmem:[#allocation6 + $0xe48] sm:$0xff] }
 0x1f3   :  { %4112 = vmatprep.subr.bf16.mxu0 %v5796_v31  ;;  %4276 = vmatprep.subr.bf16.mxu1 %v5798_v32  ;;  %v628_v31 = vld [vmem:[#allocation6 + $0xe68] sm:$0xff]  ;;  %v5843_v32 = vcombine.low %v615_v14, %v619_v20  ;;  %v5852_v34 = vcombine.high %v623_v26, %v627_v7 }
 0x1f4   :  { %v5854_v46 = vcombine.high %v624_v22, %v628_v31  ;;  %v5853_v40 = vcombine.low %v624_v22, %v628_v31  ;;  %v169_v31 = vld [vmem:[#allocation6 + $0x10] sm:$0xff] }
 0x1f6   :  { %4113 = vmatpush1.bf16.msra.mxu0 %v5795_v36  ;;  %4277 = vmatpush1.bf16.msra.mxu1 %v5797_v37  ;;  %v635_v36 = vld [vmem:[#allocation6 + $0xea0] sm:$0xff]  ;;  %v632_v37 = vld [vmem:[#allocation6 + $0xe88] sm:$0xff] }
 0x1f7   :  { %4114 = vmatprep.subr.bf16.mxu0 %v5804_v38  ;;  %4278 = vmatprep.subr.bf16.mxu1 %v5806_v39  ;;  %v636_v38 = vld [vmem:[#allocation6 + $0xea8] sm:$0xff]  ;;  %v5851_v39 = vcombine.low %v623_v26, %v627_v7  ;;  %v5860_v41 = vcombine.high %v631_v35, %v635_v36 }
 0x1f8   :  { %v5862_v42 = vcombine.high %v632_v37, %v636_v38  ;;  %v5861_v50 = vcombine.low %v632_v37, %v636_v38  ;;  %v177_v38 = vld [vmem:[#allocation6 + $0x50] sm:$0xff] }
 0x1fa   :  { %4115 = vmatpush1.bf16.msra.mxu0 %v5803_v60  ;;  %4279 = vmatpush1.bf16.msra.mxu1 %v5805_v44  ;;  %v643_v60 = vld [vmem:[#allocation6 + $0xee0] sm:$0xff]  ;;  %v640_v44 = vld [vmem:[#allocation6 + $0xec8] sm:$0xff] }
 0x1fb   :  { %4116 = vmatprep.subr.bf16.mxu0 %v5812_v47  ;;  %4280 = vmatprep.subr.bf16.mxu1 %v5814_v49  ;;  %v644_v47 = vld [vmem:[#allocation6 + $0xee8] sm:$0xff]  ;;  %v5859_v49 = vcombine.low %v631_v35, %v635_v36  ;;  %v5868_v51 = vcombine.high %v639_v6, %v643_v60 }
 0x1fc   :  { %v5870_v52 = vcombine.high %v640_v44, %v644_v47  ;;  %v5869_v8 = vcombine.low %v640_v44, %v644_v47 }
 0x1fe   :  { %4117 = vmatpush1.bf16.msra.mxu0 %v5811_v55  ;;  %4281 = vmatpush1.bf16.msra.mxu1 %v5813_v56  ;;  %v651_v55 = vld [vmem:[#allocation6 + $0xf20] sm:$0xff]  ;;  %v648_v56 = vld [vmem:[#allocation6 + $0xf08] sm:$0xff] }
 0x1ff   :  { %4118 = vmatprep.subr.bf16.mxu0 %v5820_v57  ;;  %4282 = vmatprep.subr.bf16.mxu1 %v5822_v58  ;;  %v652_v57 = vld [vmem:[#allocation6 + $0xf28] sm:$0xff]  ;;  %v5867_v58 = vcombine.low %v639_v6, %v643_v60  ;;  %v5876_v59 = vcombine.high %v647_v53, %v651_v55  ;;  %v6573_v6 = vmax.bf16 %v6336_v0, %v6528_v30 }
 0x200   :  { %v5878_v61 = vcombine.high %v648_v56, %v652_v57  ;;  %v5877_v4 = vcombine.low %v648_v56, %v652_v57  ;;  %v193_v57 = vld [vmem:[#allocation6 + $0xd0] sm:$0xff] }
 0x202   :  { %4119 = vmatpush1.bf16.msra.mxu0 %v5819_v63  ;;  %4283 = vmatpush1.bf16.msra.mxu1 %v5821_v1  ;;  %v659_v63 = vld [vmem:[#allocation6 + $0xf60] sm:$0xff]  ;;  %v656_v1 = vld [vmem:[#allocation6 + $0xf48] sm:$0xff] }
 0x203   :  { %4120 = vmatprep.subr.bf16.mxu0 %v5828_v2  ;;  %4284 = vmatprep.subr.bf16.mxu1 %v5830_v3  ;;  %v660_v2 = vld [vmem:[#allocation6 + $0xf68] sm:$0xff]  ;;  %v5875_v3 = vcombine.low %v647_v53, %v651_v55  ;;  %v5884_v9 = vcombine.high %v655_v62, %v659_v63 }
 0x204   :  { %v5886_v27 = vcombine.high %v656_v1, %v660_v2  ;;  %v5885_v14 = vcombine.low %v656_v1, %v660_v2  ;;  %v201_v2 = vld [vmem:[#allocation6 + $0x110] sm:$0xff] }
 0x206   :  { %4121 = vmatpush1.bf16.msra.mxu0 %v5827_v10  ;;  %4285 = vmatpush1.bf16.msra.mxu1 %v5829_v11  ;;  %v667_v10 = vld [vmem:[#allocation6 + $0xfa0] sm:$0xff]  ;;  %v664_v11 = vld [vmem:[#allocation6 + $0xf88] sm:$0xff] }
 0x207   :  { %4122 = vmatprep.subr.bf16.mxu0 %v5836_v12  ;;  %4286 = vmatprep.subr.bf16.mxu1 %v5838_v13  ;;  %v668_v12 = vld [vmem:[#allocation6 + $0xfa8] sm:$0xff]  ;;  %v5883_v13 = vcombine.low %v655_v62, %v659_v63  ;;  %v5892_v20 = vcombine.high %v663_v25, %v667_v10 }
 0x208   :  { %v5894_v16 = vcombine.high %v664_v11, %v668_v12  ;;  %v5893_v26 = vcombine.low %v664_v11, %v668_v12  ;;  %v209_v11 = vld [vmem:[#allocation6 + $0x150] sm:$0xff] }
 0x209   :  { %v213_v12 = vld [vmem:[#allocation6 + $0x170] sm:$0xff] }
 0x20a   :  { %4123 = vmatpush1.bf16.msra.mxu0 %v5835_v18  ;;  %4287 = vmatpush1.bf16.msra.mxu1 %v5837_v19  ;;  %v675_v18 = vld [vmem:[#allocation6 + $0xfe0] sm:$0xff]  ;;  %v672_v19 = vld [vmem:[#allocation6 + $0xfc8] sm:$0xff] }
 0x20b   :  { %4124 = vmatprep.subr.bf16.mxu0 %v5844_v23  ;;  %4288 = vmatprep.subr.bf16.mxu1 %v5846_v24  ;;  %v676_v23 = vld [vmem:[#allocation6 + $0xfe8] sm:$0xff]  ;;  %v5891_v24 = vcombine.low %v663_v25, %v667_v10  ;;  %v5900_v7 = vcombine.high %v671_v17, %v675_v18 }
 0x20c   :  { %v5902_v22 = vcombine.high %v672_v19, %v676_v23  ;;  %v5901_v35 = vcombine.low %v672_v19, %v676_v23  ;;  %v217_v19 = vld [vmem:[#allocation6 + $0x190] sm:$0xff] }
 0x20d   :  { %v221_v23 = vld [vmem:[#allocation6 + $0x1b0] sm:$0xff] }
 0x20e   :  { %4125 = vmatpush1.bf16.msra.mxu0 %v5843_v32  ;;  %4289 = vmatpush1.bf16.msra.mxu1 %v5845_v33  ;;  %v173_v32 = vld [vmem:[#allocation6 + $0x30] sm:$0xff]  ;;  %v170_v33 = vld [vmem:[#allocation6 + $0x18] sm:$0xff] }
 0x20f   :  { %4126 = vmatprep.subr.bf16.mxu0 %v5852_v34  ;;  %4290 = vmatprep.subr.bf16.mxu1 %v5854_v46  ;;  %v174_v34 = vld [vmem:[#allocation6 + $0x38] sm:$0xff]  ;;  %v5899_v46 = vcombine.low %v671_v17, %v675_v18  ;;  %v5400_v36 = vcombine.high %v169_v31, %v173_v32  ;;  %v5440_v17 = vcombine.high %v209_v11, %v213_v12 }
 0x210   :  { %v5402_v37 = vcombine.high %v170_v33, %v174_v34  ;;  %v5401_v60 = vcombine.low %v170_v33, %v174_v34  ;;  %v225_v33 = vld [vmem:[#allocation6 + $0x1d0] sm:$0xff] }
 0x211   :  { %v229_v34 = vld [vmem:[#allocation6 + $0x1f0] sm:$0xff] }
 0x212   :  { %4127 = vmatpush1.bf16.msra.mxu0 %v5851_v39  ;;  %4291 = vmatpush1.bf16.msra.mxu1 %v5853_v40  ;;  %v181_v39 = vld [vmem:[#allocation6 + $0x70] sm:$0xff]  ;;  %v178_v40 = vld [vmem:[#allocation6 + $0x58] sm:$0xff] }
 0x213   :  { %4128 = vmatprep.subr.bf16.mxu0 %v5860_v41  ;;  %4292 = vmatprep.subr.bf16.mxu1 %v5862_v42  ;;  %v182_v41 = vld [vmem:[#allocation6 + $0x78] sm:$0xff]  ;;  %v5399_v42 = vcombine.low %v169_v31, %v173_v32  ;;  %v5408_v44 = vcombine.high %v177_v38, %v181_v39  ;;  %v5407_v53 = vcombine.low %v177_v38, %v181_v39 }
 0x214   :  { %v5410_v47 = vcombine.high %v178_v40, %v182_v41  ;;  %v5409_v30 = vcombine.low %v178_v40, %v182_v41  ;;  %v5448_v31 = vcombine.high %v217_v19, %v221_v23  ;;  %v5456_v38 = vcombine.high %v225_v33, %v229_v34  ;;  %v233_v40 = vld [vmem:[#allocation6 + $0x210] sm:$0xff] }
 0x215   :  { %v237_v41 = vld [vmem:[#allocation6 + $0x230] sm:$0xff] }
 0x216   :  { %4129 = vmatpush1.bf16.msra.mxu0 %v5859_v49  ;;  %4293 = vmatpush1.bf16.msra.mxu1 %v5861_v50  ;;  %v185_v49 = vld [vmem:[#allocation6 + $0x90] sm:$0xff] }
 0x217   :  { %4130 = vmatprep.subr.bf16.mxu0 %v5868_v51  ;;  %4294 = vmatprep.subr.bf16.mxu1 %v5870_v52  ;;  %v189_v50 = vld [vmem:[#allocation6 + $0xb0] sm:$0xff]  ;;  %v186_v51 = vld [vmem:[#allocation6 + $0x98] sm:$0xff] }
 0x218   :  { %v190_v52 = vld [vmem:[#allocation6 + $0xb8] sm:$0xff]  ;;  %v5416_v55 = vcombine.high %v185_v49, %v189_v50 }
 0x219   :  { %v5418_v56 = vcombine.high %v186_v51, %v190_v52  ;;  %v5417_v62 = vcombine.low %v186_v51, %v190_v52  ;;  %v241_v51 = vld [vmem:[#allocation6 + $0x250] sm:$0xff] }
 0x21a   :  { %4131 = vmatpush1.bf16.msra.mxu0 %v5867_v58  ;;  %4295 = vmatpush1.bf16.msra.mxu1 %v5869_v8  ;;  %v197_v58 = vld [vmem:[#allocation6 + $0xf0] sm:$0xff]  ;;  %v194_v8 = vld [vmem:[#allocation6 + $0xd8] sm:$0xff] }
 0x21b   :  { %4132 = vmatprep.subr.bf16.mxu0 %v5876_v59  ;;  %4296 = vmatprep.subr.bf16.mxu1 %v5878_v61  ;;  %v198_v59 = vld [vmem:[#allocation6 + $0xf8] sm:$0xff]  ;;  %v5415_v61 = vcombine.low %v185_v49, %v189_v50  ;;  %v5424_v63 = vcombine.high %v193_v57, %v197_v58  ;;  %v5464_v49 = vcombine.high %v233_v40, %v237_v41  ;;  %v245_v52 = vld [vmem:[#allocation6 + $0x270] sm:$0xff] }
 0x21c   :  { %v5426_v1 = vcombine.high %v194_v8, %v198_v59 }
 0x21e   :  { %4133 = vmatpush1.bf16.msra.mxu0 %v5875_v3  ;;  %4297 = vmatpush1.bf16.msra.mxu1 %v5877_v4  ;;  %v205_v3 = vld [vmem:[#allocation6 + $0x130] sm:$0xff]  ;;  %v206_v4 = vld [vmem:[#allocation6 + $0x138] sm:$0xff] }
 0x21f   :  { %4134 = vmatprep.subr.bf16.mxu0 %v5884_v9  ;;  %4298 = vmatprep.subr.bf16.mxu1 %v5886_v27  ;;  %v5423_v9 = vcombine.low %v193_v57, %v197_v58  ;;  %v5425_v27 = vcombine.low %v194_v8, %v198_v59  ;;  %v5432_v25 = vcombine.high %v201_v2, %v205_v3  ;;  %v249_v8 = vld [vmem:[#allocation6 + $0x290] sm:$0xff] }
 0x220   :  { %v5472_v57 = vcombine.high %v241_v51, %v245_v52  ;;  %v253_v59 = vld [vmem:[#allocation6 + $0x2b0] sm:$0xff] }
 0x222   :  { %4135 = vmatpush1.bf16.msra.mxu0 %v5883_v13  ;;  %4299 = vmatpush1.bf16.msra.mxu1 %v5885_v14  ;;  %v210_v13 = vld [vmem:[#allocation6 + $0x158] sm:$0xff] }
 0x223   :  { %4136 = vmatprep.subr.bf16.mxu0 %v5892_v20  ;;  %4300 = vmatprep.subr.bf16.mxu1 %v5894_v16  ;;  %v214_v14 = vld [vmem:[#allocation6 + $0x178] sm:$0xff]  ;;  %v5431_v20 = vcombine.low %v201_v2, %v205_v3  ;;  %v5480_v2 = vcombine.high %v249_v8, %v253_v59 }
 0x224   :  { %v5442_v18 = vcombine.high %v210_v13, %v214_v14 }
 0x226   :  { %4137 = vmatpush1.bf16.msra.mxu0 %v5891_v24  ;;  %4301 = vmatpush1.bf16.msra.mxu1 %v5893_v26  ;;  %v218_v24 = vld [vmem:[#allocation6 + $0x198] sm:$0xff] }
 0x227   :  { %4138 = vmatprep.subr.bf16.mxu0 %v5900_v7  ;;  %4302 = vmatprep.subr.bf16.mxu1 %v5902_v22  ;;  %v222_v26 = vld [vmem:[#allocation6 + $0x1b8] sm:$0xff]  ;;  %v5439_v7 = vcombine.low %v209_v11, %v213_v12  ;;  %v5441_v22 = vcombine.low %v210_v13, %v214_v14  ;;  %v265_v13 = vld [vmem:[#allocation6 + $0x310] sm:$0xff] }
 0x228   :  { %v5450_v32 = vcombine.high %v218_v24, %v222_v26  ;;  %v269_v14 = vld [vmem:[#allocation6 + $0x330] sm:$0xff] }
 0x22a   :  { %4139 = vmatpush1.bf16.msra.mxu0 %v5899_v46  ;;  %4303 = vmatpush1.bf16.msra.mxu1 %v5901_v35  ;;  %v226_v46 = vld [vmem:[#allocation6 + $0x1d8] sm:$0xff] }
 0x22b   :  { %4313 = vmatprep.subr.bf16.mxu0 %v5400_v36  ;;  %4477 = vmatprep.subr.bf16.mxu1 %v5402_v37  ;;  %v230_v35 = vld [vmem:[#allocation6 + $0x1f8] sm:$0xff]  ;;  %v5447_v36 = vcombine.low %v217_v19, %v221_v23  ;;  %v5449_v37 = vcombine.low %v218_v24, %v222_v26  ;;  %v5496_v19 = vcombine.high %v265_v13, %v269_v14  ;;  %v273_v24 = vld [vmem:[#allocation6 + $0x350] sm:$0xff] }
 0x22c   :  { %v5458_v39 = vcombine.high %v226_v46, %v230_v35  ;;  %v277_v26 = vld [vmem:[#allocation6 + $0x370] sm:$0xff] }
 0x22d   :  { %4141 = vmatmul.mubr.bf16.vlgmr.msra.gmra.mrb[8].mxu0 %v6573_v6  ;;  %4305 = vmatmul.mubr.bf16.vlgmr.msra.gmra.mrb[8].mxu1 %v6573_v6 }
 0x22e   :  { %4314 = vmatpush1.bf16.msra.mxu0 %v5399_v42  ;;  %4345 = vmatprep.mubr.bf16.mxu0 %v6496_v45  ;;  %v234_v42 = vld [vmem:[#allocation6 + $0x218] sm:$0xff] }
 0x22f   :  { %4478 = vmatpush1.bf16.msra.mxu1 %v5401_v60  ;;  %4509 = vmatprep.mubr.bf16.mxu1 %v6496_v45  ;;  %v202_v45 = vld [vmem:[#allocation6 + $0x118] sm:$0xff] }
 0x230   :  { %4315 = vmatprep.subr.bf16.mxu0 %v5408_v44  ;;  %4479 = vmatprep.subr.bf16.mxu1 %v5410_v47  ;;  %v5434_v10 = vcombine.high %v202_v45, %v206_v4  ;;  %v5433_v16 = vcombine.low %v202_v45, %v206_v4  ;;  %v238_v60 = vld [vmem:[#allocation6 + $0x238] sm:$0xff]  ;;  %v5455_v44 = vcombine.low %v225_v33, %v229_v34  ;;  %v257_v45 = vld [vmem:[#allocation6 + $0x2d0] sm:$0xff] }
 0x231   :  { %v5457_v47 = vcombine.low %v226_v46, %v230_v35  ;;  %v5466_v50 = vcombine.high %v234_v42, %v238_v60  ;;  %v261_v4 = vld [vmem:[#allocation6 + $0x2f0] sm:$0xff]  ;;  %v5504_v33 = vcombine.high %v273_v24, %v277_v26 }
 0x232   :  { %4316 = vmatpush1.bf16.msra.mxu0 %v5407_v53  ;;  %v242_v53 = vld [vmem:[#allocation6 + $0x258] sm:$0xff]  ;;  %v5488_v11 = vcombine.high %v257_v45, %v261_v4  ;;  %v281_v46 = vld [vmem:[#allocation6 + $0x390] sm:$0xff] }
 0x233   :  { %4480 = vmatpush1.bf16.msra.mxu1 %v5409_v30  ;;  %4317 = vmatprep.subr.bf16.mxu0 %v5416_v55  ;;  %v246_v30 = vld [vmem:[#allocation6 + $0x278] sm:$0xff]  ;;  %v5463_v55 = vcombine.low %v233_v40, %v237_v41  ;;  %v285_v35 = vld [vmem:[#allocation6 + $0x3b0] sm:$0xff] }
 0x234   :  { %4481 = vmatprep.subr.bf16.mxu1 %v5418_v56  ;;  %v5465_v56 = vcombine.low %v234_v42, %v238_v60  ;;  %v5474_v58 = vcombine.high %v242_v53, %v246_v30  ;;  %v5512_v40 = vcombine.high %v281_v46, %v285_v35  ;;  %v289_v42 = vld [vmem:[#allocation6 + $0x3d0] sm:$0xff] }
 0x235   :  { %v293_v60 = vld [vmem:[#allocation6 + $0x3f0] sm:$0xff] }
 0x236   :  { %4318 = vmatpush1.bf16.msra.mxu0 %v5415_v61  ;;  %v250_v61 = vld [vmem:[#allocation6 + $0x298] sm:$0xff] }
 0x237   :  { %4482 = vmatpush1.bf16.msra.mxu1 %v5417_v62  ;;  %4319 = vmatprep.subr.bf16.mxu0 %v5424_v63  ;;  %v254_v62 = vld [vmem:[#allocation6 + $0x2b8] sm:$0xff]  ;;  %v5471_v63 = vcombine.low %v241_v51, %v245_v52  ;;  %v5520_v51 = vcombine.high %v289_v42, %v293_v60 }
 0x238   :  { %4483 = vmatprep.subr.bf16.mxu1 %v5426_v1  ;;  %v5473_v1 = vcombine.low %v242_v53, %v246_v30  ;;  %v5482_v3 = vcombine.high %v250_v61, %v254_v62  ;;  %v297_v53 = vld [vmem:[#allocation6 + $0x410] sm:$0xff] }
 0x239   :  { %v301_v30 = vld [vmem:[#allocation6 + $0x430] sm:$0xff] }
 0x23a   :  { %4320 = vmatpush1.bf16.msra.mxu0 %v5423_v9  ;;  %v258_v9 = vld [vmem:[#allocation6 + $0x2d8] sm:$0xff] }
 0x23b   :  { %4484 = vmatpush1.bf16.msra.mxu1 %v5425_v27  ;;  %4321 = vmatprep.subr.bf16.mxu0 %v5432_v25  ;;  %v262_v27 = vld [vmem:[#allocation6 + $0x2f8] sm:$0xff]  ;;  %v5479_v25 = vcombine.low %v249_v8, %v253_v59  ;;  %v5528_v8 = vcombine.high %v297_v53, %v301_v30 }
 0x23c   :  { %4485 = vmatprep.subr.bf16.mxu1 %v5434_v10  ;;  %v5481_v10 = vcombine.low %v250_v61, %v254_v62  ;;  %v5490_v12 = vcombine.high %v258_v9, %v262_v27  ;;  %v305_v61 = vld [vmem:[#allocation6 + $0x450] sm:$0xff] }
 0x23d   :  { %v309_v62 = vld [vmem:[#allocation6 + $0x470] sm:$0xff] }
 0x23e   :  { %4322 = vmatpush1.bf16.msra.mxu0 %v5431_v20  ;;  %v266_v20 = vld [vmem:[#allocation6 + $0x318] sm:$0xff] }
 0x23f   :  { %4486 = vmatpush1.bf16.msra.mxu1 %v5433_v16  ;;  %4323 = vmatprep.subr.bf16.mxu0 %v5440_v17  ;;  %v270_v16 = vld [vmem:[#allocation6 + $0x338] sm:$0xff]  ;;  %v5487_v17 = vcombine.low %v257_v45, %v261_v4  ;;  %v5536_v45 = vcombine.high %v305_v61, %v309_v62  ;;  %v313_v4 = vld [vmem:[#allocation6 + $0x490] sm:$0xff] }
 0x240   :  { %4487 = vmatprep.subr.bf16.mxu1 %v5442_v18  ;;  %v5489_v18 = vcombine.low %v258_v9, %v262_v27  ;;  %v5498_v23 = vcombine.high %v266_v20, %v270_v16  ;;  %v317_v9 = vld [vmem:[#allocation6 + $0x4b0] sm:$0xff] }
 0x242   :  { %4324 = vmatpush1.bf16.msra.mxu0 %v5439_v7  ;;  %v274_v7 = vld [vmem:[#allocation6 + $0x358] sm:$0xff] }
 0x243   :  { %4488 = vmatpush1.bf16.msra.mxu1 %v5441_v22  ;;  %4325 = vmatprep.subr.bf16.mxu0 %v5448_v31  ;;  %v278_v22 = vld [vmem:[#allocation6 + $0x378] sm:$0xff]  ;;  %v5495_v31 = vcombine.low %v265_v13, %v269_v14  ;;  %v5544_v13 = vcombine.high %v313_v4, %v317_v9 }
 0x244   :  { %4489 = vmatprep.subr.bf16.mxu1 %v5450_v32  ;;  %v5497_v32 = vcombine.low %v266_v20, %v270_v16  ;;  %v5506_v34 = vcombine.high %v274_v7, %v278_v22  ;;  %v321_v20 = vld [vmem:[#allocation6 + $0x4d0] sm:$0xff] }
 0x245   :  { %v325_v16 = vld [vmem:[#allocation6 + $0x4f0] sm:$0xff] }
 0x246   :  { %4326 = vmatpush1.bf16.msra.mxu0 %v5447_v36  ;;  %v282_v36 = vld [vmem:[#allocation6 + $0x398] sm:$0xff] }
 0x247   :  { %4490 = vmatpush1.bf16.msra.mxu1 %v5449_v37  ;;  %4327 = vmatprep.subr.bf16.mxu0 %v5456_v38  ;;  %v286_v37 = vld [vmem:[#allocation6 + $0x3b8] sm:$0xff]  ;;  %v5503_v38 = vcombine.low %v273_v24, %v277_v26  ;;  %v329_v26 = vld [vmem:[#allocation6 + $0x510] sm:$0xff] }
 0x248   :  { %4491 = vmatprep.subr.bf16.mxu1 %v5458_v39  ;;  %v5505_v39 = vcombine.low %v274_v7, %v278_v22  ;;  %v5514_v41 = vcombine.high %v282_v36, %v286_v37  ;;  %v333_v7 = vld [vmem:[#allocation6 + $0x530] sm:$0xff]  ;;  %v330_v22 = vld [vmem:[#allocation6 + $0x518] sm:$0xff] }
 0x24a   :  { %4328 = vmatpush1.bf16.msra.mxu0 %v5455_v44  ;;  %v290_v44 = vld [vmem:[#allocation6 + $0x3d8] sm:$0xff] }
 0x24b   :  { %4492 = vmatpush1.bf16.msra.mxu1 %v5457_v47  ;;  %4329 = vmatprep.subr.bf16.mxu0 %v5464_v49  ;;  %v294_v47 = vld [vmem:[#allocation6 + $0x3f8] sm:$0xff]  ;;  %v5511_v49 = vcombine.low %v281_v46, %v285_v35  ;;  %v337_v46 = vld [vmem:[#allocation6 + $0x550] sm:$0xff] }
 0x24c   :  { %4493 = vmatprep.subr.bf16.mxu1 %v5466_v50  ;;  %v5513_v50 = vcombine.low %v282_v36, %v286_v37  ;;  %v5522_v52 = vcombine.high %v290_v44, %v294_v47  ;;  %v341_v35 = vld [vmem:[#allocation6 + $0x570] sm:$0xff]  ;;  %v338_v36 = vld [vmem:[#allocation6 + $0x558] sm:$0xff] }
 0x24d   :  { %v342_v37 = vld [vmem:[#allocation6 + $0x578] sm:$0xff] }
 0x24e   :  { %4330 = vmatpush1.bf16.msra.mxu0 %v5463_v55  ;;  %v298_v55 = vld [vmem:[#allocation6 + $0x418] sm:$0xff] }
 0x24f   :  { %4494 = vmatpush1.bf16.msra.mxu1 %v5465_v56  ;;  %4331 = vmatprep.subr.bf16.mxu0 %v5472_v57  ;;  %v302_v56 = vld [vmem:[#allocation6 + $0x438] sm:$0xff]  ;;  %v5519_v57 = vcombine.low %v289_v42, %v293_v60  ;;  %v345_v42 = vld [vmem:[#allocation6 + $0x590] sm:$0xff] }
 0x250   :  { %4495 = vmatprep.subr.bf16.mxu1 %v5474_v58  ;;  %v5521_v58 = vcombine.low %v290_v44, %v294_v47  ;;  %v5530_v59 = vcombine.high %v298_v55, %v302_v56  ;;  %v349_v60 = vld [vmem:[#allocation6 + $0x5b0] sm:$0xff]  ;;  %v346_v44 = vld [vmem:[#allocation6 + $0x598] sm:$0xff] }
 0x251   :  { %v350_v47 = vld [vmem:[#allocation6 + $0x5b8] sm:$0xff] }
 0x252   :  { %4332 = vmatpush1.bf16.msra.mxu0 %v5471_v63  ;;  %v5527_v63 = vcombine.low %v297_v53, %v301_v30  ;;  %v353_v53 = vld [vmem:[#allocation6 + $0x5d0] sm:$0xff] }
 0x253   :  { %4496 = vmatpush1.bf16.msra.mxu1 %v5473_v1  ;;  %4333 = vmatprep.subr.bf16.mxu0 %v5480_v2  ;;  %v306_v1 = vld [vmem:[#allocation6 + $0x458] sm:$0xff]  ;;  %v357_v30 = vld [vmem:[#allocation6 + $0x5f0] sm:$0xff] }
 0x254   :  { %4497 = vmatprep.subr.bf16.mxu1 %v5482_v3  ;;  %v310_v2 = vld [vmem:[#allocation6 + $0x478] sm:$0xff]  ;;  %v5529_v3 = vcombine.low %v298_v55, %v302_v56 }
 0x255   :  { %v5538_v27 = vcombine.high %v306_v1, %v310_v2  ;;  %v354_v55 = vld [vmem:[#allocation6 + $0x5d8] sm:$0xff] }
 0x256   :  { %4334 = vmatpush1.bf16.msra.mxu0 %v5479_v25  ;;  %v314_v25 = vld [vmem:[#allocation6 + $0x498] sm:$0xff] }
 0x257   :  { %4498 = vmatpush1.bf16.msra.mxu1 %v5481_v10  ;;  %4335 = vmatprep.subr.bf16.mxu0 %v5488_v11  ;;  %v318_v10 = vld [vmem:[#allocation6 + $0x4b8] sm:$0xff]  ;;  %v5535_v11 = vcombine.low %v305_v61, %v309_v62  ;;  %v361_v61 = vld [vmem:[#allocation6 + $0x610] sm:$0xff] }
 0x258   :  { %4499 = vmatprep.subr.bf16.mxu1 %v5490_v12  ;;  %v5537_v12 = vcombine.low %v306_v1, %v310_v2  ;;  %v5546_v14 = vcombine.high %v314_v25, %v318_v10  ;;  %v358_v56 = vld [vmem:[#allocation6 + $0x5f8] sm:$0xff]  ;;  %v365_v62 = vld [vmem:[#allocation6 + $0x630] sm:$0xff]  ;;  %v5583_v2 = vcombine.low %v353_v53, %v357_v30 }
 0x259   :  { %v366_v1 = vld [vmem:[#allocation6 + $0x638] sm:$0xff] }
 0x25a   :  { %4336 = vmatpush1.bf16.msra.mxu0 %v5487_v17  ;;  %v322_v17 = vld [vmem:[#allocation6 + $0x4d8] sm:$0xff] }
 0x25b   :  { %4500 = vmatpush1.bf16.msra.mxu1 %v5489_v18  ;;  %4337 = vmatprep.subr.bf16.mxu0 %v5496_v19  ;;  %v326_v18 = vld [vmem:[#allocation6 + $0x4f8] sm:$0xff]  ;;  %v5543_v19 = vcombine.low %v313_v4, %v317_v9  ;;  %v369_v9 = vld [vmem:[#allocation6 + $0x650] sm:$0xff] }
 0x25c   :  { %4501 = vmatprep.subr.bf16.mxu1 %v5498_v23  ;;  %v5552_v23 = vcombine.high %v321_v20, %v325_v16  ;;  %v5554_v24 = vcombine.high %v322_v17, %v326_v18 }
 0x25e   :  { %4338 = vmatpush1.bf16.msra.mxu0 %v5495_v31  ;;  %v334_v31 = vld [vmem:[#allocation6 + $0x538] sm:$0xff] }
 0x25f   :  { %4502 = vmatpush1.bf16.msra.mxu1 %v5497_v32  ;;  %4339 = vmatprep.subr.bf16.mxu0 %v5504_v33  ;;  %v5553_v32 = vcombine.low %v322_v17, %v326_v18  ;;  %v5560_v33 = vcombine.high %v329_v26, %v333_v7  ;;  %v378_v17 = vld [vmem:[#allocation6 + $0x698] sm:$0xff] }
 0x260   :  { %4503 = vmatprep.subr.bf16.mxu1 %v5506_v34  ;;  %v5562_v34 = vcombine.high %v330_v22, %v334_v31  ;;  %v382_v18 = vld [vmem:[#allocation6 + $0x6b8] sm:$0xff] }
 0x262   :  { %4340 = vmatpush1.bf16.msra.mxu0 %v5503_v38  ;;  %v5559_v38 = vcombine.low %v329_v26, %v333_v7  ;;  %v385_v26 = vld [vmem:[#allocation6 + $0x6d0] sm:$0xff] }
 0x263   :  { %4504 = vmatpush1.bf16.msra.mxu1 %v5505_v39  ;;  %4341 = vmatprep.subr.bf16.mxu0 %v5512_v40  ;;  %v5561_v39 = vcombine.low %v330_v22, %v334_v31  ;;  %v5568_v40 = vcombine.high %v337_v46, %v341_v35  ;;  %v389_v7 = vld [vmem:[#allocation6 + $0x6f0] sm:$0xff]  ;;  %v386_v22 = vld [vmem:[#allocation6 + $0x6d8] sm:$0xff] }
 0x264   :  { %4505 = vmatprep.subr.bf16.mxu1 %v5514_v41  ;;  %v5570_v41 = vcombine.high %v338_v36, %v342_v37  ;;  %v390_v31 = vld [vmem:[#allocation6 + $0x6f8] sm:$0xff] }
 0x266   :  { %4342 = vmatpush1.bf16.msra.mxu0 %v5511_v49  ;;  %v5567_v49 = vcombine.low %v337_v46, %v341_v35  ;;  %v393_v46 = vld [vmem:[#allocation6 + $0x710] sm:$0xff] }
 0x267   :  { %4506 = vmatpush1.bf16.msra.mxu1 %v5513_v50  ;;  %4343 = vmatprep.subr.bf16.mxu0 %v5520_v51  ;;  %v5569_v50 = vcombine.low %v338_v36, %v342_v37  ;;  %v5576_v51 = vcombine.high %v345_v42, %v349_v60  ;;  %v397_v35 = vld [vmem:[#allocation6 + $0x730] sm:$0xff]  ;;  %v394_v36 = vld [vmem:[#allocation6 + $0x718] sm:$0xff] }
 0x268   :  { %4507 = vmatprep.subr.bf16.mxu1 %v5522_v52  ;;  %v5578_v52 = vcombine.high %v346_v44, %v350_v47  ;;  %v398_v37 = vld [vmem:[#allocation6 + $0x738] sm:$0xff] }
 0x26a   :  { %4344 = vmatpush1.bf16.msra.mxu0 %v5519_v57  ;;  %v5575_v57 = vcombine.low %v345_v42, %v349_v60  ;;  %v401_v42 = vld [vmem:[#allocation6 + $0x750] sm:$0xff] }
 0x26b   :  { %4508 = vmatpush1.bf16.msra.mxu1 %v5521_v58  ;;  %4354 = vmatprep.subr.bf16.mxu0 %v5528_v8  ;;  %v5577_v58 = vcombine.low %v346_v44, %v350_v47  ;;  %v5584_v8 = vcombine.high %v353_v53, %v357_v30  ;;  %v405_v60 = vld [vmem:[#allocation6 + $0x770] sm:$0xff]  ;;  %v402_v44 = vld [vmem:[#allocation6 + $0x758] sm:$0xff] }
 0x26c   :  { %4518 = vmatprep.subr.bf16.mxu1 %v5530_v59  ;;  %v5586_v59 = vcombine.high %v354_v55, %v358_v56  ;;  %v406_v47 = vld [vmem:[#allocation6 + $0x778] sm:$0xff]  ;;  %v409_v53 = vld [vmem:[#allocation6 + $0x790] sm:$0xff] }
 0x26d   :  { %4346 = vmatmul.mubr.bf16.vlgmr.msra.gmra.mrb[12].mxu0 %v6502_v48  ;;  %v413_v30 = vld [vmem:[#allocation6 + $0x7b0] sm:$0xff] }
 0x26e   :  { %4510 = vmatmul.mubr.bf16.vlgmr.msra.gmra.mrb[12].mxu1 %v6502_v48  ;;  %4355 = vmatpush1.bf16.msra.mxu0 %v5527_v63  ;;  %v5545_v48 = vcombine.low %v314_v25, %v318_v10  ;;  %v362_v63 = vld [vmem:[#allocation6 + $0x618] sm:$0xff] }
 0x26f   :  { %4386 = vmatprep.mubr.bf16.mxu0 %v6509_v5  ;;  %4519 = vmatpush1.bf16.msra.mxu1 %v5529_v3  ;;  %v5585_v3 = vcombine.low %v354_v55, %v358_v56  ;;  %v5594_v4 = vcombine.high %v362_v63, %v366_v1  ;;  %v370_v25 = vld [vmem:[#allocation6 + $0x658] sm:$0xff] }
 0x270   :  { %4550 = vmatprep.mubr.bf16.mxu1 %v6509_v5  ;;  %4356 = vmatprep.subr.bf16.mxu0 %v5536_v45  ;;  %v5551_v5 = vcombine.low %v321_v20, %v325_v16  ;;  %v5592_v45 = vcombine.high %v361_v61, %v365_v62  ;;  %v374_v10 = vld [vmem:[#allocation6 + $0x678] sm:$0xff]  ;;  %v377_v20 = vld [vmem:[#allocation6 + $0x690] sm:$0xff] }
 0x271   :  { %4520 = vmatprep.subr.bf16.mxu1 %v5538_v27  ;;  %v373_v27 = vld [vmem:[#allocation6 + $0x670] sm:$0xff]  ;;  %v410_v55 = vld [vmem:[#allocation6 + $0x798] sm:$0xff] }
 0x272   :  { %4357 = vmatpush1.bf16.msra.mxu0 %v5535_v11  ;;  %v5591_v11 = vcombine.low %v361_v61, %v365_v62  ;;  %v381_v16 = vld [vmem:[#allocation6 + $0x6b0] sm:$0xff]  ;;  %v414_v56 = vld [vmem:[#allocation6 + $0x7b8] sm:$0xff] }
 0x273   :  { %4521 = vmatpush1.bf16.msra.mxu1 %v5537_v12  ;;  %4358 = vmatprep.subr.bf16.mxu0 %v5544_v13  ;;  %v5593_v12 = vcombine.low %v362_v63, %v366_v1  ;;  %v5600_v13 = vcombine.high %v369_v9, %v373_v27  ;;  %v417_v61 = vld [vmem:[#allocation6 + $0x7d0] sm:$0xff]  ;;  %v418_v63 = vld [vmem:[#allocation6 + $0x7d8] sm:$0xff] }
 0x274   :  { %4522 = vmatprep.subr.bf16.mxu1 %v5546_v14  ;;  %v5602_v14 = vcombine.high %v370_v25, %v374_v10  ;;  %v421_v62 = vld [vmem:[#allocation6 + $0x7f0] sm:$0xff]  ;;  %v422_v1 = vld [vmem:[#allocation6 + $0x7f8] sm:$0xff] }
 0x276   :  { %4359 = vmatpush1.bf16.msra.mxu0 %v5543_v19  ;;  %v5599_v19 = vcombine.low %v369_v9, %v373_v27  ;;  %v425_v9 = vld [vmem:[#allocation6 + $0x810] sm:$0xff] }
 0x277   :  { %4523 = vmatpush1.bf16.msra.mxu1 %v5545_v48  ;;  %4360 = vmatprep.subr.bf16.mxu0 %v5552_v23  ;;  %v5601_v48 = vcombine.low %v370_v25, %v374_v10  ;;  %v5608_v23 = vcombine.high %v377_v20, %v381_v16  ;;  %v429_v27 = vld [vmem:[#allocation6 + $0x830] sm:$0xff]  ;;  %v426_v25 = vld [vmem:[#allocation6 + $0x818] sm:$0xff] }
 0x278   :  { %4524 = vmatprep.subr.bf16.mxu1 %v5554_v24  ;;  %v5610_v24 = vcombine.high %v378_v17, %v382_v18  ;;  %v430_v10 = vld [vmem:[#allocation6 + $0x838] sm:$0xff] }
 0x27a   :  { %4361 = vmatpush1.bf16.msra.mxu0 %v5551_v5  ;;  %v5607_v5 = vcombine.low %v377_v20, %v381_v16  ;;  %v433_v20 = vld [vmem:[#allocation6 + $0x850] sm:$0xff] }
 0x27b   :  { %4525 = vmatpush1.bf16.msra.mxu1 %v5553_v32  ;;  %4362 = vmatprep.subr.bf16.mxu0 %v5560_v33  ;;  %v5609_v32 = vcombine.low %v378_v17, %v382_v18  ;;  %v5616_v33 = vcombine.high %v385_v26, %v389_v7  ;;  %v437_v16 = vld [vmem:[#allocation6 + $0x870] sm:$0xff]  ;;  %v5655_v17 = vcombine.low %v425_v9, %v429_v27  ;;  %v434_v18 = vld [vmem:[#allocation6 + $0x858] sm:$0xff] }
 0x27c   :  { %4526 = vmatprep.subr.bf16.mxu1 %v5562_v34  ;;  %v5618_v34 = vcombine.high %v386_v22, %v390_v31 }
 0x27e   :  { %4363 = vmatpush1.bf16.msra.mxu0 %v5559_v38  ;;  %v5615_v38 = vcombine.low %v385_v26, %v389_v7  ;;  %v445_v26 = vld [vmem:[#allocation6 + $0x8b0] sm:$0xff] }
 0x27f   :  { %4527 = vmatpush1.bf16.msra.mxu1 %v5561_v39  ;;  %4364 = vmatprep.subr.bf16.mxu0 %v5568_v40  ;;  %v5617_v39 = vcombine.low %v386_v22, %v390_v31  ;;  %v5624_v40 = vcombine.high %v393_v46, %v397_v35  ;;  %v442_v22 = vld [vmem:[#allocation6 + $0x898] sm:$0xff] }
 0x280   :  { %4528 = vmatprep.subr.bf16.mxu1 %v5570_v41  ;;  %v5626_v41 = vcombine.high %v394_v36, %v398_v37  ;;  %v446_v31 = vld [vmem:[#allocation6 + $0x8b8] sm:$0xff] }
 0x282   :  { %4365 = vmatpush1.bf16.msra.mxu0 %v5567_v49  ;;  %v5623_v49 = vcombine.low %v393_v46, %v397_v35  ;;  %v449_v46 = vld [vmem:[#allocation6 + $0x8d0] sm:$0xff] }
 0x283   :  { %4529 = vmatpush1.bf16.msra.mxu1 %v5569_v50  ;;  %4366 = vmatprep.subr.bf16.mxu0 %v5576_v51  ;;  %v5625_v50 = vcombine.low %v394_v36, %v398_v37  ;;  %v5632_v51 = vcombine.high %v401_v42, %v405_v60  ;;  %v453_v35 = vld [vmem:[#allocation6 + $0x8f0] sm:$0xff]  ;;  %v450_v36 = vld [vmem:[#allocation6 + $0x8d8] sm:$0xff] }
 0x284   :  { %4530 = vmatprep.subr.bf16.mxu1 %v5578_v52  ;;  %v5634_v52 = vcombine.high %v402_v44, %v406_v47  ;;  %v454_v37 = vld [vmem:[#allocation6 + $0x8f8] sm:$0xff] }
 0x286   :  { %4367 = vmatpush1.bf16.msra.mxu0 %v5575_v57  ;;  %v5631_v57 = vcombine.low %v401_v42, %v405_v60  ;;  %v461_v42 = vld [vmem:[#allocation6 + $0x930] sm:$0xff]  ;;  %v458_v60 = vld [vmem:[#allocation6 + $0x918] sm:$0xff] }
 0x287   :  { %4531 = vmatpush1.bf16.msra.mxu1 %v5577_v58  ;;  %4368 = vmatprep.subr.bf16.mxu0 %v5584_v8  ;;  %v5633_v58 = vcombine.low %v402_v44, %v406_v47  ;;  %v5640_v8 = vcombine.high %v409_v53, %v413_v30  ;;  %v462_v44 = vld [vmem:[#allocation6 + $0x938] sm:$0xff]  ;;  %v5681_v47 = vcombine.low %v450_v36, %v454_v37 }
 0x288   :  { %4532 = vmatprep.subr.bf16.mxu1 %v5586_v59  ;;  %v5642_v59 = vcombine.high %v410_v55, %v414_v56 }
 0x28a   :  { %4369 = vmatpush1.bf16.msra.mxu0 %v5583_v2  ;;  %v5639_v2 = vcombine.low %v409_v53, %v413_v30  ;;  %v466_v53 = vld [vmem:[#allocation6 + $0x958] sm:$0xff] }
 0x28b   :  { %4533 = vmatpush1.bf16.msra.mxu1 %v5585_v3  ;;  %4370 = vmatprep.subr.bf16.mxu0 %v5592_v45  ;;  %v5641_v3 = vcombine.low %v410_v55, %v414_v56  ;;  %v5648_v45 = vcombine.high %v417_v61, %v421_v62  ;;  %v470_v30 = vld [vmem:[#allocation6 + $0x978] sm:$0xff]  ;;  %v5689_v56 = vcombine.low %v458_v60, %v462_v44 }
 0x28c   :  { %4534 = vmatprep.subr.bf16.mxu1 %v5594_v4  ;;  %v5650_v4 = vcombine.high %v418_v63, %v422_v1 }
 0x28e   :  { %4371 = vmatpush1.bf16.msra.mxu0 %v5591_v11  ;;  %v5647_v11 = vcombine.low %v417_v61, %v421_v62  ;;  %v474_v61 = vld [vmem:[#allocation6 + $0x998] sm:$0xff] }
 0x28f   :  { %4535 = vmatpush1.bf16.msra.mxu1 %v5593_v12  ;;  %4372 = vmatprep.subr.bf16.mxu0 %v5600_v13  ;;  %v5649_v12 = vcombine.low %v418_v63, %v422_v1  ;;  %v5656_v13 = vcombine.high %v425_v9, %v429_v27  ;;  %v478_v62 = vld [vmem:[#allocation6 + $0x9b8] sm:$0xff]  ;;  %v5697_v1 = vcombine.low %v466_v53, %v470_v30 }
 0x290   :  { %4536 = vmatprep.subr.bf16.mxu1 %v5602_v14  ;;  %v5658_v14 = vcombine.high %v426_v25, %v430_v10  ;;  %v482_v9 = vld [vmem:[#allocation6 + $0x9d8] sm:$0xff] }
 0x291   :  { %v486_v27 = vld [vmem:[#allocation6 + $0x9f8] sm:$0xff] }
 0x292   :  { %4373 = vmatpush1.bf16.msra.mxu0 %v5599_v19  ;;  %v438_v19 = vld [vmem:[#allocation6 + $0x878] sm:$0xff] }
 0x293   :  { %4537 = vmatpush1.bf16.msra.mxu1 %v5601_v48  ;;  %4374 = vmatprep.subr.bf16.mxu0 %v5608_v23  ;;  %v5657_v48 = vcombine.low %v426_v25, %v430_v10  ;;  %v5664_v23 = vcombine.high %v433_v20, %v437_v16  ;;  %v5666_v7 = vcombine.high %v434_v18, %v438_v19 }
 0x294   :  { %4538 = vmatprep.subr.bf16.mxu1 %v5610_v24  ;;  %v441_v24 = vld [vmem:[#allocation6 + $0x890] sm:$0xff]  ;;  %v5705_v10 = vcombine.low %v474_v61, %v478_v62 }
 0x296   :  { %4375 = vmatpush1.bf16.msra.mxu0 %v5607_v5  ;;  %v5663_v5 = vcombine.low %v433_v20, %v437_v16  ;;  %v490_v20 = vld [vmem:[#allocation6 + $0xa18] sm:$0xff] }
 0x297   :  { %4539 = vmatpush1.bf16.msra.mxu1 %v5609_v32  ;;  %4376 = vmatprep.subr.bf16.mxu0 %v5616_v33  ;;  %v5665_v32 = vcombine.low %v434_v18, %v438_v19  ;;  %v5672_v33 = vcombine.high %v441_v24, %v445_v26  ;;  %v494_v16 = vld [vmem:[#allocation6 + $0xa38] sm:$0xff]  ;;  %v5713_v18 = vcombine.low %v482_v9, %v486_v27 }
 0x298   :  { %4540 = vmatprep.subr.bf16.mxu1 %v5618_v34  ;;  %v5674_v34 = vcombine.high %v442_v22, %v446_v31 }
 0x29a   :  { %4377 = vmatpush1.bf16.msra.mxu0 %v5615_v38  ;;  %v5671_v38 = vcombine.low %v441_v24, %v445_v26  ;;  %v501_v24 = vld [vmem:[#allocation6 + $0xa70] sm:$0xff]  ;;  %v498_v26 = vld [vmem:[#allocation6 + $0xa58] sm:$0xff] }
 0x29b   :  { %4541 = vmatpush1.bf16.msra.mxu1 %v5617_v39  ;;  %4378 = vmatprep.subr.bf16.mxu0 %v5624_v40  ;;  %v5680_v39 = vcombine.high %v449_v46, %v453_v35  ;;  %v5682_v40 = vcombine.high %v450_v36, %v454_v37 }
 0x29c   :  { %4542 = vmatprep.subr.bf16.mxu1 %v5626_v41  ;;  %v457_v41 = vld [vmem:[#allocation6 + $0x910] sm:$0xff] }
 0x29d   :  { %v5687_v55 = vcombine.low %v457_v41, %v461_v42 }
 0x29e   :  { %4379 = vmatpush1.bf16.msra.mxu0 %v5623_v49  ;;  %v5688_v49 = vcombine.high %v457_v41, %v461_v42  ;;  %v514_v41 = vld [vmem:[#allocation6 + $0xad8] sm:$0xff] }
 0x29f   :  { %4543 = vmatpush1.bf16.msra.mxu1 %v5625_v50  ;;  %4380 = vmatprep.subr.bf16.mxu0 %v5632_v51  ;;  %v5690_v50 = vcombine.high %v458_v60, %v462_v44  ;;  %v465_v51 = vld [vmem:[#allocation6 + $0x950] sm:$0xff]  ;;  %v518_v42 = vld [vmem:[#allocation6 + $0xaf8] sm:$0xff] }
 0x2a0   :  { %4544 = vmatprep.subr.bf16.mxu1 %v5634_v52  ;;  %v469_v52 = vld [vmem:[#allocation6 + $0x970] sm:$0xff] }
 0x2a1   :  { %v5695_v63 = vcombine.low %v465_v51, %v469_v52 }
 0x2a2   :  { %4381 = vmatpush1.bf16.msra.mxu0 %v5631_v57  ;;  %v5696_v57 = vcombine.high %v465_v51, %v469_v52  ;;  %v522_v51 = vld [vmem:[#allocation6 + $0xb18] sm:$0xff] }
 0x2a3   :  { %4545 = vmatpush1.bf16.msra.mxu1 %v5633_v58  ;;  %4382 = vmatprep.subr.bf16.mxu0 %v5640_v8  ;;  %v5698_v58 = vcombine.high %v466_v53, %v470_v30  ;;  %v473_v8 = vld [vmem:[#allocation6 + $0x990] sm:$0xff]  ;;  %v526_v52 = vld [vmem:[#allocation6 + $0xb38] sm:$0xff]  ;;  %v5745_v30 = vcombine.low %v514_v41, %v518_v42 }
 0x2a4   :  { %4546 = vmatprep.subr.bf16.mxu1 %v5642_v59  ;;  %v477_v59 = vld [vmem:[#allocation6 + $0x9b0] sm:$0xff] }
 0x2a5   :  { %v5703_v25 = vcombine.low %v473_v8, %v477_v59 }
 0x2a6   :  { %4383 = vmatpush1.bf16.msra.mxu0 %v5639_v2  ;;  %v5704_v2 = vcombine.high %v473_v8, %v477_v59  ;;  %v530_v8 = vld [vmem:[#allocation6 + $0xb58] sm:$0xff] }
 0x2a7   :  { %4547 = vmatpush1.bf16.msra.mxu1 %v5641_v3  ;;  %4384 = vmatprep.subr.bf16.mxu0 %v5648_v45  ;;  %v5706_v3 = vcombine.high %v474_v61, %v478_v62  ;;  %v481_v45 = vld [vmem:[#allocation6 + $0x9d0] sm:$0xff]  ;;  %v534_v59 = vld [vmem:[#allocation6 + $0xb78] sm:$0xff]  ;;  %v5753_v62 = vcombine.low %v522_v51, %v526_v52 }
 0x2a8   :  { %4548 = vmatprep.subr.bf16.mxu1 %v5650_v4  ;;  %v485_v4 = vld [vmem:[#allocation6 + $0x9f0] sm:$0xff] }
 0x2aa   :  { %4385 = vmatpush1.bf16.msra.mxu0 %v5647_v11  ;;  %v5712_v11 = vcombine.high %v481_v45, %v485_v4 }
 0x2ab   :  { %4549 = vmatpush1.bf16.msra.mxu1 %v5649_v12  ;;  %4395 = vmatprep.subr.bf16.mxu0 %v5656_v13  ;;  %v5714_v12 = vcombine.high %v482_v9, %v486_v27  ;;  %v489_v13 = vld [vmem:[#allocation6 + $0xa10] sm:$0xff]  ;;  %v5761_v27 = vcombine.low %v530_v8, %v534_v59 }
 0x2ac   :  { %4559 = vmatprep.subr.bf16.mxu1 %v5658_v14  ;;  %v493_v14 = vld [vmem:[#allocation6 + $0xa30] sm:$0xff] }
 0x2ad   :  { %4387 = vmatmul.mubr.bf16.vlgmr.msra.gmra.mrb[12].mxu0 %v6546_v43  ;;  %v5720_v19 = vcombine.high %v489_v13, %v493_v14 }
 0x2ae   :  { %4551 = vmatmul.mubr.bf16.vlgmr.msra.gmra.mrb[12].mxu1 %v6546_v43  ;;  %4396 = vmatpush1.bf16.msra.mxu0 %v5655_v17  ;;  %v5673_v43 = vcombine.low %v442_v22, %v446_v31  ;;  %v5711_v17 = vcombine.low %v481_v45, %v485_v4  ;;  %v5719_v22 = vcombine.low %v489_v13, %v493_v14  ;;  %v538_v45 = vld [vmem:[#allocation6 + $0xb98] sm:$0xff] }
 0x2af   :  { %4427 = vmatprep.mubr.bf16.mxu0 %v6549_v54  ;;  %4560 = vmatpush1.bf16.msra.mxu1 %v5657_v48  ;;  %v5722_v48 = vcombine.high %v490_v20, %v494_v16  ;;  %v5721_v31 = vcombine.low %v490_v20, %v494_v16  ;;  %v542_v4 = vld [vmem:[#allocation6 + $0xbb8] sm:$0xff] }
 0x2b0   :  { %4591 = vmatprep.mubr.bf16.mxu1 %v6549_v54  ;;  %4397 = vmatprep.subr.bf16.mxu0 %v5664_v23  ;;  %v5679_v54 = vcombine.low %v449_v46, %v453_v35  ;;  %v497_v23 = vld [vmem:[#allocation6 + $0xa50] sm:$0xff]  ;;  %v506_v46 = vld [vmem:[#allocation6 + $0xa98] sm:$0xff]  ;;  %v5769_v16 = vcombine.low %v538_v45, %v542_v4 }
 0x2b1   :  { %4561 = vmatprep.subr.bf16.mxu1 %v5666_v7  ;;  %v502_v7 = vld [vmem:[#allocation6 + $0xa78] sm:$0xff]  ;;  %v5727_v36 = vcombine.low %v497_v23, %v501_v24 }
 0x2b2   :  { %4398 = vmatpush1.bf16.msra.mxu0 %v5663_v5  ;;  %v5728_v5 = vcombine.high %v497_v23, %v501_v24  ;;  %v510_v35 = vld [vmem:[#allocation6 + $0xab8] sm:$0xff]  ;;  %v5729_v37 = vcombine.low %v498_v26, %v502_v7 }
 0x2b3   :  { %4562 = vmatpush1.bf16.msra.mxu1 %v5665_v32  ;;  %4399 = vmatprep.subr.bf16.mxu0 %v5672_v33  ;;  %v5730_v32 = vcombine.high %v498_v26, %v502_v7  ;;  %v505_v33 = vld [vmem:[#allocation6 + $0xa90] sm:$0xff]  ;;  %v5737_v44 = vcombine.low %v506_v46, %v510_v35  ;;  %v546_v13 = vld [vmem:[#allocation6 + $0xbd8] sm:$0xff] }
 0x2b4   :  { %4563 = vmatprep.subr.bf16.mxu1 %v5674_v34  ;;  %v509_v34 = vld [vmem:[#allocation6 + $0xab0] sm:$0xff]  ;;  %v550_v14 = vld [vmem:[#allocation6 + $0xbf8] sm:$0xff] }
 0x2b5   :  { %v5735_v60 = vcombine.low %v505_v33, %v509_v34  ;;  %v554_v23 = vld [vmem:[#allocation6 + $0xc18] sm:$0xff]  ;;  %v5777_v7 = vcombine.low %v546_v13, %v550_v14 }
 0x2b6   :  { %4400 = vmatpush1.bf16.msra.mxu0 %v5671_v38  ;;  %v5736_v38 = vcombine.high %v505_v33, %v509_v34  ;;  %v558_v24 = vld [vmem:[#allocation6 + $0xc38] sm:$0xff] }
 0x2b7   :  { %4564 = vmatpush1.bf16.msra.mxu1 %v5673_v43  ;;  %4401 = vmatprep.subr.bf16.mxu0 %v5680_v39  ;;  %v5738_v43 = vcombine.high %v506_v46, %v510_v35  ;;  %v513_v39 = vld [vmem:[#allocation6 + $0xad0] sm:$0xff]  ;;  %v562_v34 = vld [vmem:[#allocation6 + $0xc58] sm:$0xff]  ;;  %v5785_v35 = vcombine.low %v554_v23, %v558_v24 }
 0x2b8   :  { %4565 = vmatprep.subr.bf16.mxu1 %v5682_v40  ;;  %v517_v40 = vld [vmem:[#allocation6 + $0xaf0] sm:$0xff]  ;;  %v566_v46 = vld [vmem:[#allocation6 + $0xc78] sm:$0xff] }
 0x2b9   :  { %v5743_v53 = vcombine.low %v513_v39, %v517_v40 }
 0x2ba   :  { %4402 = vmatpush1.bf16.msra.mxu0 %v5679_v54  ;;  %v5744_v54 = vcombine.high %v513_v39, %v517_v40  ;;  %v570_v39 = vld [vmem:[#allocation6 + $0xc98] sm:$0xff] }
 0x2bb   :  { %4566 = vmatpush1.bf16.msra.mxu1 %v5681_v47  ;;  %4403 = vmatprep.subr.bf16.mxu0 %v5688_v49  ;;  %v5746_v47 = vcombine.high %v514_v41, %v518_v42  ;;  %v521_v49 = vld [vmem:[#allocation6 + $0xb10] sm:$0xff]  ;;  %v574_v40 = vld [vmem:[#allocation6 + $0xcb8] sm:$0xff]  ;;  %v5793_v42 = vcombine.low %v562_v34, %v566_v46 }
 0x2bc   :  { %4567 = vmatprep.subr.bf16.mxu1 %v5690_v50  ;;  %v525_v50 = vld [vmem:[#allocation6 + $0xb30] sm:$0xff] }
 0x2bd   :  { %v5751_v61 = vcombine.low %v521_v49, %v525_v50 }
 0x2be   :  { %4404 = vmatpush1.bf16.msra.mxu0 %v5687_v55  ;;  %v5752_v55 = vcombine.high %v521_v49, %v525_v50  ;;  %v578_v49 = vld [vmem:[#allocation6 + $0xcd8] sm:$0xff] }
 0x2bf   :  { %4568 = vmatpush1.bf16.msra.mxu1 %v5689_v56  ;;  %4405 = vmatprep.subr.bf16.mxu0 %v5696_v57  ;;  %v5754_v56 = vcombine.high %v522_v51, %v526_v52  ;;  %v529_v57 = vld [vmem:[#allocation6 + $0xb50] sm:$0xff]  ;;  %v582_v50 = vld [vmem:[#allocation6 + $0xcf8] sm:$0xff] }
 0x2c0   :  { %4569 = vmatprep.subr.bf16.mxu1 %v5698_v58  ;;  %v533_v58 = vld [vmem:[#allocation6 + $0xb70] sm:$0xff] }
 0x2c1   :  { %v5759_v9 = vcombine.low %v529_v57, %v533_v58 }
 0x2c2   :  { %4406 = vmatpush1.bf16.msra.mxu0 %v5695_v63  ;;  %v5760_v63 = vcombine.high %v529_v57, %v533_v58  ;;  %v590_v57 = vld [vmem:[#allocation6 + $0xd38] sm:$0xff]  ;;  %v5809_v58 = vcombine.low %v578_v49, %v582_v50 }
 0x2c3   :  { %4570 = vmatpush1.bf16.msra.mxu1 %v5697_v1  ;;  %4407 = vmatprep.subr.bf16.mxu0 %v5704_v2  ;;  %v5762_v1 = vcombine.high %v530_v8, %v534_v59  ;;  %v537_v2 = vld [vmem:[#allocation6 + $0xb90] sm:$0xff] }
 0x2c4   :  { %4571 = vmatprep.subr.bf16.mxu1 %v5706_v3  ;;  %v541_v3 = vld [vmem:[#allocation6 + $0xbb0] sm:$0xff] }
 0x2c5   :  { %v5767_v20 = vcombine.low %v537_v2, %v541_v3 }
 0x2c6   :  { %4408 = vmatpush1.bf16.msra.mxu0 %v5703_v25  ;;  %v5768_v25 = vcombine.high %v537_v2, %v541_v3 }
 0x2c7   :  { %4572 = vmatpush1.bf16.msra.mxu1 %v5705_v10  ;;  %4409 = vmatprep.subr.bf16.mxu0 %v5712_v11  ;;  %v5770_v10 = vcombine.high %v538_v45, %v542_v4  ;;  %v545_v11 = vld [vmem:[#allocation6 + $0xbd0] sm:$0xff] }
 0x2c8   :  { %4573 = vmatprep.subr.bf16.mxu1 %v5714_v12  ;;  %v549_v12 = vld [vmem:[#allocation6 + $0xbf0] sm:$0xff] }
 0x2c9   :  { %v5775_v26 = vcombine.low %v545_v11, %v549_v12 }
 0x2ca   :  { %4410 = vmatpush1.bf16.msra.mxu0 %v5711_v17  ;;  %v5776_v17 = vcombine.high %v545_v11, %v549_v12 }
 0x2cb   :  { %4574 = vmatpush1.bf16.msra.mxu1 %v5713_v18  ;;  %4411 = vmatprep.subr.bf16.mxu0 %v5720_v19  ;;  %v5778_v18 = vcombine.high %v546_v13, %v550_v14  ;;  %v553_v19 = vld [vmem:[#allocation6 + $0xc10] sm:$0xff] }
 0x2cc   :  { %4575 = vmatprep.subr.bf16.mxu1 %v5722_v48  ;;  %v557_v48 = vld [vmem:[#allocation6 + $0xc30] sm:$0xff] }
 0x2cd   :  { %v5783_v33 = vcombine.low %v553_v19, %v557_v48 }
 0x2ce   :  { %4412 = vmatpush1.bf16.msra.mxu0 %v5719_v22  ;;  %v5784_v22 = vcombine.high %v553_v19, %v557_v48 }
 0x2cf   :  { %4576 = vmatpush1.bf16.msra.mxu1 %v5721_v31  ;;  %4413 = vmatprep.subr.bf16.mxu0 %v5728_v5  ;;  %v5786_v31 = vcombine.high %v554_v23, %v558_v24  ;;  %v561_v5 = vld [vmem:[#allocation6 + $0xc50] sm:$0xff]  ;;  %v610_v23 = vld [vmem:[#allocation6 + $0xdd8] sm:$0xff] }
 0x2d0   :  { %4577 = vmatprep.subr.bf16.mxu1 %v5730_v32  ;;  %v565_v32 = vld [vmem:[#allocation6 + $0xc70] sm:$0xff]  ;;  %v614_v24 = vld [vmem:[#allocation6 + $0xdf8] sm:$0xff] }
 0x2d1   :  { %v5791_v41 = vcombine.low %v561_v5, %v565_v32 }
 0x2d2   :  { %4414 = vmatpush1.bf16.msra.mxu0 %v5727_v36  ;;  %v5792_v36 = vcombine.high %v561_v5, %v565_v32 }
 0x2d3   :  { %4578 = vmatpush1.bf16.msra.mxu1 %v5729_v37  ;;  %4415 = vmatprep.subr.bf16.mxu0 %v5736_v38  ;;  %v569_v37 = vld [vmem:[#allocation6 + $0xc90] sm:$0xff] }
 0x2d4   :  { %4579 = vmatprep.subr.bf16.mxu1 %v5738_v43  ;;  %v573_v38 = vld [vmem:[#allocation6 + $0xcb0] sm:$0xff]  ;;  %v5794_v43 = vcombine.high %v562_v34, %v566_v46  ;;  %v5842_v34 = vcombine.high %v610_v23, %v614_v24 }
 0x2d5   :  { %v5799_v51 = vcombine.low %v569_v37, %v573_v38  ;;  %v617_v46 = vld [vmem:[#allocation6 + $0xe10] sm:$0xff] }
 0x2d6   :  { %4416 = vmatpush1.bf16.msra.mxu0 %v5735_v60  ;;  %v5800_v60 = vcombine.high %v569_v37, %v573_v38  ;;  %v622_v37 = vld [vmem:[#allocation6 + $0xe38] sm:$0xff] }
 0x2d7   :  { %4580 = vmatpush1.bf16.msra.mxu1 %v5737_v44  ;;  %4417 = vmatprep.subr.bf16.mxu0 %v5744_v54  ;;  %v5802_v44 = vcombine.high %v570_v39, %v574_v40  ;;  %v577_v54 = vld [vmem:[#allocation6 + $0xcd0] sm:$0xff] }
 0x2d8   :  { %4581 = vmatprep.subr.bf16.mxu1 %v5746_v47  ;;  %v581_v47 = vld [vmem:[#allocation6 + $0xcf0] sm:$0xff] }
 0x2d9   :  { %v5808_v52 = vcombine.high %v577_v54, %v581_v47 }
 0x2da   :  { %4418 = vmatpush1.bf16.msra.mxu0 %v5743_v53  ;;  %v5810_v53 = vcombine.high %v578_v49, %v582_v50 }
 0x2db   :  { %4582 = vmatpush1.bf16.msra.mxu1 %v5745_v30  ;;  %4419 = vmatprep.subr.bf16.mxu0 %v5752_v55  ;;  %v585_v30 = vld [vmem:[#allocation6 + $0xd10] sm:$0xff] }
 0x2dc   :  { %4583 = vmatprep.subr.bf16.mxu1 %v5754_v56  ;;  %v589_v55 = vld [vmem:[#allocation6 + $0xd30] sm:$0xff]  ;;  %v586_v56 = vld [vmem:[#allocation6 + $0xd18] sm:$0xff] }
 0x2dd   :  { %v5816_v8 = vcombine.high %v585_v30, %v589_v55  ;;  %v5818_v59 = vcombine.high %v586_v56, %v590_v57  ;;  %v5815_v2 = vcombine.low %v585_v30, %v589_v55  ;;  %v5817_v3 = vcombine.low %v586_v56, %v590_v57  ;;  %v6599_v55 = vld [vmem:[#allocation7] sm:$0xff] }
 0x2de   :  { %4420 = vmatpush1.bf16.msra.mxu0 %v5751_v61  ;;  %v593_v61 = vld [vmem:[#allocation6 + $0xd50] sm:$0xff] }
 0x2df   :  { %4584 = vmatpush1.bf16.msra.mxu1 %v5753_v62  ;;  %4421 = vmatprep.subr.bf16.mxu0 %v5760_v63  ;;  %v597_v62 = vld [vmem:[#allocation6 + $0xd70] sm:$0xff]  ;;  %v594_v63 = vld [vmem:[#allocation6 + $0xd58] sm:$0xff] }
 0x2e0   :  { %4585 = vmatprep.subr.bf16.mxu1 %v5762_v1  ;;  %v598_v1 = vld [vmem:[#allocation6 + $0xd78] sm:$0xff]  ;;  %v5824_v45 = vcombine.high %v593_v61, %v597_v62  ;;  %v5823_v11 = vcombine.low %v593_v61, %v597_v62  ;;  %v6603_v62 = vrot.slane %v6599_v55, %v6479_v21 }
 0x2e1   :  { %v5826_v4 = vcombine.high %v594_v63, %v598_v1  ;;  %v5825_v12 = vcombine.low %v594_v63, %v598_v1  ;;  %v646_v61 = vld [vmem:[#allocation6 + $0xef8] sm:$0xff] }
 0x2e2   :  { %4422 = vmatpush1.bf16.msra.mxu0 %v5759_v9  ;;  %v601_v9 = vld [vmem:[#allocation6 + $0xd90] sm:$0xff] }
 0x2e3   :  { %4586 = vmatpush1.bf16.msra.mxu1 %v5761_v27  ;;  %4423 = vmatprep.subr.bf16.mxu0 %v5768_v25  ;;  %v605_v27 = vld [vmem:[#allocation6 + $0xdb0] sm:$0xff]  ;;  %v602_v25 = vld [vmem:[#allocation6 + $0xd98] sm:$0xff] }
 0x2e4   :  { %4587 = vmatprep.subr.bf16.mxu1 %v5770_v10  ;;  %v606_v10 = vld [vmem:[#allocation6 + $0xdb8] sm:$0xff]  ;;  %v5832_v13 = vcombine.high %v601_v9, %v605_v27 }
 0x2e5   :  { %v5833_v32 = vcombine.low %v602_v25, %v606_v10 }
 0x2e6   :  { %4424 = vmatpush1.bf16.msra.mxu0 %v5767_v20 }
 0x2e7   :  { %4588 = vmatpush1.bf16.msra.mxu1 %v5769_v16  ;;  %4425 = vmatprep.subr.bf16.mxu0 %v5776_v17  ;;  %v5834_v16 = vcombine.high %v602_v25, %v606_v10  ;;  %v609_v17 = vld [vmem:[#allocation6 + $0xdd0] sm:$0xff]  ;;  %v4665_v25 = vcombine.high %v6603_v62, %v6603_v62 }
 0x2e8   :  { %4589 = vmatprep.subr.bf16.mxu1 %v5778_v18  ;;  %v613_v18 = vld [vmem:[#allocation6 + $0xdf0] sm:$0xff] }
 0x2e9   :  { %v5839_v38 = vcombine.low %v609_v17, %v613_v18 }
 0x2ea   :  { %4426 = vmatpush1.bf16.msra.mxu0 %v5775_v26 }
 0x2eb   :  { %4590 = vmatpush1.bf16.msra.mxu1 %v5777_v7  ;;  %4436 = vmatprep.subr.bf16.mxu0 %v5784_v22  ;;  %v5831_v22 = vcombine.low %v601_v9, %v605_v27  ;;  %v650_v9 = vld [vmem:[#allocation6 + $0xf18] sm:$0xff] }
 0x2ec   :  { %4600 = vmatprep.subr.bf16.mxu1 %v5786_v31  ;;  %v654_v27 = vld [vmem:[#allocation6 + $0xf38] sm:$0xff] }
 0x2ed   :  { %4428 = vmatmul.mubr.bf16.vlgmr.msra.gmra.mrb[12].mxu0 %v6562_v15 }
 0x2ee   :  { %4592 = vmatmul.mubr.bf16.vlgmr.msra.gmra.mrb[12].mxu1 %v6562_v15  ;;  %4437 = vmatpush1.bf16.msra.mxu0 %v5783_v33  ;;  %v5801_v15 = vcombine.low %v570_v39, %v574_v40  ;;  %v5840_v33 = vcombine.high %v609_v17, %v613_v18  ;;  %v661_v17 = vld [vmem:[#allocation6 + $0xf70] sm:$0xff]  ;;  %v658_v18 = vld [vmem:[#allocation6 + $0xf58] sm:$0xff] }
 0x2ef   :  { %4468 = vmatprep.mubr.bf16.mxu0 %v6565_v29  ;;  %4601 = vmatpush1.bf16.msra.mxu1 %v5785_v35  ;;  %v621_v35 = vld [vmem:[#allocation6 + $0xe30] sm:$0xff] }
 0x2f0   :  { %4632 = vmatprep.mubr.bf16.mxu1 %v6565_v29  ;;  %4438 = vmatprep.subr.bf16.mxu0 %v5792_v36  ;;  %v5807_v29 = vcombine.low %v577_v54, %v581_v47  ;;  %v618_v36 = vld [vmem:[#allocation6 + $0xe18] sm:$0xff]  ;;  %v5848_v39 = vcombine.high %v617_v46, %v621_v35  ;;  %v5847_v54 = vcombine.low %v617_v46, %v621_v35 }
 0x2f1   :  { %4602 = vmatprep.subr.bf16.mxu1 %v5794_v43  ;;  %v5841_v43 = vcombine.low %v610_v23, %v614_v24  ;;  %v5850_v40 = vcombine.high %v618_v36, %v622_v37  ;;  %v5849_v47 = vcombine.low %v618_v36, %v622_v37  ;;  %v662_v23 = vld [vmem:[#allocation6 + $0xf78] sm:$0xff]  ;;  %v4687_v24 = vrot.slane %v4665_v25, %v6479_v21  ;;  %v6135_v25 = vld [vmem:[#allocation9 + $0x18] sm:$0xff]  }
 0x2f2   :  { %4439 = vmatpush1.bf16.msra.mxu0 %v5791_v41  ;;  %v625_v41 = vld [vmem:[#allocation6 + $0xe50] sm:$0xff]  ;;  %v5889_v36 = vcombine.low %v658_v18, %v662_v23 }
 0x2f3   :  { %4603 = vmatpush1.bf16.msra.mxu1 %v5793_v42  ;;  %4440 = vmatprep.subr.bf16.mxu0 %v5800_v60  ;;  %v629_v42 = vld [vmem:[#allocation6 + $0xe70] sm:$0xff]  ;;  %v626_v60 = vld [vmem:[#allocation6 + $0xe58] sm:$0xff]  ;;  %v4697_v46 = vcombine.high %v4687_v24, %v4687_v24 }
 0x2f4   :  { %4604 = vmatprep.subr.bf16.mxu1 %v5802_v44  ;;  %v630_v44 = vld [vmem:[#allocation6 + $0xe78] sm:$0xff]  ;;  %v5856_v49 = vcombine.high %v625_v41, %v629_v42  ;;  %v5855_v30 = vcombine.low %v625_v41, %v629_v42 }
 0x2f5   :  { %v5858_v50 = vcombine.high %v626_v60, %v630_v44  ;;  %v5857_v56 = vcombine.low %v626_v60, %v630_v44  ;;  %v674_v41 = vld [vmem:[#allocation6 + $0xfd8] sm:$0xff]  ;;  %v4721_v60 = vpack.i.b16 %v4697_v46, %v4697_v46 }
 0x2f6   :  { %4441 = vmatpush1.bf16.msra.mxu0 %v5799_v51  ;;  %v633_v51 = vld [vmem:[#allocation6 + $0xe90] sm:$0xff]  ;;  %v678_v42 = vld [vmem:[#allocation6 + $0xff8] sm:$0xff] }
 0x2f7   :  { %4605 = vmatpush1.bf16.msra.mxu1 %v5801_v15  ;;  %4442 = vmatprep.subr.bf16.mxu0 %v5808_v52  ;;  %v637_v15 = vld [vmem:[#allocation6 + $0xeb0] sm:$0xff]  ;;  %v634_v52 = vld [vmem:[#allocation6 + $0xe98] sm:$0xff] }
 0x2f8   :  { %4606 = vmatprep.subr.bf16.mxu1 %v5810_v53  ;;  %v638_v53 = vld [vmem:[#allocation6 + $0xeb8] sm:$0xff]  ;;  %v5864_v57 = vcombine.high %v633_v51, %v637_v15  ;;  %v5863_v63 = vcombine.low %v633_v51, %v637_v15 }
 0x2f9   :  { %v5865_v1 = vcombine.low %v634_v52, %v638_v53  ;;  %v6148_v46 = vld [vmem:[#allocation9 + $0xb0] sm:$0xff]  }
 0x2fa   :  { %4443 = vmatpush1.bf16.msra.mxu0 %v5807_v29  ;;  %v5866_v29 = vcombine.high %v634_v52, %v638_v53  ;;  %v4726_v52 = vrot.slane %v4721_v60, %v6491_v28  ;;  %v6155_v60 = vld [vmem:[#allocation9 + $0x100] sm:$0xff]  }
 0x2fb   :  { %4607 = vmatpush1.bf16.msra.mxu1 %v5809_v58  ;;  %4444 = vmatprep.subr.bf16.mxu0 %v5816_v8  ;;  %v641_v58 = vld [vmem:[#allocation6 + $0xed0] sm:$0xff] }
 0x2fc   :  { %4608 = vmatprep.subr.bf16.mxu1 %v5818_v59  ;;  %v645_v8 = vld [vmem:[#allocation6 + $0xef0] sm:$0xff]  ;;  %v642_v59 = vld [vmem:[#allocation6 + $0xed8] sm:$0xff] }
 0x2fd   :  { %v5871_v10 = vcombine.low %v641_v58, %v645_v8 }
 0x2fe   :  { %4445 = vmatpush1.bf16.msra.mxu0 %v5815_v2  ;;  %v5872_v2 = vcombine.high %v641_v58, %v645_v8  ;;  %v6123_v8 = vld [vmem:[#allocation9] sm:$0xff]  }
 0x2ff   :  { %4609 = vmatpush1.bf16.msra.mxu1 %v5817_v3  ;;  %4446 = vmatprep.subr.bf16.mxu0 %v5824_v45  ;;  %v5874_v3 = vcombine.high %v642_v59, %v646_v61  ;;  %v649_v45 = vld [vmem:[#allocation6 + $0xf10] sm:$0xff] }
 0x300   :  { %v6591_v14 = vpop.f32.mrb[8].mxu0  ;;  %v6593_v20 = vpop.f32.mrb[8].mxu1  ;;  %4610 = vmatprep.subr.bf16.mxu1 %v5826_v4  ;;  %v653_v4 = vld [vmem:[#allocation6 + $0xf30] sm:$0xff] }
 0x301   :  { %v6595_v19 = vpop.f32.mrb[9].mxu0  ;;  %v6597_v48 = vpop.f32.mrb[9].mxu1 }
 0x302   :  { %v4146_v26 = vpop.f32.mrb[10].mxu0  ;;  %v4310_v7 = vpop.f32.mrb[10].mxu1  ;;  %4447 = vmatpush1.bf16.msra.mxu0 %v5823_v11  ;;  %v5873_v11 = vcombine.low %v642_v59, %v646_v61  ;;  %v4644_v15 = vpack.c.bf16 %v6597_v48, %v6597_v48  ;;  %v6125_v59 = vld [vmem:[#allocation9 + $0x48] sm:$0xff]  }
 0x303   :  { %4611 = vmatpush1.bf16.msra.mxu1 %v5825_v12  ;;  %v4147_v31 = vpop.f32.mrb[11].mxu0  ;;  %v4311_v5 = vpop.f32.mrb[11].mxu1  ;;  %4448 = vmatprep.subr.bf16.mxu0 %v5832_v13  ;;  %v5880_v12 = vcombine.high %v649_v45, %v653_v4  ;;  %v5882_v13 = vcombine.high %v650_v9, %v654_v27  ;;  %v5879_v26 = vcombine.low %v649_v45, %v653_v4  ;;  %v6126_v61 = vld [vmem:[#allocation9 + $0xc8] sm:$0xff]   ;;  %v6130_v45 = vld [vmem:[#allocation9 + $0xd0] sm:$0xff]  }
 0x304   :  { %4612 = vmatprep.subr.bf16.mxu1 %v5834_v16  ;;  %v657_v16 = vld [vmem:[#allocation6 + $0xf50] sm:$0xff]  ;;  %v5881_v7 = vcombine.low %v650_v9, %v654_v27  ;;  %v5890_v31 = vcombine.high %v658_v18, %v662_v23  ;;  %v4758_v58 = vadd.bf16 %v4726_v52, %v4644_v15  ;;  %v6131_v4 = vld [vmem:[#allocation9 + $0x10] sm:$0xff]   ;;  %v6133_v27 = vld [vmem:[#allocation9 + $0x58] sm:$0xff]  }
 0x305   :  { %v665_v5 = vld [vmem:[#allocation6 + $0xf90] sm:$0xff]  ;;  %v5887_v35 = vcombine.low %v657_v16, %v661_v17  ;;  %v6132_v9 = vld [vmem:[#allocation9 + $0x90] sm:$0xff]  }
 0x306   :  { %4449 = vmatpush1.bf16.msra.mxu0 %v5831_v22  ;;  %v5888_v22 = vcombine.high %v657_v16, %v661_v17  ;;  %v6139_v16 = vld [vmem:[#allocation9 + $0x20] sm:$0xff]   ;;  %v6141_v18 = vld [vmem:[#allocation9 + $0x68] sm:$0xff]   ;;  %v6161_v15 = vld [vmem:[#allocation9 + $0x150] sm:$0xff]  }
 0x307   :  { %4613 = vmatpush1.bf16.msra.mxu1 %v5833_v32  ;;  %4450 = vmatprep.subr.bf16.mxu0 %v5840_v33  ;;  %v669_v32 = vld [vmem:[#allocation6 + $0xfb0] sm:$0xff]  ;;  %v666_v33 = vld [vmem:[#allocation6 + $0xf98] sm:$0xff]  ;;  %v6140_v17 = vld [vmem:[#allocation9 + $0xa0] sm:$0xff]  }
 0x308   :  { %4614 = vmatprep.subr.bf16.mxu1 %v5842_v34  ;;  %v670_v34 = vld [vmem:[#allocation6 + $0xfb8] sm:$0xff]  ;;  %v5896_v37 = vcombine.high %v665_v5, %v669_v32  ;;  %v5895_v44 = vcombine.low %v665_v5, %v669_v32 }
 0x309   :  { %v6147_v32 = vld [vmem:[#allocation9 + $0x30] sm:$0xff]  }
 0x30a   :  { %4451 = vmatpush1.bf16.msra.mxu0 %v5839_v38  ;;  %v5898_v38 = vcombine.high %v666_v33, %v670_v34  ;;  %v6162_v52 = vld [vmem:[#allocation9 + $0x1d0] sm:$0xff]  }
 0x30b   :  { %4615 = vmatpush1.bf16.msra.mxu1 %v5841_v43  ;;  %4452 = vmatprep.subr.bf16.mxu0 %v5848_v39  ;;  %v673_v43 = vld [vmem:[#allocation6 + $0xfd0] sm:$0xff] }
 0x30c   :  { %4616 = vmatprep.subr.bf16.mxu1 %v5850_v40  ;;  %v677_v39 = vld [vmem:[#allocation6 + $0xff0] sm:$0xff]  ;;  %v4707_v40 = vpack.i.b16 %v4687_v24, %v4687_v24 }
 0x30d   :  { %v5903_v53 = vcombine.low %v673_v43, %v677_v39  ;;  %v6142_v24 = vld [vmem:[#allocation9 + $0xe8] sm:$0xff]  }
 0x30e   :  { %4453 = vmatpush1.bf16.msra.mxu0 %v5847_v54  ;;  %v5897_v54 = vcombine.low %v666_v33, %v670_v34  ;;  %v4712_v51 = vrot.slane %v4707_v40, %v6491_v28  ;;  %v4641_v33 = vpack.c.bf16 %v6591_v14, %v6591_v14  ;;  %v6152_v40 = vld [vmem:[#allocation9 + $0xb8] sm:$0xff]   ;;  %v6153_v14 = vld [vmem:[#allocation9 + $0x140] sm:$0xff]  }
 0x30f   :  { %4617 = vmatpush1.bf16.msra.mxu1 %v5849_v47  ;;  %4454 = vmatprep.subr.bf16.mxu0 %v5856_v49  ;;  %v5904_v47 = vcombine.high %v673_v43, %v677_v39  ;;  %v5906_v49 = vcombine.high %v674_v41, %v678_v42  ;;  %v6151_v43 = vld [vmem:[#allocation9 + $0x38] sm:$0xff]  }
 0x310   :  { %4618 = vmatprep.subr.bf16.mxu1 %v5858_v50  ;;  %v4642_v50 = vpack.c.bf16 %v6595_v19, %v6595_v19  ;;  %v6124_v19 = vld [vmem:[#allocation9 + $0x80] sm:$0xff]  }
 0x312   :  { %4455 = vmatpush1.bf16.msra.mxu0 %v5855_v30  ;;  %v5905_v30 = vcombine.low %v674_v41, %v678_v42  ;;  %v6154_v42 = vld [vmem:[#allocation9 + $0x1c0] sm:$0xff]  }
 0x313   :  { %4619 = vmatpush1.bf16.msra.mxu1 %v5857_v56  ;;  %4456 = vmatprep.subr.bf16.mxu0 %v5864_v57  ;;  %v6121_v56 = vld [vmem:[#allocation9 + $0x40] sm:$0xff]  }
 0x314   :  { %4620 = vmatprep.subr.bf16.mxu1 %v5866_v29  ;;  %v6122_v57 = vld [vmem:[#allocation9 + $0xc0] sm:$0xff]   ;;  %v4756_v29 = vadd.bf16 %v4712_v51, %v4642_v50  ;;  %v6159_v50 = vld [vmem:[#allocation9 + $0x108] sm:$0xff]  }
 0x315   :  { %v6160_v51 = vld [vmem:[#allocation9 + $0x188] sm:$0xff]  }
 0x316   :  { %4457 = vmatpush1.bf16.msra.mxu0 %v5863_v63  ;;  %v4764_v48 = vmax.bf16 %v6336_v0, %v4756_v29  ;;  %v4766_v63 = vmax.bf16 %v6336_v0, %v4758_v58  ;;  %v6167_v29 = vld [vmem:[#allocation9 + $0x118] sm:$0xff]  }
 0x317   :  { %4621 = vmatpush1.bf16.msra.mxu1 %v5865_v1  ;;  %4458 = vmatprep.subr.bf16.mxu0 %v5872_v2  ;;  %v6127_v1 = vld [vmem:[#allocation9 + $0x8] sm:$0xff]   ;;  %v6168_v58 = vld [vmem:[#allocation9 + $0x198] sm:$0xff]  }
 0x318   :  { %4622 = vmatprep.subr.bf16.mxu1 %v5874_v3  ;;  %v6128_v2 = vld [vmem:[#allocation9 + $0x88] sm:$0xff]   ;;  %v6129_v3 = vld [vmem:[#allocation9 + $0x50] sm:$0xff]  }
 0x31a   :  { %4459 = vmatpush1.bf16.msra.mxu0 %v5871_v10  ;;  %v6136_v10 = vld [vmem:[#allocation9 + $0x98] sm:$0xff]  }
 0x31b   :  { %4623 = vmatpush1.bf16.msra.mxu1 %v5873_v11  ;;  %4460 = vmatprep.subr.bf16.mxu0 %v5880_v12  ;;  %v6137_v11 = vld [vmem:[#allocation9 + $0x60] sm:$0xff]   ;;  %v4673_v12 = vrot.slane %v6603_v62, %v6479_v21  ;;  %v6146_v62 = vld [vmem:[#allocation9 + $0xf0] sm:$0xff]  }
 0x31c   :  { %4624 = vmatprep.subr.bf16.mxu1 %v5882_v13  ;;  %v6138_v13 = vld [vmem:[#allocation9 + $0xe0] sm:$0xff]  }
 0x31d   :  { %v4695_v23 = vcombine.high %v4673_v12, %v4673_v12 }
 0x31e   :  { %4461 = vmatpush1.bf16.msra.mxu0 %v5879_v26  ;;  %v6143_v26 = vld [vmem:[#allocation9 + $0x28] sm:$0xff]  }
 0x31f   :  { %4625 = vmatpush1.bf16.msra.mxu1 %v5881_v7  ;;  %4462 = vmatprep.subr.bf16.mxu0 %v5888_v22  ;;  %v4700_v7 = vpack.i.b16 %v4673_v12, %v4673_v12  ;;  %v6144_v22 = vld [vmem:[#allocation9 + $0xa8] sm:$0xff]   ;;  %v4714_v5 = vpack.i.b16 %v4695_v23, %v4695_v23 }
 0x320   :  { %4626 = vmatprep.subr.bf16.mxu1 %v5890_v31  ;;  %v6145_v31 = vld [vmem:[#allocation9 + $0x70] sm:$0xff]  }
 0x321   :  { %v4705_v34 = vrot.slane %v4700_v7, %v6491_v28 }
 0x322   :  { %4463 = vmatpush1.bf16.msra.mxu0 %v5887_v35  ;;  %v6149_v35 = vld [vmem:[#allocation9 + $0x78] sm:$0xff]  }
 0x323   :  { %4627 = vmatpush1.bf16.msra.mxu1 %v5889_v36  ;;  %4464 = vmatprep.subr.bf16.mxu0 %v5896_v37  ;;  %v4643_v36 = vpack.c.bf16 %v6593_v20, %v6593_v20  ;;  %v4719_v37 = vrot.slane %v4714_v5, %v6491_v28  ;;  %v4755_v39 = vadd.bf16 %v4705_v34, %v4641_v33  ;;  %v6156_v20 = vld [vmem:[#allocation9 + $0x180] sm:$0xff]  }
 0x324   :  { %4628 = vmatprep.subr.bf16.mxu1 %v5898_v38  ;;  %v6150_v38 = vld [vmem:[#allocation9 + $0xf8] sm:$0xff]  }
 0x325   :  { %v4757_v41 = vadd.bf16 %v4719_v37, %v4643_v36 }
 0x326   :  { %4465 = vmatpush1.bf16.msra.mxu0 %v5895_v44  ;;  %v4763_v44 = vmax.bf16 %v6336_v0, %v4755_v39 }
 0x327   :  { %4629 = vmatpush1.bf16.msra.mxu1 %v5897_v54  ;;  %4466 = vmatprep.subr.bf16.mxu0 %v5904_v47  ;;  %v6157_v54 = vld [vmem:[#allocation9 + $0x148] sm:$0xff]   ;;  %v4765_v47 = vmax.bf16 %v6336_v0, %v4757_v41 }
 0x328   :  { %4630 = vmatprep.subr.bf16.mxu1 %v5906_v49  ;;  %v6158_v49 = vld [vmem:[#allocation9 + $0x1c8] sm:$0xff]  }
 0x32a   :  { %4467 = vmatpush1.bf16.msra.mxu0 %v5903_v53  ;;  %v6163_v53 = vld [vmem:[#allocation9 + $0x110] sm:$0xff]  }
 0x32b   :  { %4631 = vmatpush1.bf16.msra.mxu1 %v5905_v30  ;;  %5972 = vmatprep.subr.bf16.mxu0 %v6121_v56  ;;  %v6164_v30 = vld [vmem:[#allocation9 + $0x190] sm:$0xff]   ;;  %v6165_v56 = vld [vmem:[#allocation9 + $0x158] sm:$0xff]  }
 0x32c   :  { %5994 = vmatprep.subr.bf16.mxu1 %v6122_v57  ;;  %v6166_v57 = vld [vmem:[#allocation9 + $0x1d8] sm:$0xff]  }
 0x32d   :  { %4469 = vmatmul.mubr.bf16.vlgmr.msra.gmra.mrb[12].mxu0 %v6573_v6 }
 0x32e   :  { %4633 = vmatmul.mubr.bf16.vlgmr.msra.gmra.mrb[12].mxu1 %v6573_v6  ;;  %5973 = vmatpush3.bf16.msra.mxu0 %v6123_v8  ;;  %v6134_v6 = vld [vmem:[#allocation9 + $0xd8] sm:$0xff]   ;;  %v6169_v8 = vld [vmem:[#allocation9 + $0x160] sm:$0xff]  }
 0x32f   :  { %5194 = vmatprep.mubr.bf16.mxu0 %v4764_v48  ;;  %5995 = vmatpush3.bf16.msra.mxu1 %v6124_v19  ;;  %v6170_v19 = vld [vmem:[#allocation9 + $0x1e0] sm:$0xff]  }
 0x330   :  { %5234 = vmatprep.mubr.bf16.mxu1 %v4766_v63  ;;  %5974 = vmatprep.subr.bf16.mxu0 %v6125_v59  ;;  %v6171_v59 = vld [vmem:[#allocation9 + $0x120] sm:$0xff]   ;;  %v6174_v63 = vld [vmem:[#allocation9 + $0x1e8] sm:$0xff]  }
 0x331   :  { %5996 = vmatprep.subr.bf16.mxu1 %v6126_v61  ;;  %v6172_v48 = vld [vmem:[#allocation9 + $0x1a0] sm:$0xff]   ;;  %v6173_v61 = vld [vmem:[#allocation9 + $0x168] sm:$0xff]  }
 0x332   :  { %5975 = vmatpush3.bf16.msra.mxu0 %v6127_v1  ;;  %v6175_v1 = vld [vmem:[#allocation9 + $0x128] sm:$0xff]  }
 0x333   :  { %5997 = vmatpush3.bf16.msra.mxu1 %v6128_v2  ;;  %5976 = vmatprep.subr.bf16.mxu0 %v6129_v3  ;;  %v6176_v2 = vld [vmem:[#allocation9 + $0x1a8] sm:$0xff]   ;;  %v6178_v3 = vld [vmem:[#allocation9 + $0x170] sm:$0xff]  }
 0x334   :  { %5998 = vmatprep.subr.bf16.mxu1 %v6130_v45  ;;  %v6179_v45 = vld [vmem:[#allocation9 + $0x1f0] sm:$0xff]  }
 0x336   :  { %5977 = vmatpush3.bf16.msra.mxu0 %v6131_v4  ;;  %v6180_v4 = vld [vmem:[#allocation9 + $0x130] sm:$0xff]  }
 0x337   :  { %5999 = vmatpush3.bf16.msra.mxu1 %v6132_v9  ;;  %5978 = vmatprep.subr.bf16.mxu0 %v6133_v27  ;;  %v6181_v9 = vld [vmem:[#allocation9 + $0x1b0] sm:$0xff]   ;;  %v6182_v27 = vld [vmem:[#allocation9 + $0x178] sm:$0xff]  }
 0x338   :  { %6000 = vmatprep.subr.bf16.mxu1 %v6134_v6  ;;  %v6183_v6 = vld [vmem:[#allocation9 + $0x1f8] sm:$0xff]  }
 0x33a   :  { %5979 = vmatpush3.bf16.msra.mxu0 %v6135_v25  ;;  %v6184_v25 = vld [vmem:[#allocation9 + $0x138] sm:$0xff]  }
 0x33b   :  { %6001 = vmatpush3.bf16.msra.mxu1 %v6136_v10  ;;  %5980 = vmatprep.subr.bf16.mxu0 %v6137_v11  ;;  %v6185_v10 = vld [vmem:[#allocation9 + $0x1b8] sm:$0xff]   ;;  %v4650_v11 = vcombine.high %v6599_v55, %v6599_v55 }
 0x33c   :  { %6002 = vmatprep.subr.bf16.mxu1 %v6138_v13 }
 0x33d   :  { %v4664_v12 = vrot.slane %v4650_v11, %v6479_v21 }
 0x33e   :  { %5981 = vmatpush3.bf16.msra.mxu0 %v6139_v16 }
 0x33f   :  { %6003 = vmatpush3.bf16.msra.mxu1 %v6140_v17  ;;  %5982 = vmatprep.subr.bf16.mxu0 %v6141_v18  ;;  %v4666_v13 = vcombine.high %v4664_v12, %v4664_v12  ;;  %v4680_v16 = vrot.slane %v4664_v12, %v6479_v21 }
 0x340   :  { %6004 = vmatprep.subr.bf16.mxu1 %v6142_v24 }
 0x341   :  { %v4694_v17 = vrot.slane %v4666_v13, %v6479_v21  ;;  %v4696_v18 = vcombine.high %v4680_v16, %v4680_v16  ;;  %v4728_v24 = vpack.i.b16 %v4680_v16, %v4680_v16 }
 0x342   :  { %5983 = vmatpush3.bf16.msra.mxu0 %v6143_v26 }
 0x343   :  { %6005 = vmatpush3.bf16.msra.mxu1 %v6144_v22  ;;  %5984 = vmatprep.subr.bf16.mxu0 %v6145_v31  ;;  %v4698_v23 = vcombine.high %v4694_v17, %v4694_v17  ;;  %v4742_v26 = vpack.i.b16 %v4696_v18, %v4696_v18  ;;  %v4735_v7 = vpack.i.b16 %v4694_v17, %v4694_v17 }
 0x344   :  { %6006 = vmatprep.subr.bf16.mxu1 %v6146_v62  ;;  %v4733_v31 = vrot.slane %v4728_v24, %v6491_v28 }
 0x345   :  { %v4749_v22 = vpack.i.b16 %v4698_v23, %v4698_v23  ;;  %v4747_v62 = vrot.slane %v4742_v26, %v6491_v28  ;;  %v4740_v55 = vrot.slane %v4735_v7, %v6491_v28 }
 0x346   :  { %5985 = vmatpush3.bf16.msra.mxu0 %v6147_v32 }
 0x347   :  { %6007 = vmatpush3.bf16.msra.mxu1 %v6148_v46  ;;  %5986 = vmatprep.subr.bf16.mxu0 %v6149_v35  ;;  %v4754_v46 = vrot.slane %v4749_v22, %v6491_v28 }
 0x348   :  { %6008 = vmatprep.subr.bf16.mxu1 %v6150_v38 }
 0x34a   :  { %5987 = vmatpush3.bf16.msra.mxu0 %v6151_v43 }
 0x34b   :  { %6009 = vmatpush3.bf16.msra.mxu1 %v6152_v40  ;;  %6016 = vmatprep.subr.bf16.mxu0 %v6153_v14 }
 0x34c   :  { %6038 = vmatprep.subr.bf16.mxu1 %v6154_v42 }
 0x34d   :  { %5195 = vmatmul.mubr.bf16.vlgmr.msra.gmra.mrb[16].mxu0 %v4763_v44 }
 0x34e   :  { %5235 = vmatmul.mubr.bf16.vlgmr.msra.gmra.mrb[16].mxu1 %v4765_v47  ;;  %6017 = vmatpush3.bf16.msra.mxu0 %v6155_v60 }
 0x34f   :  { %6039 = vmatpush3.bf16.msra.mxu1 %v6156_v20  ;;  %6018 = vmatprep.subr.bf16.mxu0 %v6157_v54 }
 0x350   :  { %6040 = vmatprep.subr.bf16.mxu1 %v6158_v49 }
 0x352   :  { %6019 = vmatpush3.bf16.msra.mxu0 %v6159_v50  ;;  %v5907_v50 = vld [vmem:[#allocation10] ss:$0 sm:$0xff] }
 0x353   :  { %6041 = vmatpush3.bf16.msra.mxu1 %v6160_v51  ;;  %6020 = vmatprep.subr.bf16.mxu0 %v6161_v15 }
 0x354   :  { %6042 = vmatprep.subr.bf16.mxu1 %v6162_v52 }
 0x356   :  { %6021 = vmatpush3.bf16.msra.mxu0 %v6163_v53 }
 0x357   :  { %6043 = vmatpush3.bf16.msra.mxu1 %v6164_v30  ;;  %6022 = vmatprep.subr.bf16.mxu0 %v6165_v56 }
 0x358   :  { %6044 = vmatprep.subr.bf16.mxu1 %v6166_v57 }
 0x35a   :  { %6023 = vmatpush3.bf16.msra.mxu0 %v6167_v29 }
 0x35b   :  { %6045 = vmatpush3.bf16.msra.mxu1 %v6168_v58  ;;  %6024 = vmatprep.subr.bf16.mxu0 %v6169_v8 }
 0x35c   :  { %6046 = vmatprep.subr.bf16.mxu1 %v6170_v19 }
 0x35e   :  { %6025 = vmatpush3.bf16.msra.mxu0 %v6171_v59 }
 0x35f   :  { %6047 = vmatpush3.bf16.msra.mxu1 %v6172_v48  ;;  %6026 = vmatprep.subr.bf16.mxu0 %v6173_v61 }
 0x360   :  { %6048 = vmatprep.subr.bf16.mxu1 %v6174_v63 }
 0x362   :  { %6027 = vmatpush3.bf16.msra.mxu0 %v6175_v1 }
 0x363   :  { %6049 = vmatpush3.bf16.msra.mxu1 %v6176_v2  ;;  %6028 = vmatprep.subr.bf16.mxu0 %v6178_v3 }
 0x364   :  { %6050 = vmatprep.subr.bf16.mxu1 %v6179_v45 }
 0x366   :  { %6029 = vmatpush3.bf16.msra.mxu0 %v6180_v4 }
 0x367   :  { %6051 = vmatpush3.bf16.msra.mxu1 %v6181_v9  ;;  %6030 = vmatprep.subr.bf16.mxu0 %v6182_v27 }
 0x368   :  { %6052 = vmatprep.subr.bf16.mxu1 %v6183_v6 }
 0x36a   :  { %6031 = vmatpush3.bf16.msra.mxu0 %v6184_v25 }
 0x36b   :  { %6053 = vmatpush3.bf16.msra.mxu1 %v6185_v10 }
 0x400   :  { %v4470_v5 = vpop.f32.mrb[12].mxu0 }
 0x401   :  { %v4645_v32 = vpack.c.bf16 %v4470_v5, %v4470_v5  ;;  %v4634_v33 = vpop.f32.mrb[12].mxu1  ;;  %v4472_v34 = vpop.f32.mrb[13].mxu0 }
 0x402   :  { %v4647_v35 = vpack.c.bf16 %v4634_v33, %v4634_v33  ;;  %v4646_v21 = vpack.c.bf16 %v4472_v34, %v4472_v34  ;;  %v4636_v36 = vpop.f32.mrb[13].mxu1  ;;  %v4474_v37 = vpop.f32.mrb[14].mxu0 }
 0x403   :  { %v4759_v38 = vadd.bf16 %v4733_v31, %v4645_v32  ;;  %v4648_v43 = vpack.c.bf16 %v4636_v36, %v4636_v36  ;;  %v4638_v39 = vpop.f32.mrb[14].mxu1  ;;  %v4475_v40 = vpop.f32.mrb[15].mxu0 }
 0x404   :  { %v4761_v14 = vadd.bf16 %v4747_v62, %v4647_v35  ;;  %v4760_v41 = vadd.bf16 %v4740_v55, %v4646_v21  ;;  %v4639_v42 = vpop.f32.mrb[15].mxu1 }
 0x405   :  { %v4762_v60 = vadd.bf16 %v4754_v46, %v4648_v43  ;;  %v4767_v20 = vmax.bf16 %v6336_v0, %v4759_v38 }
 0x406   :  { %v4768_v44 = vmax.bf16 %v6336_v0, %v4760_v41  ;;  %v4769_v28 = vmax.bf16 %v6336_v0, %v4761_v14 }
 0x407   :  { %v4770_v54 = vmax.bf16 %v6336_v0, %v4762_v60 }
 0x408   :  { %5274 = vmatprep.mubr.bf16.mxu0 %v4768_v44 }
 0x409   :  { %5314 = vmatprep.mubr.bf16.mxu1 %v4770_v54  ;;  %5275 = vmatmul.mubr.bf16.vlgmr.msra.gmra.mrb[20].mxu0 %v4767_v20 }
 0x40a   :  { %5315 = vmatmul.mubr.bf16.vlgmr.msra.gmra.mrb[20].mxu1 %v4769_v28 }
 0x420   :  { %v5988_v47 = vpop.f32.mrb[16].mxu0 }
 0x421   :  { %v6010_v49 = vpop.f32.mrb[16].mxu1  ;;  %v5989_v51 = vpop.f32.mrb[17].mxu0 }
 0x422   :  { %v5990_v15 = vadd.f32 %v5989_v51, %v5988_v47  ;;  %v6011_v52 = vpop.f32.mrb[17].mxu1  ;;  %v5991_v53 = vpop.f32.mrb[18].mxu0 }
 0x423   :  { %v6012_v30 = vadd.f32 %v6011_v52, %v6010_v49  ;;  %v6013_v56 = vpop.f32.mrb[18].mxu1  ;;  %v5992_v57 = vpop.f32.mrb[19].mxu0 }
 0x424   :  { %v5197_v29 = vadd.f32 %v5990_v15, %v5907_v50  ;;  %v6014_v58 = vpop.f32.mrb[19].mxu1 }
 0x426   :  { %v5237_v8 = vadd.f32 %v6012_v30, %v5197_v29 }
 0x4dc   :  { %v6032_v19 = vpop.f32.mrb[20].mxu0 }
 0x4dd   :  { %v6054_v59 = vpop.f32.mrb[20].mxu1  ;;  %v6033_v0 = vpop.f32.mrb[21].mxu0 }
 0x4de   :  { %v6034_v48 = vadd.f32 %v6033_v0, %v6032_v19  ;;  %v6055_v61 = vpop.f32.mrb[21].mxu1  ;;  %v6035_v63 = vpop.f32.mrb[22].mxu0 }
 0x4df   :  { %v6056_v1 = vadd.f32 %v6055_v61, %v6054_v59  ;;  %v6057_v2 = vpop.f32.mrb[22].mxu1  ;;  %v6036_v3 = vpop.f32.mrb[23].mxu0 }
 0x4e0   :  { %v5277_v45 = vadd.f32 %v6034_v48, %v5237_v8  ;;  %v6058_v4 = vpop.f32.mrb[23].mxu1 }
 0x4e2   :  { %v5317_v9 = vadd.f32 %v6056_v1, %v5277_v45 }
 0x4e4   :  { %5322 = vst [vmem:[%s6651_s7] sm:$0xff] %v5317_v9 }
 0x4e5   :  { %5327 = vsyncpa [#allocation3], 1 }
 0x4e6   :  { %5328 = vsyncpa [#allocation5], 1 }
 0x4e7   :  { %5329 = vsyncpa [#allocation8], 1 }
 0x4e8   :  { %5330 = vsyncpa [#allocation11], 1 }

</bundles_post_ra>
